<compile_context>
chip_gen: v6e
topology: v6e:2x2x1
jax: 0.10.0
libtpu: 0.0.40
codegen_flags: <defaults>
</compile_context>

<pallas_src>
import functools

import jax
import jax.numpy as jnp
from jax import lax
from jax.experimental import pallas as pl
from jax.experimental.pallas import tpu as pltpu

LANE = 128
EPS = 1e-3  # BatchNorm2d(out_channels, eps=0.001) in the reference module.
VMEM_LIMIT = 32 * 1024 * 1024  # safe on v5e/v6e/v7x


def _round_up(x, m):
    return (x + m - 1) // m * m


def _block_m(m):
    if m >= 1024:
        return 512
    if m >= 256:
        return 256
    if m >= 128:
        return 128
    return _round_up(m, 8)


# ----------------------------------------------------------------------------
# Kernel 1: tiled matmul (used by the 1x1 convs and the im2col'd stride-2 convs)
# ----------------------------------------------------------------------------
def _matmul_kernel(x_ref, w_ref, o_ref):
    o_ref[...] = jnp.dot(x_ref[...].astype(jnp.bfloat16),
                         w_ref[...].astype(jnp.bfloat16),
                         preferred_element_type=jnp.float32)


def matmul_lanedense(x2d, w2d):
    """(M, K) @ (K, Cp) -> (Mp, Cp) f32, Cp % 128 == 0, M padded with zero rows."""
    M, K = x2d.shape
    Cp = w2d.shape[1]
    bm = _block_m(M)
    Mp = _round_up(M, bm)
    if Mp != M:
        x2d = jnp.pad(x2d, ((0, Mp - M), (0, 0)))
    grid = (Mp // bm, Cp // LANE)
    return pl.pallas_call(
        _matmul_kernel,
        grid=grid,
        in_specs=[pl.BlockSpec((bm, K), lambda i, j: (i, 0)),
                  pl.BlockSpec((K, LANE), lambda i, j: (0, j))],
        out_specs=pl.BlockSpec((bm, LANE), lambda i, j: (i, j)),
        out_shape=jax.ShapeDtypeStruct((Mp, Cp), jnp.float32),
        compiler_params=pltpu.CompilerParams(
            dimension_semantics=("parallel", "parallel"),
            vmem_limit_bytes=VMEM_LIMIT),
        cost_estimate=pl.CostEstimate(
            flops=2 * Mp * K * Cp, transcendentals=0,
            bytes_accessed=4 * (Mp * K + K * Cp + Mp * Cp)),
    )(x2d, w2d)


# ----------------------------------------------------------------------------
# Kernel 2: lane-dense BN scale/bias + ReLU epilogue
# ----------------------------------------------------------------------------
def _scale_bias_relu_kernel(x_ref, s_ref, b_ref, o_ref):
    o_ref[...] = jnp.maximum(x_ref[...] * s_ref[...] + b_ref[...], 0.0)


def scale_bias_relu(y2d, scale, bias):
    M, Cp = y2d.shape
    bm = _block_m(M)
    Mp = _round_up(M, bm)
    if Mp != M:
        y2d = jnp.pad(y2d, ((0, Mp - M), (0, 0)))
    grid = (Mp // bm, Cp // LANE)
    out = pl.pallas_call(
        _scale_bias_relu_kernel,
        grid=grid,
        in_specs=[pl.BlockSpec((bm, LANE), lambda i, j: (i, j)),
                  pl.BlockSpec((1, LANE), lambda i, j: (0, j)),
                  pl.BlockSpec((1, LANE), lambda i, j: (0, j))],
        out_specs=pl.BlockSpec((bm, LANE), lambda i, j: (i, j)),
        out_shape=jax.ShapeDtypeStruct((Mp, Cp), jnp.float32),
        compiler_params=pltpu.CompilerParams(
            dimension_semantics=("parallel", "parallel")),
    )(y2d, scale.reshape(1, Cp), bias.reshape(1, Cp))
    return out[:M]


# ----------------------------------------------------------------------------
# Kernel 3: 3x3 stride-1 pad-1 conv with in-kernel 9-tap accumulation
# (no 9x im2col in HBM: the padded image is row-flattened so every tap is a
#  contiguous window; width-edge taps are masked on the VPU).
# ----------------------------------------------------------------------------
def _conv3x3_s1_kernel(x_ref, w_ref, o_ref, *, H, W):
    HW = H * W
    cin = x_ref.shape[2]
    cout = o_ref.shape[2]
    col = lax.broadcasted_iota(jnp.int32, (HW, cin), 0) % W
    not_left = col != 0
    not_right = col != (W - 1)
    acc = jnp.zeros((HW, cout), jnp.float32)
    for di in range(3):
        for dj in range(3):
            start = di * W + dj
            lhs = x_ref[0, start:start + HW, :].astype(jnp.bfloat16)
            if dj == 0:
                lhs = jnp.where(not_left, lhs, jnp.zeros_like(lhs))
            elif dj == 2:
                lhs = jnp.where(not_right, lhs, jnp.zeros_like(lhs))
            acc = acc + jnp.dot(lhs,
                                w_ref[di * 3 + dj].astype(jnp.bfloat16),
                                preferred_element_type=jnp.float32)
    o_ref[0] = acc


def _flatten_height_padded(x_nhwc, pad_value):
    # (N,H,W,C) -> (N, (H+2)*W + 2, C): pad H by 1 each side, flatten (H,W),
    # then one extra pad row front/back so every 3x3 tap is a contiguous window.
    N, H, W, C = x_nhwc.shape
    xh = jnp.pad(x_nhwc, ((0, 0), (1, 1), (0, 0), (0, 0)),
                 constant_values=pad_value)
    xf = xh.reshape(N, (H + 2) * W, C)
    return jnp.pad(xf, ((0, 0), (1, 1), (0, 0)), constant_values=pad_value)


def conv3x3_s1(x_nhwc, w_oihw):
    # TODO(synk): for very large H*W, tile the spatial dim too (per-image blocks
    # are sufficient for these shapes).
    N, H, W, Cin = x_nhwc.shape
    Cout = w_oihw.shape[0]
    Cp = _round_up(Cout, LANE)
    HW = H * W
    L = (H + 2) * W + 2
    xf = _flatten_height_padded(x_nhwc, 0.0)
    w = jnp.transpose(w_oihw, (2, 3, 1, 0)).reshape(9, Cin, Cout)
    w = jnp.pad(w, ((0, 0), (0, 0), (0, Cp - Cout)))
    kern = functools.partial(_conv3x3_s1_kernel, H=H, W=W)
    y = pl.pallas_call(
        kern,
        grid=(N, Cp // LANE),
        in_specs=[pl.BlockSpec((1, L, Cin), lambda n, c: (n, 0, 0)),
                  pl.BlockSpec((9, Cin, LANE), lambda n, c: (0, 0, c))],
        out_specs=pl.BlockSpec((1, HW, LANE), lambda n, c: (n, 0, c)),
        out_shape=jax.ShapeDtypeStruct((N, HW, Cp), jnp.float32),
        compiler_params=pltpu.CompilerParams(
            dimension_semantics=("parallel", "parallel"),
            vmem_limit_bytes=VMEM_LIMIT),
        cost_estimate=pl.CostEstimate(
            flops=2 * N * HW * 9 * Cin * Cp, transcendentals=0,
            bytes_accessed=4 * (N * L * Cin + 9 * Cin * Cp + N * HW * Cp)),
    )(xf, w)
    return y.reshape(N * HW, Cp)  # rows ordered (n, h, w)


# ----------------------------------------------------------------------------
# Kernel 4: 3x3 max-pool, 9 taps reduced in-kernel (stride-1 running max;
# the stride-2 subsample is a cheap wrapper-side slice).
# ----------------------------------------------------------------------------
def _maxpool3x3_s1_kernel(x_ref, o_ref, *, H, W):
    HW = H * W
    c = x_ref.shape[2]
    col = lax.broadcasted_iota(jnp.int32, (HW, c), 0) % W
    not_left = col != 0
    not_right = col != (W - 1)
    neg = jnp.full((HW, c), -jnp.inf, jnp.float32)
    acc = neg
    for di in range(3):
        for dj in range(3):
            start = di * W + dj
            v = x_ref[0, start:start + HW, :]
            if dj == 0:
                v = jnp.where(not_left, v, neg)
            elif dj == 2:
                v = jnp.where(not_right, v, neg)
            acc = jnp.maximum(acc, v)
    o_ref[0] = acc


def maxpool3x3_s2(x_nhwc):
    N, H, W, C = x_nhwc.shape
    HW = H * W
    L = (H + 2) * W + 2
    xf = _flatten_height_padded(x_nhwc, -jnp.inf)
    kern = functools.partial(_maxpool3x3_s1_kernel, H=H, W=W)
    y = pl.pallas_call(
        kern,
        grid=(N,),
        in_specs=[pl.BlockSpec((1, L, C), lambda n: (n, 0, 0))],
        out_specs=pl.BlockSpec((1, HW, C), lambda n: (n, 0, 0)),
        out_shape=jax.ShapeDtypeStruct((N, HW, C), jnp.float32),
        compiler_params=pltpu.CompilerParams(
            dimension_semantics=("parallel",)),
    )(xf)
    # k=3, s=2, p=1 max-pool == stride-1 running max sampled at even positions.
    return y.reshape(N, H, W, C)[:, ::2, ::2, :]


# ----------------------------------------------------------------------------
# BasicConv2d = conv + training-mode BatchNorm (batch stats, beta=0) + ReLU
# ----------------------------------------------------------------------------
def _batchnorm_relu(y2d, gamma, m_true, cout_true):
    # y2d: (Mp, Cp) raw conv output.  Any padded rows are exact zeros (zero LHS
    # rows), so sums over all rows divided by the true element count are exact.
    Cp = y2d.shape[1]
    g = jnp.pad(gamma.astype(jnp.float32), (0, Cp - cout_true),
                constant_values=1.0)
    s1 = jnp.sum(y2d, axis=0)
    s2 = jnp.sum(y2d * y2d, axis=0)
    mean = s1 / m_true
    var = jnp.maximum(s2 / m_true - mean * mean, 0.0)  # biased var (BN forward)
    scale = g * lax.rsqrt(var + EPS)
    bias = -mean * scale  # beta == 0 at init
    out = scale_bias_relu(y2d, scale, bias)
    return out[:m_true, :cout_true]


def basic_conv1x1_dual(x_nhwc, w_a, g_a, w_b, g_b):
    """Two 1x1 reduce convs on the same input fused into one wider matmul."""
    N, H, W, Cin = x_nhwc.shape
    ca, cb = w_a.shape[0], w_b.shape[0]
    Cout = ca + cb
    Cp = _round_up(Cout, LANE)
    w2d = jnp.concatenate([w_a.reshape(ca, Cin), w_b.reshape(cb, Cin)], axis=0).T
    w2d = jnp.pad(w2d, ((0, 0), (0, Cp - Cout)))
    gamma = jnp.concatenate([g_a, g_b])
    x2d = x_nhwc.reshape(N * H * W, Cin)
    y = matmul_lanedense(x2d, w2d)
    out = _batchnorm_relu(y, gamma, N * H * W, Cout).reshape(N, H, W, Cout)
    return out[..., :ca], out[..., ca:]


def basic_conv3x3_s1(x_nhwc, w_oihw, gamma):
    N, H, W, _ = x_nhwc.shape
    Cout = w_oihw.shape[0]
    y = conv3x3_s1(x_nhwc, w_oihw)
    out = _batchnorm_relu(y, gamma, N * H * W, Cout)
    return out.reshape(N, H, W, Cout)


def basic_conv3x3_s2(x_nhwc, w_oihw, gamma):
    # Stride-2: small wrapper-side im2col (~2.25x input) + tiled matmul kernel.
    N, H, W, Cin = x_nhwc.shape
    Cout = w_oihw.shape[0]
    Cp = _round_up(Cout, LANE)
    Ho, Wo = (H - 1) // 2 + 1, (W - 1) // 2 + 1
    xp = jnp.pad(x_nhwc, ((0, 0), (1, 1), (1, 1), (0, 0)))
    slices = []
    for di in range(3):
        for dj in range(3):
            slices.append(xp[:, di:di + 2 * (Ho - 1) + 1:2,
                             dj:dj + 2 * (Wo - 1) + 1:2, :])
    patches = jnp.concatenate(slices, axis=-1).reshape(N * Ho * Wo, 9 * Cin)
    w2d = jnp.transpose(w_oihw, (2, 3, 1, 0)).reshape(9 * Cin, Cout)
    w2d = jnp.pad(w2d, ((0, 0), (0, Cp - Cout)))
    y = matmul_lanedense(patches, w2d)
    out = _batchnorm_relu(y, gamma, N * Ho * Wo, Cout)
    return out.reshape(N, Ho, Wo, Cout)


# ----------------------------------------------------------------------------
# Inception_downsample forward (NCHW in / NCHW out, as in the PyTorch module)
# ----------------------------------------------------------------------------
def inception_downsample(x_nchw, params):
    x = jnp.transpose(x_nchw, (0, 2, 3, 1)).astype(jnp.float32)  # -> NHWC

    # fused 1x1 reduces (both branches share the input)
    r2, r3 = basic_conv1x1_dual(
        x, params["w_3x3_reduce"], params["g_3x3_reduce"],
        params["w_d_reduce"], params["g_d_reduce"])

    # branch 2: 1x1 reduce -> 3x3 stride 2
    x2 = basic_conv3x3_s2(r2, params["w_3x3"], params["g_3x3"])

    # branch 3: 1x1 reduce -> 3x3 stride 1 -> 3x3 stride 2
    x3 = basic_conv3x3_s1(r3, params["w_d_a"], params["g_d_a"])
    x3 = basic_conv3x3_s2(x3, params["w_d_b"], params["g_d_b"])

    # branch 4: max_pool2d(kernel=3, stride=2, padding=1)
    x4 = maxpool3x3_s2(x)

    out = jnp.concatenate([x2, x3, x4], axis=-1)  # channel concat (NHWC)
    return jnp.transpose(out, (0, 3, 1, 2))       # back to NCHW


# ----------------------------------------------------------------------------
# Pure-JAX reference (f32 convs, training-mode BN) for a correctness guard.
# ----------------------------------------------------------------------------
def _ref_conv_bn_relu(x, w_oihw, gamma, stride, pad):
    y = lax.conv_general_dilated(
        x, jnp.transpose(w_oihw, (2, 3, 1, 0)),
        window_strides=(stride, stride),
        padding=((pad, pad), (pad, pad)),
        dimension_numbers=("NHWC", "HWIO", "NHWC"))
    mean = jnp.mean(y, axis=(0, 1, 2))
    var = jnp.var(y, axis=(0, 1, 2))
    y = (y - mean) * (gamma / jnp.sqrt(var + EPS))
    return jnp.maximum(y, 0.0)


def inception_downsample_reference(x_nchw, p):
    x = jnp.transpose(x_nchw, (0, 2, 3, 1)).astype(jnp.float32)
    x2 = _ref_conv_bn_relu(x, p["w_3x3_reduce"], p["g_3x3_reduce"], 1, 0)
    x2 = _ref_conv_bn_relu(x2, p["w_3x3"], p["g_3x3"], 2, 1)
    x3 = _ref_conv_bn_relu(x, p["w_d_reduce"], p["g_d_reduce"], 1, 0)
    x3 = _ref_conv_bn_relu(x3, p["w_d_a"], p["g_d_a"], 1, 1)
    x3 = _ref_conv_bn_relu(x3, p["w_d_b"], p["g_d_b"], 2, 1)
    x4 = lax.reduce_window(
        x, jnp.array(-jnp.inf, x.dtype), lax.max,
        window_dimensions=(1, 3, 3, 1), window_strides=(1, 2, 2, 1),
        padding=((0, 0), (1, 1), (1, 1), (0, 0)))
    out = jnp.concatenate([x2, x3, x4], axis=-1)
    return jnp.transpose(out, (0, 3, 1, 2))


# ----------------------------------------------------------------------------
# Deterministic parameter init (matches module __init__ shapes / init scheme)
# ----------------------------------------------------------------------------
def init_params(key, nc_in, nc_3x3_reduce, nc_3x3,
                nc_double_3x3_reduce, nc_double_3x3_a, nc_double_3x3_b):
    def kaiming(k, cout, cin, ks):
        fan_in = cin * ks * ks
        std = (2.0 / fan_in) ** 0.5
        return std * jax.random.normal(k, (cout, cin, ks, ks), jnp.float32)

    def gamma(k, c):
        return 1.0 + 0.02 * jax.random.normal(k, (c,), jnp.float32)

    ks = jax.random.split(key, 10)
    return {
        "w_3x3_reduce": kaiming(ks[0], nc_3x3_reduce, nc_in, 1),
        "g_3x3_reduce": gamma(ks[1], nc_3x3_reduce),
        "w_3x3":        kaiming(ks[2], nc_3x3, nc_3x3_reduce, 3),
        "g_3x3":        gamma(ks[3], nc_3x3),
        "w_d_reduce":   kaiming(ks[4], nc_double_3x3_reduce, nc_in, 1),
        "g_d_reduce":   gamma(ks[5], nc_double_3x3_reduce),
        "w_d_a":        kaiming(ks[6], nc_double_3x3_a, nc_double_3x3_reduce, 3),
        "g_d_a":        gamma(ks[7], nc_double_3x3_a),
        "w_d_b":        kaiming(ks[8], nc_double_3x3_b, nc_double_3x3_a, 3),
        "g_d_b":        gamma(ks[9], nc_double_3x3_b),
    }


if __name__ == "__main__":
    key = jax.random.PRNGKey(0)
    k_x, k_p = jax.random.split(key)

    nc_in, nc_3x3_reduce, nc_3x3 = 4, 8, 8
    nc_d_reduce, nc_d_a, nc_d_b = 8, 8, 8

    x = jax.random.normal(k_x, (2, nc_in, 16, 16), jnp.float32)  # NCHW
    params = init_params(k_p, nc_in, nc_3x3_reduce, nc_3x3,
                         nc_d_reduce, nc_d_a, nc_d_b)

    fwd = jax.jit(inception_downsample)
    out = jax.block_until_ready(fwd(x, params))

    # Output: (N, nc_3x3 + nc_double_3x3_b + nc_in, H//2, W//2)
    assert out.shape == (2, nc_3x3 + nc_d_b + nc_in, 8, 8), out.shape
    assert out.dtype == jnp.float32

    # Correctness guard vs. a pure-JAX reference (loose tolerance for the
    # in-kernel bf16 MXU inputs; real bugs would show O(1) errors).
    ref = jax.block_until_ready(inception_downsample_reference(x, params))
    err = float(jnp.max(jnp.abs(out - ref)))
    assert err < 0.15, f"max abs err vs reference: {err}"

    print("KERNEL_OK")
</pallas_src>

<mosaic_0001>
module attributes {stable_mosaic.version = 11 : i64} {
  func.func @_maxpool3x3_s1_kernel(%arg0: i32, %arg1: memref<1x290x4xf32, #tpu.memory_space<vmem>>, %arg2: memref<1x256x4xf32, #tpu.memory_space<vmem>>) attributes {dimension_semantics = [#tpu.dimension_semantics<parallel>], iteration_bounds = array<i64: 2>, scalar_prefetch = 0 : i64, scratch_operands = 0 : i64, tpu.core_type = #tpu.core_type<tc>, window_params = [{transform_indices = @transform_0, window_bounds = array<i64: 1, 290, 4>}, {transform_indices = @transform_1, window_bounds = array<i64: 1, 256, 4>}]} {
    %0 = tpu.iota {dimensions = array<i32: 0>} : vector<256x4xi32>
    %c16_i32 = arith.constant 16 : i32
    %c0_i32 = arith.constant 0 : i32
    %1 = arith.cmpi eq, %c16_i32, %c0_i32 : i32
    %c1_i32 = arith.constant 1 : i32
    %2 = arith.select %1, %c1_i32, %c16_i32 : i32
    %3 = vector.broadcast %2 : i32 to vector<256x4xi32>
    %4 = arith.remsi %0, %3 : vector<256x4xi32>
    %c0_i32_0 = arith.constant 0 : i32
    %5 = vector.broadcast %c0_i32_0 : i32 to vector<256x4xi32>
    %6 = arith.cmpi ne, %4, %5 : vector<256x4xi32>
    %c0_i32_1 = arith.constant 0 : i32
    %7 = vector.broadcast %c0_i32_1 : i32 to vector<256x4xi32>
    %8 = arith.cmpi slt, %4, %7 : vector<256x4xi32>
    %c0_i32_2 = arith.constant 0 : i32
    %9 = arith.cmpi slt, %2, %c0_i32_2 : i32
    %10 = vector.broadcast %9 : i1 to vector<256x4xi1>
    %11 = vector.broadcast %10 : vector<256x4xi1> to vector<256x4xi1>
    %12 = arith.xori %8, %11 : vector<256x4xi1>
    %13 = arith.andi %12, %6 : vector<256x4xi1>
    %14 = vector.broadcast %2 : i32 to vector<256x4xi32>
    %15 = arith.addi %4, %14 : vector<256x4xi32>
    %16 = arith.select %13, %15, %4 : vector<256x4xi1>, vector<256x4xi32>
    %c0_i32_3 = arith.constant 0 : i32
    %17 = vector.broadcast %c0_i32_3 : i32 to vector<256x4xi32>
    %18 = arith.cmpi ne, %16, %17 : vector<256x4xi32>
    %c15_i32 = arith.constant 15 : i32
    %19 = vector.broadcast %c15_i32 : i32 to vector<256x4xi32>
    %20 = arith.cmpi ne, %16, %19 : vector<256x4xi32>
    %cst = arith.constant 0xFF800000 : f32
    %21 = vector.broadcast %cst : f32 to vector<256x4xf32>
    %c0 = arith.constant 0 : index
    %c0_4 = arith.constant 0 : index
    %c0_5 = arith.constant 0 : index
    %22 = vector.load %arg1[%c0, %c0_4, %c0_5] : memref<1x290x4xf32, #tpu.memory_space<vmem>>, vector<1x256x4xf32>
    %23 = vector.shape_cast %22 : vector<1x256x4xf32> to vector<256x4xf32>
    %24 = arith.select %18, %23, %21 : vector<256x4xi1>, vector<256x4xf32>
    %25 = arith.maximumf %21, %24 : vector<256x4xf32>
    %c0_6 = arith.constant 0 : index
    %c1 = arith.constant 1 : index
    %c0_7 = arith.constant 0 : index
    %26 = vector.load %arg1[%c0_6, %c1, %c0_7] : memref<1x290x4xf32, #tpu.memory_space<vmem>>, vector<1x256x4xf32>
    %27 = vector.shape_cast %26 : vector<1x256x4xf32> to vector<256x4xf32>
    %28 = arith.maximumf %25, %27 : vector<256x4xf32>
    %c0_8 = arith.constant 0 : index
    %c2 = arith.constant 2 : index
    %c0_9 = arith.constant 0 : index
    %29 = vector.load %arg1[%c0_8, %c2, %c0_9] : memref<1x290x4xf32, #tpu.memory_space<vmem>>, vector<1x256x4xf32>
    %30 = vector.shape_cast %29 : vector<1x256x4xf32> to vector<256x4xf32>
    %31 = arith.select %20, %30, %21 : vector<256x4xi1>, vector<256x4xf32>
    %32 = arith.maximumf %28, %31 : vector<256x4xf32>
    %c0_10 = arith.constant 0 : index
    %c16 = arith.constant 16 : index
    %c0_11 = arith.constant 0 : index
    %33 = vector.load %arg1[%c0_10, %c16, %c0_11] : memref<1x290x4xf32, #tpu.memory_space<vmem>>, vector<1x256x4xf32>
    %34 = vector.shape_cast %33 : vector<1x256x4xf32> to vector<256x4xf32>
    %35 = arith.select %18, %34, %21 : vector<256x4xi1>, vector<256x4xf32>
    %36 = arith.maximumf %32, %35 : vector<256x4xf32>
    %c0_12 = arith.constant 0 : index
    %c17 = arith.constant 17 : index
    %c0_13 = arith.constant 0 : index
    %37 = vector.load %arg1[%c0_12, %c17, %c0_13] : memref<1x290x4xf32, #tpu.memory_space<vmem>>, vector<1x256x4xf32>
    %38 = vector.shape_cast %37 : vector<1x256x4xf32> to vector<256x4xf32>
    %39 = arith.maximumf %36, %38 : vector<256x4xf32>
    %c0_14 = arith.constant 0 : index
    %c18 = arith.constant 18 : index
    %c0_15 = arith.constant 0 : index
    %40 = vector.load %arg1[%c0_14, %c18, %c0_15] : memref<1x290x4xf32, #tpu.memory_space<vmem>>, vector<1x256x4xf32>
    %41 = vector.shape_cast %40 : vector<1x256x4xf32> to vector<256x4xf32>
    %42 = arith.select %20, %41, %21 : vector<256x4xi1>, vector<256x4xf32>
    %43 = arith.maximumf %39, %42 : vector<256x4xf32>
    %c0_16 = arith.constant 0 : index
    %c32 = arith.constant 32 : index
    %c0_17 = arith.constant 0 : index
    %44 = vector.load %arg1[%c0_16, %c32, %c0_17] : memref<1x290x4xf32, #tpu.memory_space<vmem>>, vector<1x256x4xf32>
    %45 = vector.shape_cast %44 : vector<1x256x4xf32> to vector<256x4xf32>
    %46 = arith.select %18, %45, %21 : vector<256x4xi1>, vector<256x4xf32>
    %47 = arith.maximumf %43, %46 : vector<256x4xf32>
    %c0_18 = arith.constant 0 : index
    %c33 = arith.constant 33 : index
    %c0_19 = arith.constant 0 : index
    %48 = vector.load %arg1[%c0_18, %c33, %c0_19] : memref<1x290x4xf32, #tpu.memory_space<vmem>>, vector<1x256x4xf32>
    %49 = vector.shape_cast %48 : vector<1x256x4xf32> to vector<256x4xf32>
    %50 = arith.maximumf %47, %49 : vector<256x4xf32>
    %c0_20 = arith.constant 0 : index
    %c34 = arith.constant 34 : index
    %c0_21 = arith.constant 0 : index
    %51 = vector.load %arg1[%c0_20, %c34, %c0_21] : memref<1x290x4xf32, #tpu.memory_space<vmem>>, vector<1x256x4xf32>
    %52 = vector.shape_cast %51 : vector<1x256x4xf32> to vector<256x4xf32>
    %53 = arith.select %20, %52, %21 : vector<256x4xi1>, vector<256x4xf32>
    %54 = arith.maximumf %50, %53 : vector<256x4xf32>
    %c0_22 = arith.constant 0 : index
    %c0_23 = arith.constant 0 : index
    %c0_24 = arith.constant 0 : index
    %55 = vector.load %arg2[%c0_22, %c0_23, %c0_24] : memref<1x256x4xf32, #tpu.memory_space<vmem>>, vector<1x256x4xf32>
    %56 = vector.shape_cast %55 : vector<1x256x4xf32> to vector<256x4xf32>
    %57 = vector.shape_cast %54 : vector<256x4xf32> to vector<1x256x4xf32>
    tpu.vector_store %arg2[%c0_22, %c0_23, %c0_24], %57 {strides = array<i32>} : memref<1x256x4xf32, #tpu.memory_space<vmem>>, vector<1x256x4xf32>,
    return
  }
  func.func @transform_0(%arg0: i32) -> (i32, i32, i32) {
    %c0_i32 = arith.constant 0 : i32
    %c0_i32_0 = arith.constant 0 : i32
    %c0_i32_1 = arith.constant 0 : i32
    return %arg0, %c0_i32, %c0_i32_0 : i32, i32, i32
  }
  func.func @transform_1(%arg0: i32) -> (i32, i32, i32) {
    %c0_i32 = arith.constant 0 : i32
    %c0_i32_0 = arith.constant 0 : i32
    %c0_i32_1 = arith.constant 0 : i32
    return %arg0, %c0_i32, %c0_i32_0 : i32, i32, i32
  }
}

module attributes {stable_mosaic.version = 11 : i64} {
  func.func @_matmul_kernel(%arg0: i32, %arg1: i32, %arg2: memref<256x4xf32, #tpu.memory_space<vmem>>, %arg3: memref<4x128xf32, #tpu.memory_space<vmem>>, %arg4: memref<256x128xf32, #tpu.memory_space<vmem>>) attributes {dimension_semantics = [#tpu.dimension_semantics<parallel>, #tpu.dimension_semantics<parallel>], iteration_bounds = array<i64: 2, 1>, scalar_prefetch = 0 : i64, scratch_operands = 0 : i64, tpu.core_type = #tpu.core_type<tc>, window_params = [{transform_indices = @transform_0, window_bounds = array<i64: 256, 4>}, {transform_indices = @transform_1, window_bounds = array<i64: 4, 128>}, {transform_indices = @transform_2, window_bounds = array<i64: 256, 128>}]} {
    %c0 = arith.constant 0 : index
    %c0_0 = arith.constant 0 : index
    %0 = vector.load %arg2[%c0, %c0_0] : memref<256x4xf32, #tpu.memory_space<vmem>>, vector<256x4xf32>
    %1 = arith.truncf %0 : vector<256x4xf32> to vector<256x4xbf16>
    %c0_1 = arith.constant 0 : index
    %c0_2 = arith.constant 0 : index
    %2 = vector.load %arg3[%c0_1, %c0_2] : memref<4x128xf32, #tpu.memory_space<vmem>>, vector<4x128xf32>
    %3 = arith.truncf %2 : vector<4x128xf32> to vector<4x128xbf16>
    %cst = arith.constant dense<0.000000e+00> : vector<256x128xf32>
    %4 = tpu.matmul %1, %3, %cst {dimension_numbers = #tpu.dot_dimension_numbers<[1], [0], [0], [1], [0, 0, 1, 1], [], []>} : vector<256x4xbf16>, vector<4x128xbf16>, vector<256x128xf32> -> vector<256x128xf32>
    %c0_3 = arith.constant 0 : index
    %c0_4 = arith.constant 0 : index
    %5 = vector.load %arg4[%c0_3, %c0_4] : memref<256x128xf32, #tpu.memory_space<vmem>>, vector<256x128xf32>
    tpu.vector_store %arg4[%c0_3, %c0_4], %4 {strides = array<i32>} : memref<256x128xf32, #tpu.memory_space<vmem>>, vector<256x128xf32>,
    return
  }
  func.func @transform_0(%arg0: i32, %arg1: i32) -> (i32, i32) {
    %c0_i32 = arith.constant 0 : i32
    %c0_i32_0 = arith.constant 0 : i32
    return %arg0, %c0_i32 : i32, i32
  }
  func.func @transform_1(%arg0: i32, %arg1: i32) -> (i32, i32) {
    %c0_i32 = arith.constant 0 : i32
    %c0_i32_0 = arith.constant 0 : i32
    return %c0_i32, %arg1 : i32, i32
  }
  func.func @transform_2(%arg0: i32, %arg1: i32) -> (i32, i32) {
    %c0_i32 = arith.constant 0 : i32
    return %arg0, %arg1 : i32, i32
  }
}

module attributes {stable_mosaic.version = 11 : i64} {
  func.func @_scale_bias_relu_kernel(%arg0: i32, %arg1: i32, %arg2: memref<256x128xf32, #tpu.memory_space<vmem>>, %arg3: memref<1x128xf32, #tpu.memory_space<vmem>>, %arg4: memref<1x128xf32, #tpu.memory_space<vmem>>, %arg5: memref<256x128xf32, #tpu.memory_space<vmem>>) attributes {dimension_semantics = [#tpu.dimension_semantics<parallel>, #tpu.dimension_semantics<parallel>], iteration_bounds = array<i64: 2, 1>, scalar_prefetch = 0 : i64, scratch_operands = 0 : i64, tpu.core_type = #tpu.core_type<tc>, window_params = [{transform_indices = @transform_0, window_bounds = array<i64: 256, 128>}, {transform_indices = @transform_1, window_bounds = array<i64: 1, 128>}, {transform_indices = @transform_2, window_bounds = array<i64: 1, 128>}, {transform_indices = @transform_3, window_bounds = array<i64: 256, 128>}]} {
    %c0 = arith.constant 0 : index
    %c0_0 = arith.constant 0 : index
    %0 = vector.load %arg2[%c0, %c0_0] : memref<256x128xf32, #tpu.memory_space<vmem>>, vector<256x128xf32>
    %c0_1 = arith.constant 0 : index
    %c0_2 = arith.constant 0 : index
    %1 = vector.load %arg3[%c0_1, %c0_2] : memref<1x128xf32, #tpu.memory_space<vmem>>, vector<1x128xf32>
    %2 = vector.broadcast %1 : vector<1x128xf32> to vector<256x128xf32>
    %3 = arith.mulf %0, %2 : vector<256x128xf32>
    %c0_3 = arith.constant 0 : index
    %c0_4 = arith.constant 0 : index
    %4 = vector.load %arg4[%c0_3, %c0_4] : memref<1x128xf32, #tpu.memory_space<vmem>>, vector<1x128xf32>
    %5 = vector.broadcast %4 : vector<1x128xf32> to vector<256x128xf32>
    %6 = arith.addf %3, %5 : vector<256x128xf32>
    %cst = arith.constant 0.000000e+00 : f32
    %7 = vector.broadcast %cst : f32 to vector<256x128xf32>
    %8 = arith.maximumf %6, %7 : vector<256x128xf32>
    %c0_5 = arith.constant 0 : index
    %c0_6 = arith.constant 0 : index
    %9 = vector.load %arg5[%c0_5, %c0_6] : memref<256x128xf32, #tpu.memory_space<vmem>>, vector<256x128xf32>
    tpu.vector_store %arg5[%c0_5, %c0_6], %8 {strides = array<i32>} : memref<256x128xf32, #tpu.memory_space<vmem>>, vector<256x128xf32>,
    return
  }
  func.func @transform_0(%arg0: i32, %arg1: i32) -> (i32, i32) {
    %c0_i32 = arith.constant 0 : i32
    return %arg0, %arg1 : i32, i32
  }
  func.func @transform_1(%arg0: i32, %arg1: i32) -> (i32, i32) {
    %c0_i32 = arith.constant 0 : i32
    %c0_i32_0 = arith.constant 0 : i32
    return %c0_i32, %arg1 : i32, i32
  }
  func.func @transform_2(%arg0: i32, %arg1: i32) -> (i32, i32) {
    %c0_i32 = arith.constant 0 : i32
    %c0_i32_0 = arith.constant 0 : i32
    return %c0_i32, %arg1 : i32, i32
  }
  func.func @transform_3(%arg0: i32, %arg1: i32) -> (i32, i32) {
    %c0_i32 = arith.constant 0 : i32
    return %arg0, %arg1 : i32, i32
  }
}

module attributes {stable_mosaic.version = 11 : i64} {
  func.func @_conv3x3_s1_kernel(%arg0: i32, %arg1: i32, %arg2: memref<1x290x8xf32, #tpu.memory_space<vmem>>, %arg3: memref<9x8x128xf32, #tpu.memory_space<vmem>>, %arg4: memref<1x256x128xf32, #tpu.memory_space<vmem>>) attributes {dimension_semantics = [#tpu.dimension_semantics<parallel>, #tpu.dimension_semantics<parallel>], iteration_bounds = array<i64: 2, 1>, scalar_prefetch = 0 : i64, scratch_operands = 0 : i64, tpu.core_type = #tpu.core_type<tc>, window_params = [{transform_indices = @transform_0, window_bounds = array<i64: 1, 290, 8>}, {transform_indices = @transform_1, window_bounds = array<i64: 9, 8, 128>}, {transform_indices = @transform_2, window_bounds = array<i64: 1, 256, 128>}]} {
    %0 = tpu.iota {dimensions = array<i32: 0>} : vector<256x8xi32>
    %c16_i32 = arith.constant 16 : i32
    %c0_i32 = arith.constant 0 : i32
    %1 = arith.cmpi eq, %c16_i32, %c0_i32 : i32
    %c1_i32 = arith.constant 1 : i32
    %2 = arith.select %1, %c1_i32, %c16_i32 : i32
    %3 = vector.broadcast %2 : i32 to vector<256x8xi32>
    %4 = arith.remsi %0, %3 : vector<256x8xi32>
    %c0_i32_0 = arith.constant 0 : i32
    %5 = vector.broadcast %c0_i32_0 : i32 to vector<256x8xi32>
    %6 = arith.cmpi ne, %4, %5 : vector<256x8xi32>
    %c0_i32_1 = arith.constant 0 : i32
    %7 = vector.broadcast %c0_i32_1 : i32 to vector<256x8xi32>
    %8 = arith.cmpi slt, %4, %7 : vector<256x8xi32>
    %c0_i32_2 = arith.constant 0 : i32
    %9 = arith.cmpi slt, %2, %c0_i32_2 : i32
    %10 = vector.broadcast %9 : i1 to vector<256x8xi1>
    %11 = vector.broadcast %10 : vector<256x8xi1> to vector<256x8xi1>
    %12 = arith.xori %8, %11 : vector<256x8xi1>
    %13 = arith.andi %12, %6 : vector<256x8xi1>
    %14 = vector.broadcast %2 : i32 to vector<256x8xi32>
    %15 = arith.addi %4, %14 : vector<256x8xi32>
    %16 = arith.select %13, %15, %4 : vector<256x8xi1>, vector<256x8xi32>
    %c0_i32_3 = arith.constant 0 : i32
    %17 = vector.broadcast %c0_i32_3 : i32 to vector<256x8xi32>
    %18 = arith.cmpi ne, %16, %17 : vector<256x8xi32>
    %c15_i32 = arith.constant 15 : i32
    %19 = vector.broadcast %c15_i32 : i32 to vector<256x8xi32>
    %20 = arith.cmpi ne, %16, %19 : vector<256x8xi32>
    %cst = arith.constant 0.000000e+00 : f32
    %21 = vector.broadcast %cst : f32 to vector<256x128xf32>
    %c0 = arith.constant 0 : index
    %c0_4 = arith.constant 0 : index
    %c0_5 = arith.constant 0 : index
    %22 = vector.load %arg2[%c0, %c0_4, %c0_5] : memref<1x290x8xf32, #tpu.memory_space<vmem>>, vector<1x256x8xf32>
    %23 = vector.shape_cast %22 : vector<1x256x8xf32> to vector<256x8xf32>
    %24 = arith.truncf %23 : vector<256x8xf32> to vector<256x8xbf16>
    %cst_6 = arith.constant 0.000000e+00 : bf16
    %25 = vector.broadcast %cst_6 : bf16 to vector<256x8xbf16>
    %26 = arith.select %18, %24, %25 : vector<256x8xi1>, vector<256x8xbf16>
    %c0_7 = arith.constant 0 : index
    %c0_8 = arith.constant 0 : index
    %c0_9 = arith.constant 0 : index
    %27 = vector.load %arg3[%c0_7, %c0_8, %c0_9] : memref<9x8x128xf32, #tpu.memory_space<vmem>>, vector<1x8x128xf32>
    %28 = vector.shape_cast %27 : vector<1x8x128xf32> to vector<8x128xf32>
    %29 = arith.truncf %28 : vector<8x128xf32> to vector<8x128xbf16>
    %cst_10 = arith.constant dense<0.000000e+00> : vector<256x128xf32>
    %30 = tpu.matmul %26, %29, %cst_10 {dimension_numbers = #tpu.dot_dimension_numbers<[1], [0], [0], [1], [0, 0, 1, 1], [], []>} : vector<256x8xbf16>, vector<8x128xbf16>, vector<256x128xf32> -> vector<256x128xf32>
    %31 = arith.addf %21, %30 : vector<256x128xf32>
    %c0_11 = arith.constant 0 : index
    %c1 = arith.constant 1 : index
    %c0_12 = arith.constant 0 : index
    %32 = vector.load %arg2[%c0_11, %c1, %c0_12] : memref<1x290x8xf32, #tpu.memory_space<vmem>>, vector<1x256x8xf32>
    %33 = vector.shape_cast %32 : vector<1x256x8xf32> to vector<256x8xf32>
    %34 = arith.truncf %33 : vector<256x8xf32> to vector<256x8xbf16>
    %c1_13 = arith.constant 1 : index
    %c0_14 = arith.constant 0 : index
    %c0_15 = arith.constant 0 : index
    %35 = vector.load %arg3[%c1_13, %c0_14, %c0_15] : memref<9x8x128xf32, #tpu.memory_space<vmem>>, vector<1x8x128xf32>
    %36 = vector.shape_cast %35 : vector<1x8x128xf32> to vector<8x128xf32>
    %37 = arith.truncf %36 : vector<8x128xf32> to vector<8x128xbf16>
    %cst_16 = arith.constant dense<0.000000e+00> : vector<256x128xf32>
    %38 = tpu.matmul %34, %37, %cst_16 {dimension_numbers = #tpu.dot_dimension_numbers<[1], [0], [0], [1], [0, 0, 1, 1], [], []>} : vector<256x8xbf16>, vector<8x128xbf16>, vector<256x128xf32> -> vector<256x128xf32>
    %39 = arith.addf %31, %38 : vector<256x128xf32>
    %c0_17 = arith.constant 0 : index
    %c2 = arith.constant 2 : index
    %c0_18 = arith.constant 0 : index
    %40 = vector.load %arg2[%c0_17, %c2, %c0_18] : memref<1x290x8xf32, #tpu.memory_space<vmem>>, vector<1x256x8xf32>
    %41 = vector.shape_cast %40 : vector<1x256x8xf32> to vector<256x8xf32>
    %42 = arith.truncf %41 : vector<256x8xf32> to vector<256x8xbf16>
    %cst_19 = arith.constant 0.000000e+00 : bf16
    %43 = vector.broadcast %cst_19 : bf16 to vector<256x8xbf16>
    %44 = arith.select %20, %42, %43 : vector<256x8xi1>, vector<256x8xbf16>
    %c2_20 = arith.constant 2 : index
    %c0_21 = arith.constant 0 : index
    %c0_22 = arith.constant 0 : index
    %45 = vector.load %arg3[%c2_20, %c0_21, %c0_22] : memref<9x8x128xf32, #tpu.memory_space<vmem>>, vector<1x8x128xf32>
    %46 = vector.shape_cast %45 : vector<1x8x128xf32> to vector<8x128xf32>
    %47 = arith.truncf %46 : vector<8x128xf32> to vector<8x128xbf16>
    %cst_23 = arith.constant dense<0.000000e+00> : vector<256x128xf32>
    %48 = tpu.matmul %44, %47, %cst_23 {dimension_numbers = #tpu.dot_dimension_numbers<[1], [0], [0], [1], [0, 0, 1, 1], [], []>} : vector<256x8xbf16>, vector<8x128xbf16>, vector<256x128xf32> -> vector<256x128xf32>
    %49 = arith.addf %39, %48 : vector<256x128xf32>
    %c0_24 = arith.constant 0 : index
    %c16 = arith.constant 16 : index
    %c0_25 = arith.constant 0 : index
    %50 = vector.load %arg2[%c0_24, %c16, %c0_25] : memref<1x290x8xf32, #tpu.memory_space<vmem>>, vector<1x256x8xf32>
    %51 = vector.shape_cast %50 : vector<1x256x8xf32> to vector<256x8xf32>
    %52 = arith.truncf %51 : vector<256x8xf32> to vector<256x8xbf16>
    %cst_26 = arith.constant 0.000000e+00 : bf16
    %53 = vector.broadcast %cst_26 : bf16 to vector<256x8xbf16>
    %54 = arith.select %18, %52, %53 : vector<256x8xi1>, vector<256x8xbf16>
    %c3 = arith.constant 3 : index
    %c0_27 = arith.constant 0 : index
    %c0_28 = arith.constant 0 : index
    %55 = vector.load %arg3[%c3, %c0_27, %c0_28] : memref<9x8x128xf32, #tpu.memory_space<vmem>>, vector<1x8x128xf32>
    %56 = vector.shape_cast %55 : vector<1x8x128xf32> to vector<8x128xf32>
    %57 = arith.truncf %56 : vector<8x128xf32> to vector<8x128xbf16>
    %cst_29 = arith.constant dense<0.000000e+00> : vector<256x128xf32>
    %58 = tpu.matmul %54, %57, %cst_29 {dimension_numbers = #tpu.dot_dimension_numbers<[1], [0], [0], [1], [0, 0, 1, 1], [], []>} : vector<256x8xbf16>, vector<8x128xbf16>, vector<256x128xf32> -> vector<256x128xf32>
    %59 = arith.addf %49, %58 : vector<256x128xf32>
    %c0_30 = arith.constant 0 : index
    %c17 = arith.constant 17 : index
    %c0_31 = arith.constant 0 : index
    %60 = vector.load %arg2[%c0_30, %c17, %c0_31] : memref<1x290x8xf32, #tpu.memory_space<vmem>>, vector<1x256x8xf32>
    %61 = vector.shape_cast %60 : vector<1x256x8xf32> to vector<256x8xf32>
    %62 = arith.truncf %61 : vector<256x8xf32> to vector<256x8xbf16>
    %c4 = arith.constant 4 : index
    %c0_32 = arith.constant 0 : index
    %c0_33 = arith.constant 0 : index
    %63 = vector.load %arg3[%c4, %c0_32, %c0_33] : memref<9x8x128xf32, #tpu.memory_space<vmem>>, vector<1x8x128xf32>
    %64 = vector.shape_cast %63 : vector<1x8x128xf32> to vector<8x128xf32>
    %65 = arith.truncf %64 : vector<8x128xf32> to vector<8x128xbf16>
    %cst_34 = arith.constant dense<0.000000e+00> : vector<256x128xf32>
    %66 = tpu.matmul %62, %65, %cst_34 {dimension_numbers = #tpu.dot_dimension_numbers<[1], [0], [0], [1], [0, 0, 1, 1], [], []>} : vector<256x8xbf16>, vector<8x128xbf16>, vector<256x128xf32> -> vector<256x128xf32>
    %67 = arith.addf %59, %66 : vector<256x128xf32>
    %c0_35 = arith.constant 0 : index
    %c18 = arith.constant 18 : index
    %c0_36 = arith.constant 0 : index
    %68 = vector.load %arg2[%c0_35, %c18, %c0_36] : memref<1x290x8xf32, #tpu.memory_space<vmem>>, vector<1x256x8xf32>
    %69 = vector.shape_cast %68 : vector<1x256x8xf32> to vector<256x8xf32>
    %70 = arith.truncf %69 : vector<256x8xf32> to vector<256x8xbf16>
    %cst_37 = arith.constant 0.000000e+00 : bf16
    %71 = vector.broadcast %cst_37 : bf16 to vector<256x8xbf16>
    %72 = arith.select %20, %70, %71 : vector<256x8xi1>, vector<256x8xbf16>
    %c5 = arith.constant 5 : index
    %c0_38 = arith.constant 0 : index
    %c0_39 = arith.constant 0 : index
    %73 = vector.load %arg3[%c5, %c0_38, %c0_39] : memref<9x8x128xf32, #tpu.memory_space<vmem>>, vector<1x8x128xf32>
    %74 = vector.shape_cast %73 : vector<1x8x128xf32> to vector<8x128xf32>
    %75 = arith.truncf %74 : vector<8x128xf32> to vector<8x128xbf16>
    %cst_40 = arith.constant dense<0.000000e+00> : vector<256x128xf32>
    %76 = tpu.matmul %72, %75, %cst_40 {dimension_numbers = #tpu.dot_dimension_numbers<[1], [0], [0], [1], [0, 0, 1, 1], [], []>} : vector<256x8xbf16>, vector<8x128xbf16>, vector<256x128xf32> -> vector<256x128xf32>
    %77 = arith.addf %67, %76 : vector<256x128xf32>
    %c0_41 = arith.constant 0 : index
    %c32 = arith.constant 32 : index
    %c0_42 = arith.constant 0 : index
    %78 = vector.load %arg2[%c0_41, %c32, %c0_42] : memref<1x290x8xf32, #tpu.memory_space<vmem>>, vector<1x256x8xf32>
    %79 = vector.shape_cast %78 : vector<1x256x8xf32> to vector<256x8xf32>
    %80 = arith.truncf %79 : vector<256x8xf32> to vector<256x8xbf16>
    %cst_43 = arith.constant 0.000000e+00 : bf16
    %81 = vector.broadcast %cst_43 : bf16 to vector<256x8xbf16>
    %82 = arith.select %18, %80, %81 : vector<256x8xi1>, vector<256x8xbf16>
    %c6 = arith.constant 6 : index
    %c0_44 = arith.constant 0 : index
    %c0_45 = arith.constant 0 : index
    %83 = vector.load %arg3[%c6, %c0_44, %c0_45] : memref<9x8x128xf32, #tpu.memory_space<vmem>>, vector<1x8x128xf32>
    %84 = vector.shape_cast %83 : vector<1x8x128xf32> to vector<8x128xf32>
    %85 = arith.truncf %84 : vector<8x128xf32> to vector<8x128xbf16>
    %cst_46 = arith.constant dense<0.000000e+00> : vector<256x128xf32>
    %86 = tpu.matmul %82, %85, %cst_46 {dimension_numbers = #tpu.dot_dimension_numbers<[1], [0], [0], [1], [0, 0, 1, 1], [], []>} : vector<256x8xbf16>, vector<8x128xbf16>, vector<256x128xf32> -> vector<256x128xf32>
    %87 = arith.addf %77, %86 : vector<256x128xf32>
    %c0_47 = arith.constant 0 : index
    %c33 = arith.constant 33 : index
    %c0_48 = arith.constant 0 : index
    %88 = vector.load %arg2[%c0_47, %c33, %c0_48] : memref<1x290x8xf32, #tpu.memory_space<vmem>>, vector<1x256x8xf32>
    %89 = vector.shape_cast %88 : vector<1x256x8xf32> to vector<256x8xf32>
    %90 = arith.truncf %89 : vector<256x8xf32> to vector<256x8xbf16>
    %c7 = arith.constant 7 : index
    %c0_49 = arith.constant 0 : index
    %c0_50 = arith.constant 0 : index
    %91 = vector.load %arg3[%c7, %c0_49, %c0_50] : memref<9x8x128xf32, #tpu.memory_space<vmem>>, vector<1x8x128xf32>
    %92 = vector.shape_cast %91 : vector<1x8x128xf32> to vector<8x128xf32>
    %93 = arith.truncf %92 : vector<8x128xf32> to vector<8x128xbf16>
    %cst_51 = arith.constant dense<0.000000e+00> : vector<256x128xf32>
    %94 = tpu.matmul %90, %93, %cst_51 {dimension_numbers = #tpu.dot_dimension_numbers<[1], [0], [0], [1], [0, 0, 1, 1], [], []>} : vector<256x8xbf16>, vector<8x128xbf16>, vector<256x128xf32> -> vector<256x128xf32>
    %95 = arith.addf %87, %94 : vector<256x128xf32>
    %c0_52 = arith.constant 0 : index
    %c34 = arith.constant 34 : index
    %c0_53 = arith.constant 0 : index
    %96 = vector.load %arg2[%c0_52, %c34, %c0_53] : memref<1x290x8xf32, #tpu.memory_space<vmem>>, vector<1x256x8xf32>
    %97 = vector.shape_cast %96 : vector<1x256x8xf32> to vector<256x8xf32>
    %98 = arith.truncf %97 : vector<256x8xf32> to vector<256x8xbf16>
    %cst_54 = arith.constant 0.000000e+00 : bf16
    %99 = vector.broadcast %cst_54 : bf16 to vector<256x8xbf16>
    %100 = arith.select %20, %98, %99 : vector<256x8xi1>, vector<256x8xbf16>
    %c8 = arith.constant 8 : index
    %c0_55 = arith.constant 0 : index
    %c0_56 = arith.constant 0 : index
    %101 = vector.load %arg3[%c8, %c0_55, %c0_56] : memref<9x8x128xf32, #tpu.memory_space<vmem>>, vector<1x8x128xf32>
    %102 = vector.shape_cast %101 : vector<1x8x128xf32> to vector<8x128xf32>
    %103 = arith.truncf %102 : vector<8x128xf32> to vector<8x128xbf16>
    %cst_57 = arith.constant dense<0.000000e+00> : vector<256x128xf32>
    %104 = tpu.matmul %100, %103, %cst_57 {dimension_numbers = #tpu.dot_dimension_numbers<[1], [0], [0], [1], [0, 0, 1, 1], [], []>} : vector<256x8xbf16>, vector<8x128xbf16>, vector<256x128xf32> -> vector<256x128xf32>
    %105 = arith.addf %95, %104 : vector<256x128xf32>
    %c0_58 = arith.constant 0 : index
    %c0_59 = arith.constant 0 : index
    %c0_60 = arith.constant 0 : index
    %106 = vector.load %arg4[%c0_58, %c0_59, %c0_60] : memref<1x256x128xf32, #tpu.memory_space<vmem>>, vector<1x256x128xf32>
    %107 = vector.shape_cast %106 : vector<1x256x128xf32> to vector<256x128xf32>
    %108 = vector.shape_cast %105 : vector<256x128xf32> to vector<1x256x128xf32>
    tpu.vector_store %arg4[%c0_58, %c0_59, %c0_60], %108 {strides = array<i32>} : memref<1x256x128xf32, #tpu.memory_space<vmem>>, vector<1x256x128xf32>,
    return
  }
  func.func @transform_0(%arg0: i32, %arg1: i32) -> (i32, i32, i32) {
    %c0_i32 = arith.constant 0 : i32
    %c0_i32_0 = arith.constant 0 : i32
    %c0_i32_1 = arith.constant 0 : i32
    return %arg0, %c0_i32, %c0_i32_0 : i32, i32, i32
  }
  func.func @transform_1(%arg0: i32, %arg1: i32) -> (i32, i32, i32) {
    %c0_i32 = arith.constant 0 : i32
    %c0_i32_0 = arith.constant 0 : i32
    %c0_i32_1 = arith.constant 0 : i32
    return %c0_i32, %c0_i32_0, %arg1 : i32, i32, i32
  }
  func.func @transform_2(%arg0: i32, %arg1: i32) -> (i32, i32, i32) {
    %c0_i32 = arith.constant 0 : i32
    %c0_i32_0 = arith.constant 0 : i32
    return %arg0, %c0_i32, %arg1 : i32, i32, i32
  }
}

module attributes {stable_mosaic.version = 11 : i64} {
  func.func @_matmul_kernel(%arg0: i32, %arg1: i32, %arg2: memref<128x72xf32, #tpu.memory_space<vmem>>, %arg3: memref<72x128xf32, #tpu.memory_space<vmem>>, %arg4: memref<128x128xf32, #tpu.memory_space<vmem>>) attributes {dimension_semantics = [#tpu.dimension_semantics<parallel>, #tpu.dimension_semantics<parallel>], iteration_bounds = array<i64: 1, 1>, scalar_prefetch = 0 : i64, scratch_operands = 0 : i64, tpu.core_type = #tpu.core_type<tc>, window_params = [{transform_indices = @transform_0, window_bounds = array<i64: 128, 72>}, {transform_indices = @transform_1, window_bounds = array<i64: 72, 128>}, {transform_indices = @transform_2, window_bounds = array<i64: 128, 128>}]} {
    %c0 = arith.constant 0 : index
    %c0_0 = arith.constant 0 : index
    %0 = vector.load %arg2[%c0, %c0_0] : memref<128x72xf32, #tpu.memory_space<vmem>>, vector<128x72xf32>
    %1 = arith.truncf %0 : vector<128x72xf32> to vector<128x72xbf16>
    %c0_1 = arith.constant 0 : index
    %c0_2 = arith.constant 0 : index
    %2 = vector.load %arg3[%c0_1, %c0_2] : memref<72x128xf32, #tpu.memory_space<vmem>>, vector<72x128xf32>
    %3 = arith.truncf %2 : vector<72x128xf32> to vector<72x128xbf16>
    %cst = arith.constant dense<0.000000e+00> : vector<128x128xf32>
    %4 = tpu.matmul %1, %3, %cst {dimension_numbers = #tpu.dot_dimension_numbers<[1], [0], [0], [1], [0, 0, 1, 1], [], []>} : vector<128x72xbf16>, vector<72x128xbf16>, vector<128x128xf32> -> vector<128x128xf32>
    %c0_3 = arith.constant 0 : index
    %c0_4 = arith.constant 0 : index
    %5 = vector.load %arg4[%c0_3, %c0_4] : memref<128x128xf32, #tpu.memory_space<vmem>>, vector<128x128xf32>
    tpu.vector_store %arg4[%c0_3, %c0_4], %4 {strides = array<i32>} : memref<128x128xf32, #tpu.memory_space<vmem>>, vector<128x128xf32>,
    return
  }
  func.func @transform_0(%arg0: i32, %arg1: i32) -> (i32, i32) {
    %c0_i32 = arith.constant 0 : i32
    %c0_i32_0 = arith.constant 0 : i32
    return %arg0, %c0_i32 : i32, i32
  }
  func.func @transform_1(%arg0: i32, %arg1: i32) -> (i32, i32) {
    %c0_i32 = arith.constant 0 : i32
    %c0_i32_0 = arith.constant 0 : i32
    return %c0_i32, %arg1 : i32, i32
  }
  func.func @transform_2(%arg0: i32, %arg1: i32) -> (i32, i32) {
    %c0_i32 = arith.constant 0 : i32
    return %arg0, %arg1 : i32, i32
  }
}

module attributes {stable_mosaic.version = 11 : i64} {
  func.func @_scale_bias_relu_kernel(%arg0: i32, %arg1: i32, %arg2: memref<128x128xf32, #tpu.memory_space<vmem>>, %arg3: memref<1x128xf32, #tpu.memory_space<vmem>>, %arg4: memref<1x128xf32, #tpu.memory_space<vmem>>, %arg5: memref<128x128xf32, #tpu.memory_space<vmem>>) attributes {dimension_semantics = [#tpu.dimension_semantics<parallel>, #tpu.dimension_semantics<parallel>], iteration_bounds = array<i64: 1, 1>, scalar_prefetch = 0 : i64, scratch_operands = 0 : i64, tpu.core_type = #tpu.core_type<tc>, window_params = [{transform_indices = @transform_0, window_bounds = array<i64: 128, 128>}, {transform_indices = @transform_1, window_bounds = array<i64: 1, 128>}, {transform_indices = @transform_2, window_bounds = array<i64: 1, 128>}, {transform_indices = @transform_3, window_bounds = array<i64: 128, 128>}]} {
    %c0 = arith.constant 0 : index
    %c0_0 = arith.constant 0 : index
    %0 = vector.load %arg2[%c0, %c0_0] : memref<128x128xf32, #tpu.memory_space<vmem>>, vector<128x128xf32>
    %c0_1 = arith.constant 0 : index
    %c0_2 = arith.constant 0 : index
    %1 = vector.load %arg3[%c0_1, %c0_2] : memref<1x128xf32, #tpu.memory_space<vmem>>, vector<1x128xf32>
    %2 = vector.broadcast %1 : vector<1x128xf32> to vector<128x128xf32>
    %3 = arith.mulf %0, %2 : vector<128x128xf32>
    %c0_3 = arith.constant 0 : index
    %c0_4 = arith.constant 0 : index
    %4 = vector.load %arg4[%c0_3, %c0_4] : memref<1x128xf32, #tpu.memory_space<vmem>>, vector<1x128xf32>
    %5 = vector.broadcast %4 : vector<1x128xf32> to vector<128x128xf32>
    %6 = arith.addf %3, %5 : vector<128x128xf32>
    %cst = arith.constant 0.000000e+00 : f32
    %7 = vector.broadcast %cst : f32 to vector<128x128xf32>
    %8 = arith.maximumf %6, %7 : vector<128x128xf32>
    %c0_5 = arith.constant 0 : index
    %c0_6 = arith.constant 0 : index
    %9 = vector.load %arg5[%c0_5, %c0_6] : memref<128x128xf32, #tpu.memory_space<vmem>>, vector<128x128xf32>
    tpu.vector_store %arg5[%c0_5, %c0_6], %8 {strides = array<i32>} : memref<128x128xf32, #tpu.memory_space<vmem>>, vector<128x128xf32>,
    return
  }
  func.func @transform_0(%arg0: i32, %arg1: i32) -> (i32, i32) {
    %c0_i32 = arith.constant 0 : i32
    return %arg0, %arg1 : i32, i32
  }
  func.func @transform_1(%arg0: i32, %arg1: i32) -> (i32, i32) {
    %c0_i32 = arith.constant 0 : i32
    %c0_i32_0 = arith.constant 0 : i32
    return %c0_i32, %arg1 : i32, i32
  }
  func.func @transform_2(%arg0: i32, %arg1: i32) -> (i32, i32) {
    %c0_i32 = arith.constant 0 : i32
    %c0_i32_0 = arith.constant 0 : i32
    return %c0_i32, %arg1 : i32, i32
  }
  func.func @transform_3(%arg0: i32, %arg1: i32) -> (i32, i32) {
    %c0_i32 = arith.constant 0 : i32
    return %arg0, %arg1 : i32, i32
  }
}

</mosaic_0001>

<bundles_post_ra>
// kernel: inception_downsample.9
= control target key start
LH: loop header
LB: loop body
LE: loop exit
PB: predicated region body
PF: predicated region fallthrough
CT: control target
= control target key end

     0   :  { %s717_s9 = smov 0   ;;  %s719_s10 = smov 0   ;;  %s844_s0 = inlined_call_operand.vmem [shape: f32[512,4], index: 0, kind: input, shape index: {}]   ;;  %s845_s1 = inlined_call_operand.vmem [shape: f32[4,128], index: 1, kind: input, shape index: {}]   ;;  %s846_s2 = inlined_call_operand.vmem [shape: f32[512,128], index: 2, kind: output, shape index: {}]  }
   0x1   :  { %s721_s11 = smov 0  }
   0x2 LB: > { %s24_s12 = sadd.s32 1, %s696_s10  ;;  %p576_p0 = scmp.ge.s32.totalorder %s700_s11, 1  ;;  %s700_s11 = sphi %s721_s11, %s12_s11   ;;  %s696_s10 = sphi %s719_s10, %s848_s10   ;;  %s692_s9 = sphi %s717_s9, %s847_s9  }
   0x3   : > { %p26_p1 = scmp.ge.s32.totalorder %s24_s12, 2  ;;  %p136_p2 = scmp.lt.s32.totalorder %s700_s11, 3 }
   0x5   : > { %s850_s12 = smov (%p26_p1, %s24_s12), 0  ;;  %p137_p3 = pnand %p576_p0, %p136_p2 }
   0x6   : > { %s577_s15 = sshll.u32 (!%p137_p3), %s692_s9, 5 }
   0x7   : > { %140 = sbr.rel (%p137_p3) target bundleno = 244 (0xf4), region = 28  ;;  %p166_p4 = scmp.lt.s32.totalorder (!%p137_p3), %s577_s15, 63 }
   0xc   : > { %v233_v0 = vld [vmem:[%s845_s1] sm:$0xf]  ;;  %vm284_vm0 = vcmask 1041408   ;;  %s852_s15 = smov (!%p166_p4, %s577_s15), 63  ;;  %vm235_vm1 = vcmask 31744  }
   0xd   : > { %v234_v1 = vpack.c.bf16 %v233_v0, %v233_v0  ;;  %s578_s16 = sshll.u32 %s852_s15, 3 }
   0xe   : > { %s746_s19 = scalar_lea.vmem %s844_s0, %s578_s16  ;;  %s801_s22 = scalar_lea.vmem %s846_s2, %s578_s16 }
   0xf   : > { %652 = vmatprep.subr.msk.bf16.mxu0 %vm284_vm0, %v234_v1  ;;  %653 = vmatprep.subr.msk.bf16.mxu1 %vm284_vm0, %v234_v1  ;;  %v286_v2 = vsel %vm284_vm0, %v234_v1, 0  ;;  %v185_v3 = vld [vmem:[%s746_s19] sm:$0xff]  ;;  %v186_v4 = vld [vmem:[%s746_s19 + $0x8] sm:$0xff]  ;;  %v187_v8 = vld [vmem:[%s746_s19 + $0x10] sm:$0xff] }
  0x10   : > { %617 = vmatpush3.bf16.msra.mxu0 %v286_v2  ;;  %651 = vmatpush3.bf16.msra.mxu1 %v286_v2  ;;  %v201_v5 = vld [vmem:[%s746_s19 + $0x80] sm:$0xff]  ;;  %v217_v6 = vpack.c.bf16 %v186_v4, %v185_v3  ;;  %v202_v7 = vld [vmem:[%s746_s19 + $0x88] sm:$0xff]  ;;  %v188_v9 = vld [vmem:[%s746_s19 + $0x18] sm:$0xff] }
  0x11   : > { %v225_v10 = vpack.c.bf16 %v202_v7, %v201_v5  ;;  %v218_v11 = vpack.c.bf16 %v188_v9, %v187_v8  ;;  %v203_v12 = vld [vmem:[%s746_s19 + $0x90] sm:$0xff]  ;;  %v204_v13 = vld [vmem:[%s746_s19 + $0x98] sm:$0xff]  ;;  %v189_v14 = vld [vmem:[%s746_s19 + $0x20] sm:$0xff] }
  0x12   : > { %618 = vmatprep.mubr.msk.bf16.mxu0 %vm235_vm1, %v217_v6  ;;  %v226_v15 = vpack.c.bf16 %v204_v13, %v203_v12  ;;  %v190_v16 = vld [vmem:[%s746_s19 + $0x28] sm:$0xff]  ;;  %v205_v17 = vld [vmem:[%s746_s19 + $0xa0] sm:$0xff]  ;;  %v191_v21 = vld [vmem:[%s746_s19 + $0x30] sm:$0xff] }
  0x13   : > { %v206_v18 = vld [vmem:[%s746_s19 + $0xa8] sm:$0xff]  ;;  %634 = vmatprep.mubr.msk.bf16.mxu1 %vm235_vm1, %v225_v10  ;;  %619 = vmatmul.mubr.msk.bf16.vlgmr.msra.gmra.mxu0 %vm235_vm1, %v218_v11  ;;  %v219_v19 = vpack.c.bf16 %v190_v16, %v189_v14  ;;  %v192_v22 = vld [vmem:[%s746_s19 + $0x38] sm:$0xff]  ;;  %v207_v23 = vld [vmem:[%s746_s19 + $0xb0] sm:$0xff] }
  0x14   : > { %v227_v20 = vpack.c.bf16 %v206_v18, %v205_v17  ;;  %635 = vmatmul.mubr.msk.bf16.vlgmr.msra.gmra.mxu1 %vm235_vm1, %v226_v15  ;;  %v208_v24 = vld [vmem:[%s746_s19 + $0xb8] sm:$0xff]  ;;  %v193_v25 = vld [vmem:[%s746_s19 + $0x40] sm:$0xff]  ;;  %v194_v26 = vld [vmem:[%s746_s19 + $0x48] sm:$0xff]  ;;  %v220_v29 = vpack.c.bf16 %v192_v22, %v191_v21 }
  0x15   : > { %622 = vmatprep.mubr.msk.bf16.mxu0 %vm235_vm1, %v219_v19  ;;  %v209_v27 = vld [vmem:[%s746_s19 + $0xc0] sm:$0xff]  ;;  %v210_v28 = vld [vmem:[%s746_s19 + $0xc8] sm:$0xff]  ;;  %v228_v30 = vpack.c.bf16 %v208_v24, %v207_v23  ;;  %v221_v31 = vpack.c.bf16 %v194_v26, %v193_v25  ;;  %v195_v33 = vld [vmem:[%s746_s19 + $0x50] sm:$0xff] }
  0x16   : > { %638 = vmatprep.mubr.msk.bf16.mxu1 %vm235_vm1, %v227_v20  ;;  %v229_v32 = vpack.c.bf16 %v210_v28, %v209_v27  ;;  %v196_v34 = vld [vmem:[%s746_s19 + $0x58] sm:$0xff]  ;;  %v211_v35 = vld [vmem:[%s746_s19 + $0xd0] sm:$0xff]  ;;  %v197_v37 = vld [vmem:[%s746_s19 + $0x60] sm:$0xff] }
  0x17   : > { %v212_v36 = vld [vmem:[%s746_s19 + $0xd8] sm:$0xff]  ;;  %v198_v38 = vld [vmem:[%s746_s19 + $0x68] sm:$0xff]  ;;  %v213_v39 = vld [vmem:[%s746_s19 + $0xe0] sm:$0xff]  ;;  %v222_v41 = vpack.c.bf16 %v196_v34, %v195_v33 }
  0x18   : > { %v214_v40 = vld [vmem:[%s746_s19 + $0xe8] sm:$0xff]  ;;  %v230_v42 = vpack.c.bf16 %v212_v36, %v211_v35  ;;  %v223_v43 = vpack.c.bf16 %v198_v38, %v197_v37  ;;  %v199_v45 = vld [vmem:[%s746_s19 + $0x70] sm:$0xff]  ;;  %v200_v46 = vld [vmem:[%s746_s19 + $0x78] sm:$0xff] }
  0x19   : > { %v231_v44 = vpack.c.bf16 %v214_v40, %v213_v39  ;;  %v215_v47 = vld [vmem:[%s746_s19 + $0xf0] sm:$0xff]  ;;  %v216_v48 = vld [vmem:[%s746_s19 + $0xf8] sm:$0xff]  ;;  %v224_v49 = vpack.c.bf16 %v200_v46, %v199_v45 }
  0x1a   : > { %v232_v50 = vpack.c.bf16 %v216_v48, %v215_v47 }
  0x1b   : > { %623 = vmatmul.mubr.msk.bf16.gmra.mxu0 %vm235_vm1, %v220_v29 }
  0x1c   : > { %639 = vmatmul.mubr.msk.bf16.gmra.mxu1 %vm235_vm1, %v228_v30  ;;  %626 = vmatprep.mubr.msk.bf16.mxu0 %vm235_vm1, %v221_v31 }
  0x1d   : > { %642 = vmatprep.mubr.msk.bf16.mxu1 %vm235_vm1, %v229_v32 }
  0x23   : > { %627 = vmatmul.mubr.msk.bf16.gmra.mxu0 %vm235_vm1, %v222_v41 }
  0x24   : > { %643 = vmatmul.mubr.msk.bf16.gmra.mxu1 %vm235_vm1, %v230_v42  ;;  %630 = vmatprep.mubr.msk.bf16.mxu0 %vm235_vm1, %v223_v43 }
  0x25   : > { %646 = vmatprep.mubr.msk.bf16.mxu1 %vm235_vm1, %v231_v44 }
  0x2b   : > { %631 = vmatmul.mubr.msk.bf16.gmra.mxu0 %vm235_vm1, %v224_v49 }
  0x2c   : > { %647 = vmatmul.mubr.msk.bf16.gmra.mxu1 %vm235_vm1, %v232_v50 }
  0xd3   : > { %v620_v51 = vpop.f32.mrf.mxu0 }
  0xd4   : > { %451 = vst [vmem:[%s801_s22 + $0x10] sm:$0xff] %v620_v51  ;;  %v636_v52 = vpop.f32.mrf.mxu1 }
  0xd5   : > { %467 = vst [vmem:[%s801_s22 + $0x90] sm:$0xff] %v636_v52  ;;  %v322_v53 = vpop.f32.mrf.mxu0 }
  0xd6   : > { %449 = vst [vmem:[%s801_s22] sm:$0xff] %v322_v53  ;;  %v386_v54 = vpop.f32.mrf.mxu1 }
  0xd7   : > { %465 = vst [vmem:[%s801_s22 + $0x80] sm:$0xff] %v386_v54  ;;  %v621_v55 = vpop.f32.mrf.mxu0 }
  0xd8   : > { %452 = vst [vmem:[%s801_s22 + $0x18] sm:$0xff] %v621_v55  ;;  %v637_v56 = vpop.f32.mrf.mxu1 }
  0xd9   : > { %468 = vst [vmem:[%s801_s22 + $0x98] sm:$0xff] %v637_v56  ;;  %v325_v57 = vpop.f32.mrf.mxu0 }
  0xda   : > { %450 = vst [vmem:[%s801_s22 + $0x8] sm:$0xff] %v325_v57  ;;  %v389_v58 = vpop.f32.mrf.mxu1 }
  0xdb   : > { %466 = vst [vmem:[%s801_s22 + $0x88] sm:$0xff] %v389_v58  ;;  %v624_v59 = vpop.f32.mrf.mxu0 }
  0xdc   : > { %455 = vst [vmem:[%s801_s22 + $0x30] sm:$0xff] %v624_v59  ;;  %v640_v60 = vpop.f32.mrf.mxu1 }
  0xdd   : > { %471 = vst [vmem:[%s801_s22 + $0xb0] sm:$0xff] %v640_v60  ;;  %v338_v61 = vpop.f32.mrf.mxu0 }
  0xde   : > { %453 = vst [vmem:[%s801_s22 + $0x20] sm:$0xff] %v338_v61  ;;  %v402_v62 = vpop.f32.mrf.mxu1 }
  0xdf   : > { %469 = vst [vmem:[%s801_s22 + $0xa0] sm:$0xff] %v402_v62  ;;  %v625_v63 = vpop.f32.mrf.mxu0 }
  0xe0   : > { %456 = vst [vmem:[%s801_s22 + $0x38] sm:$0xff] %v625_v63  ;;  %v641_v0 = vpop.f32.mrf.mxu1 }
  0xe1   : > { %472 = vst [vmem:[%s801_s22 + $0xb8] sm:$0xff] %v641_v0  ;;  %v341_v1 = vpop.f32.mrf.mxu0 }
  0xe2   : > { %454 = vst [vmem:[%s801_s22 + $0x28] sm:$0xff] %v341_v1  ;;  %v405_v2 = vpop.f32.mrf.mxu1 }
  0xe3   : > { %470 = vst [vmem:[%s801_s22 + $0xa8] sm:$0xff] %v405_v2  ;;  %v628_v3 = vpop.f32.mrf.mxu0 }
  0xe4   : > { %459 = vst [vmem:[%s801_s22 + $0x50] sm:$0xff] %v628_v3  ;;  %v644_v4 = vpop.f32.mrf.mxu1 }
  0xe5   : > { %475 = vst [vmem:[%s801_s22 + $0xd0] sm:$0xff] %v644_v4  ;;  %v354_v5 = vpop.f32.mrf.mxu0 }
  0xe6   : > { %457 = vst [vmem:[%s801_s22 + $0x40] sm:$0xff] %v354_v5  ;;  %v418_v6 = vpop.f32.mrf.mxu1 }
  0xe7   : > { %473 = vst [vmem:[%s801_s22 + $0xc0] sm:$0xff] %v418_v6  ;;  %v629_v7 = vpop.f32.mrf.mxu0 }
  0xe8   : > { %460 = vst [vmem:[%s801_s22 + $0x58] sm:$0xff] %v629_v7  ;;  %v645_v8 = vpop.f32.mrf.mxu1 }
  0xe9   : > { %476 = vst [vmem:[%s801_s22 + $0xd8] sm:$0xff] %v645_v8  ;;  %v357_v9 = vpop.f32.mrf.mxu0 }
  0xea   : > { %458 = vst [vmem:[%s801_s22 + $0x48] sm:$0xff] %v357_v9  ;;  %v421_v10 = vpop.f32.mrf.mxu1 }
  0xeb   : > { %474 = vst [vmem:[%s801_s22 + $0xc8] sm:$0xff] %v421_v10  ;;  %v632_v11 = vpop.f32.mrf.mxu0 }
  0xec   : > { %463 = vst [vmem:[%s801_s22 + $0x70] sm:$0xff] %v632_v11  ;;  %v648_v12 = vpop.f32.mrf.mxu1 }
  0xed   : > { %479 = vst [vmem:[%s801_s22 + $0xf0] sm:$0xff] %v648_v12  ;;  %v370_v13 = vpop.f32.mrf.mxu0 }
  0xee   : > { %461 = vst [vmem:[%s801_s22 + $0x60] sm:$0xff] %v370_v13  ;;  %v434_v14 = vpop.f32.mrf.mxu1 }
  0xef   : > { %477 = vst [vmem:[%s801_s22 + $0xe0] sm:$0xff] %v434_v14  ;;  %v633_v15 = vpop.f32.mrf.mxu0 }
  0xf0   : > { %464 = vst [vmem:[%s801_s22 + $0x78] sm:$0xff] %v633_v15  ;;  %v649_v16 = vpop.f32.mrf.mxu1 }
  0xf1   : > { %480 = vst [vmem:[%s801_s22 + $0xf8] sm:$0xff] %v649_v16  ;;  %v373_v17 = vpop.f32.mrf.mxu0 }
  0xf2   : > { %462 = vst [vmem:[%s801_s22 + $0x68] sm:$0xff] %v373_v17  ;;  %v437_v18 = vpop.f32.mrf.mxu1 }
  0xf3   : > { %478 = vst [vmem:[%s801_s22 + $0xe8] sm:$0xff] %v437_v18 }
  0xf4 PF: > { %s12_s11 = sadd.s32 1, %s700_s11   ;;  %s847_s9 = smov %s696_s10 }
  0xf5   : > { %p9_p5 = scmp.ge.s32.totalorder %s12_s11, 4   ;;  %s848_s10 = smov %s850_s12 }
  0xf7   :  { %11 = sbr.rel (!%p9_p5) target bundleno = 2 (0x2), region = 61 }

// kernel: inception_downsample.10
= control target key start
LH: loop header
LB: loop body
LE: loop exit
PB: predicated region body
PF: predicated region fallthrough
CT: control target
= control target key end

     0   :  { %s592_s12 = smov 0   ;;  %s594_s13 = smov 0   ;;  %s767_s0 = inlined_call_operand.vmem [shape: f32[512,128], index: 0, kind: input, shape index: {}]   ;;  %s768_s1 = inlined_call_operand.vmem [shape: f32[1,128], index: 1, kind: input, shape index: {}]   ;;  %s769_s2 = inlined_call_operand.vmem [shape: f32[1,128], index: 2, kind: input, shape index: {}]   ;;  %s770_s3 = inlined_call_operand.vmem [shape: f32[512,128], index: 3, kind: output, shape index: {}]  }
   0x1   :  { %s596_s14 = smov 0  }
   0x2 LB: > { %s25_s15 = sadd.s32 1, %s566_s13  ;;  %p515_p0 = scmp.ge.s32.totalorder %s570_s14, 1  ;;  %s570_s14 = sphi %s596_s14, %s13_s14   ;;  %s566_s13 = sphi %s594_s13, %s772_s13   ;;  %s562_s12 = sphi %s592_s12, %s771_s12  }
   0x3   : > { %p27_p1 = scmp.ge.s32.totalorder %s25_s15, 2  ;;  %p173_p2 = scmp.lt.s32.totalorder %s570_s14, 3 }
   0x5   : > { %s774_s15 = smov (%p27_p1, %s25_s15), 0  ;;  %p174_p3 = pnand %p515_p0, %p173_p2 }
   0x6   : > { %s516_s16 = sshll.u32 (!%p174_p3), %s562_s12, 5 }
   0x7   : > { %177 = sbr.rel (%p174_p3) target bundleno = 45 (0x2d), region = 32  ;;  %p210_p4 = scmp.lt.s32.totalorder (!%p174_p3), %s516_s16, 63 }
   0xc   : > { %s776_s16 = smov (!%p210_p4, %s516_s16), 63  ;;  %v613_v0 = vld [vmem:[%s768_s1] ss:$0 sm:$0xff] }
   0xd   : > { %s517_s17 = sshll.u32 %s776_s16, 3  ;;  %v623_v1 = vld [vmem:[%s769_s2] ss:$0 sm:$0xff] }
   0xe   : > { %s618_s22 = scalar_lea.vmem %s767_s0, %s517_s17  ;;  %s646_s27 = scalar_lea.vmem %s770_s3, %s517_s17 }
   0xf   : > { %v233_v2 = vld [vmem:[%s618_s22] sm:$0xff]  ;;  %v234_v3 = vld [vmem:[%s618_s22 + $0x8] sm:$0xff]  ;;  %v235_v4 = vld [vmem:[%s618_s22 + $0x10] sm:$0xff] }
  0x10   : > { %v272_v5 = vmul.f32 %v613_v0, %v233_v2  ;;  %v273_v6 = vmul.f32 %v613_v0, %v234_v3  ;;  %v274_v7 = vmul.f32 %v613_v0, %v235_v4  ;;  %v236_v8 = vld [vmem:[%s618_s22 + $0x18] sm:$0xff]  ;;  %v237_v9 = vld [vmem:[%s618_s22 + $0x20] sm:$0xff]  ;;  %v238_v10 = vld [vmem:[%s618_s22 + $0x28] sm:$0xff] }
  0x11   : > { %v275_v11 = vmul.f32 %v613_v0, %v236_v8  ;;  %v276_v12 = vmul.f32 %v613_v0, %v237_v9  ;;  %v277_v13 = vmul.f32 %v613_v0, %v238_v10  ;;  %v239_v14 = vld [vmem:[%s618_s22 + $0x30] sm:$0xff]  ;;  %v240_v15 = vld [vmem:[%s618_s22 + $0x38] sm:$0xff]  ;;  %v241_v24 = vld [vmem:[%s618_s22 + $0x40] sm:$0xff] }
  0x12   : > { %v311_v16 = vadd.f32 %v623_v1, %v272_v5  ;;  %v312_v17 = vadd.f32 %v623_v1, %v273_v6  ;;  %v313_v18 = vadd.f32 %v623_v1, %v274_v7  ;;  %v278_v19 = vmul.f32 %v613_v0, %v239_v14  ;;  %v242_v25 = vld [vmem:[%s618_s22 + $0x48] sm:$0xff]  ;;  %v243_v26 = vld [vmem:[%s618_s22 + $0x50] sm:$0xff]  ;;  %v244_v31 = vld [vmem:[%s618_s22 + $0x58] sm:$0xff] }
  0x13   : > { %v314_v20 = vadd.f32 %v623_v1, %v275_v11  ;;  %v315_v21 = vadd.f32 %v623_v1, %v276_v12  ;;  %v316_v22 = vadd.f32 %v623_v1, %v277_v13  ;;  %v279_v23 = vmul.f32 %v613_v0, %v240_v15  ;;  %v245_v32 = vld [vmem:[%s618_s22 + $0x60] sm:$0xff]  ;;  %v246_v33 = vld [vmem:[%s618_s22 + $0x68] sm:$0xff]  ;;  %v247_v38 = vld [vmem:[%s618_s22 + $0x70] sm:$0xff] }
  0x14   : > { %v343_v27 = vmax.f32 %v311_v16, 0.0  ;;  %v344_v28 = vmax.f32 %v312_v17, 0.0  ;;  %v345_v29 = vmax.f32 %v313_v18, 0.0  ;;  %v317_v30 = vadd.f32 %v623_v1, %v278_v19  ;;  %v248_v43 = vld [vmem:[%s618_s22 + $0x78] sm:$0xff]  ;;  %v249_v56 = vld [vmem:[%s618_s22 + $0x80] sm:$0xff]  ;;  %v250_v57 = vld [vmem:[%s618_s22 + $0x88] sm:$0xff] }
  0x15   : > { %v346_v34 = vmax.f32 %v314_v20, 0.0  ;;  %v347_v35 = vmax.f32 %v315_v21, 0.0  ;;  %v348_v36 = vmax.f32 %v316_v22, 0.0  ;;  %v318_v37 = vadd.f32 %v623_v1, %v279_v23  ;;  %v251_v58 = vld [vmem:[%s618_s22 + $0x90] sm:$0xff]  ;;  %v252_v63 = vld [vmem:[%s618_s22 + $0x98] sm:$0xff]  ;;  %v253_v2 = vld [vmem:[%s618_s22 + $0xa0] sm:$0xff] }
  0x16   : > { %375 = vst [vmem:[%s646_s27] sm:$0xff] %v343_v27  ;;  %376 = vst [vmem:[%s646_s27 + $0x8] sm:$0xff] %v344_v28  ;;  %v349_v39 = vmax.f32 %v317_v30, 0.0  ;;  %v280_v40 = vmul.f32 %v613_v0, %v241_v24  ;;  %v281_v41 = vmul.f32 %v613_v0, %v242_v25  ;;  %v282_v42 = vmul.f32 %v613_v0, %v243_v26  ;;  %v254_v3 = vld [vmem:[%s618_s22 + $0xa8] sm:$0xff]  ;;  %v255_v8 = vld [vmem:[%s618_s22 + $0xb0] sm:$0xff] }
  0x17   : > { %377 = vst [vmem:[%s646_s27 + $0x10] sm:$0xff] %v345_v29  ;;  %378 = vst [vmem:[%s646_s27 + $0x18] sm:$0xff] %v346_v34  ;;  %v350_v44 = vmax.f32 %v318_v37, 0.0  ;;  %v283_v45 = vmul.f32 %v613_v0, %v244_v31  ;;  %v284_v46 = vmul.f32 %v613_v0, %v245_v32  ;;  %v285_v47 = vmul.f32 %v613_v0, %v246_v33  ;;  %v256_v13 = vld [vmem:[%s618_s22 + $0xb8] sm:$0xff]  ;;  %v257_v26 = vld [vmem:[%s618_s22 + $0xc0] sm:$0xff] }
  0x18   : > { %379 = vst [vmem:[%s646_s27 + $0x20] sm:$0xff] %v347_v35  ;;  %380 = vst [vmem:[%s646_s27 + $0x28] sm:$0xff] %v348_v36  ;;  %v319_v48 = vadd.f32 %v623_v1, %v280_v40  ;;  %v320_v49 = vadd.f32 %v623_v1, %v281_v41  ;;  %v321_v50 = vadd.f32 %v623_v1, %v282_v42  ;;  %v258_v27 = vld [vmem:[%s618_s22 + $0xc8] sm:$0xff]  ;;  %v259_v28 = vld [vmem:[%s618_s22 + $0xd0] sm:$0xff] }
  0x19   : > { %381 = vst [vmem:[%s646_s27 + $0x30] sm:$0xff] %v349_v39  ;;  %v286_v51 = vmul.f32 %v613_v0, %v247_v38  ;;  %382 = vst [vmem:[%s646_s27 + $0x38] sm:$0xff] %v350_v44  ;;  %v322_v52 = vadd.f32 %v623_v1, %v283_v45  ;;  %v323_v53 = vadd.f32 %v623_v1, %v284_v46  ;;  %v260_v33 = vld [vmem:[%s618_s22 + $0xd8] sm:$0xff]  ;;  %v261_v34 = vld [vmem:[%s618_s22 + $0xe0] sm:$0xff] }
  0x1a   : > { %v324_v54 = vadd.f32 %v623_v1, %v285_v47  ;;  %v287_v55 = vmul.f32 %v613_v0, %v248_v43  ;;  %v351_v59 = vmax.f32 %v319_v48, 0.0  ;;  %v352_v60 = vmax.f32 %v320_v49, 0.0  ;;  %v262_v35 = vld [vmem:[%s618_s22 + $0xe8] sm:$0xff]  ;;  %v263_v40 = vld [vmem:[%s618_s22 + $0xf0] sm:$0xff]  ;;  %v264_v45 = vld [vmem:[%s618_s22 + $0xf8] sm:$0xff] }
  0x1b   : > { %v353_v61 = vmax.f32 %v321_v50, 0.0  ;;  %v325_v62 = vadd.f32 %v623_v1, %v286_v51  ;;  %v354_v4 = vmax.f32 %v322_v52, 0.0  ;;  %v355_v5 = vmax.f32 %v323_v53, 0.0 }
  0x1c   : > { %v356_v6 = vmax.f32 %v324_v54, 0.0  ;;  %v326_v7 = vadd.f32 %v623_v1, %v287_v55  ;;  %383 = vst [vmem:[%s646_s27 + $0x40] sm:$0xff] %v351_v59  ;;  %384 = vst [vmem:[%s646_s27 + $0x48] sm:$0xff] %v352_v60  ;;  %v288_v10 = vmul.f32 %v613_v0, %v249_v56  ;;  %v289_v11 = vmul.f32 %v613_v0, %v250_v57 }
  0x1d   : > { %385 = vst [vmem:[%s646_s27 + $0x50] sm:$0xff] %v353_v61  ;;  %v357_v9 = vmax.f32 %v325_v62, 0.0  ;;  %v290_v12 = vmul.f32 %v613_v0, %v251_v58  ;;  %386 = vst [vmem:[%s646_s27 + $0x58] sm:$0xff] %v354_v4  ;;  %v291_v15 = vmul.f32 %v613_v0, %v252_v63  ;;  %v292_v16 = vmul.f32 %v613_v0, %v253_v2 }
  0x1e   : > { %387 = vst [vmem:[%s646_s27 + $0x60] sm:$0xff] %v355_v5  ;;  %388 = vst [vmem:[%s646_s27 + $0x68] sm:$0xff] %v356_v6  ;;  %v358_v14 = vmax.f32 %v326_v7, 0.0  ;;  %v293_v17 = vmul.f32 %v613_v0, %v254_v3  ;;  %v327_v18 = vadd.f32 %v623_v1, %v288_v10  ;;  %v328_v19 = vadd.f32 %v623_v1, %v289_v11 }
  0x1f   : > { %389 = vst [vmem:[%s646_s27 + $0x70] sm:$0xff] %v357_v9  ;;  %v329_v20 = vadd.f32 %v623_v1, %v290_v12  ;;  %v294_v21 = vmul.f32 %v613_v0, %v255_v8  ;;  %v330_v22 = vadd.f32 %v623_v1, %v291_v15  ;;  %v331_v23 = vadd.f32 %v623_v1, %v292_v16 }
  0x20   : > { %390 = vst [vmem:[%s646_s27 + $0x78] sm:$0xff] %v358_v14  ;;  %v332_v24 = vadd.f32 %v623_v1, %v293_v17  ;;  %v295_v25 = vmul.f32 %v613_v0, %v256_v13  ;;  %v359_v29 = vmax.f32 %v327_v18, 0.0  ;;  %v360_v30 = vmax.f32 %v328_v19, 0.0 }
  0x21   : > { %v361_v31 = vmax.f32 %v329_v20, 0.0  ;;  %v333_v32 = vadd.f32 %v623_v1, %v294_v21  ;;  %v362_v36 = vmax.f32 %v330_v22, 0.0  ;;  %v363_v37 = vmax.f32 %v331_v23, 0.0 }
  0x22   : > { %v364_v38 = vmax.f32 %v332_v24, 0.0  ;;  %v334_v39 = vadd.f32 %v623_v1, %v295_v25  ;;  %391 = vst [vmem:[%s646_s27 + $0x80] sm:$0xff] %v359_v29  ;;  %392 = vst [vmem:[%s646_s27 + $0x88] sm:$0xff] %v360_v30  ;;  %v296_v42 = vmul.f32 %v613_v0, %v257_v26  ;;  %v297_v43 = vmul.f32 %v613_v0, %v258_v27 }
  0x23   : > { %393 = vst [vmem:[%s646_s27 + $0x90] sm:$0xff] %v361_v31  ;;  %v365_v41 = vmax.f32 %v333_v32, 0.0  ;;  %v298_v44 = vmul.f32 %v613_v0, %v259_v28  ;;  %394 = vst [vmem:[%s646_s27 + $0x98] sm:$0xff] %v362_v36  ;;  %v299_v47 = vmul.f32 %v613_v0, %v260_v33  ;;  %v300_v48 = vmul.f32 %v613_v0, %v261_v34 }
  0x24   : > { %395 = vst [vmem:[%s646_s27 + $0xa0] sm:$0xff] %v363_v37  ;;  %396 = vst [vmem:[%s646_s27 + $0xa8] sm:$0xff] %v364_v38  ;;  %v366_v46 = vmax.f32 %v334_v39, 0.0  ;;  %v301_v49 = vmul.f32 %v613_v0, %v262_v35  ;;  %v335_v50 = vadd.f32 %v623_v1, %v296_v42  ;;  %v336_v51 = vadd.f32 %v623_v1, %v297_v43 }
  0x25   : > { %397 = vst [vmem:[%s646_s27 + $0xb0] sm:$0xff] %v365_v41  ;;  %v337_v52 = vadd.f32 %v623_v1, %v298_v44  ;;  %v302_v53 = vmul.f32 %v613_v0, %v263_v40  ;;  %v338_v54 = vadd.f32 %v623_v1, %v299_v47  ;;  %v339_v55 = vadd.f32 %v623_v1, %v300_v48 }
  0x26   : > { %398 = vst [vmem:[%s646_s27 + $0xb8] sm:$0xff] %v366_v46  ;;  %v340_v56 = vadd.f32 %v623_v1, %v301_v49  ;;  %v303_v57 = vmul.f32 %v613_v0, %v264_v45  ;;  %v367_v58 = vmax.f32 %v335_v50, 0.0  ;;  %v368_v59 = vmax.f32 %v336_v51, 0.0 }
  0x27   : > { %v369_v60 = vmax.f32 %v337_v52, 0.0  ;;  %v341_v61 = vadd.f32 %v623_v1, %v302_v53  ;;  %v370_v62 = vmax.f32 %v338_v54, 0.0  ;;  %v371_v63 = vmax.f32 %v339_v55, 0.0 }
  0x28   : > { %v372_v2 = vmax.f32 %v340_v56, 0.0  ;;  %v342_v3 = vadd.f32 %v623_v1, %v303_v57  ;;  %399 = vst [vmem:[%s646_s27 + $0xc0] sm:$0xff] %v367_v58  ;;  %400 = vst [vmem:[%s646_s27 + $0xc8] sm:$0xff] %v368_v59 }
  0x29   : > { %401 = vst [vmem:[%s646_s27 + $0xd0] sm:$0xff] %v369_v60  ;;  %v373_v4 = vmax.f32 %v341_v61, 0.0  ;;  %402 = vst [vmem:[%s646_s27 + $0xd8] sm:$0xff] %v370_v62 }
  0x2a   : > { %403 = vst [vmem:[%s646_s27 + $0xe0] sm:$0xff] %v371_v63  ;;  %404 = vst [vmem:[%s646_s27 + $0xe8] sm:$0xff] %v372_v2  ;;  %v374_v0 = vmax.f32 %v342_v3, 0.0 }
  0x2b   : > { %405 = vst [vmem:[%s646_s27 + $0xf0] sm:$0xff] %v373_v4 }
  0x2c   : > { %406 = vst [vmem:[%s646_s27 + $0xf8] sm:$0xff] %v374_v0 }
  0x2d PF: > { %s13_s14 = sadd.s32 1, %s570_s14   ;;  %s771_s12 = smov %s566_s13 }
  0x2e   : > { %p10_p5 = scmp.ge.s32.totalorder %s13_s14, 4   ;;  %s772_s13 = smov %s774_s15 }
  0x30   :  { %12 = sbr.rel (!%p10_p5) target bundleno = 2 (0x2), region = 68 }

// kernel: inception_downsample.17
= control target key start
LH: loop header
LB: loop body
LE: loop exit
PB: predicated region body
PF: predicated region fallthrough
CT: control target
= control target key end

     0   :  { %s1280_s6 = smov 0   ;;  %s1963_s0 = inlined_call_operand.vmem [shape: f32[2,290,4], index: 0, kind: input, shape index: {}]   ;;  %s1964_s1 = inlined_call_operand.vmem [shape: f32[2,256,4], index: 1, kind: output, shape index: {}]  }
   0x1 LB: > { %s1242_s7 = sadd.s32 4294967295, %s1268_s6   ;;  %p1246_p0 = scmp.ge.s32.totalorder %s1268_s6, 1  ;;  %s1268_s6 = sphi %s1280_s6, %s11_s6  }
   0x2   : > { %p87_p1 = scmp.lt.s32.totalorder %s1268_s6, 3 }
   0x4   : > { %p88_p2 = pnand %p1246_p0, %p87_p1 }
   0x5   : > { %p107_p3 = scmp.lt.s32.totalorder (!%p88_p2), %s1242_s7, 1 }
   0x6   : > { %91 = sbr.rel (%p88_p2) target bundleno = 136 (0x88), region = 24 }
   0xb   : > { %v117_v0 = vlaneseq  ;;  %s2030_s7 = smov (!%p107_p3, %s1242_s7), 1  ;;  %vm1154_vm5 = vcmask 31744  }
   0xc   : > { %s1253_s8 = smul.u32 296, %s2030_s7  ;;  %s1252_s12 = sshll.u32 %s2030_s7, 8 }
   0xd   : > { %v1290_v1 = vshrl.u32 %v117_v0, 7  ;;  %s1434_s15 = scalar_lea.vmem %s1964_s1, %s1252_s12 }
   0xe   : > { %s1304_s11 = scalar_lea.vmem %s1963_s0, %s1253_s8 }
   0xf   : > { %v120_v2 = vadd.s32 16, %v1290_v1  ;;  %v122_v3 = vadd.s32 32, %v1290_v1  ;;  %v154_v4 = vand.u32 15, %v1290_v1  ;;  %v119_v5 = vadd.s32 8, %v1290_v1  ;;  %v598_v12 = vld [vmem:[%s1304_s11] sm:$0xff]  ;;  %v600_v13 = vld [vmem:[%s1304_s11 + $0x10] sm:$0xff] }
  0x10   : > { %v124_v6 = vadd.s32 48, %v1290_v1  ;;  %v1299_v7 = vadd.s32 24, %v1290_v1  ;;  %v1311_v11 = vadd.s32 64, %v1290_v1  ;;  %v1316_v14 = vld [vmem:[%s1304_s11 + $0x20] sm:$0xff]  ;;  %v1319_v17 = vadd.s32 40, %v1290_v1  ;;  %v1330_v20 = vld [vmem:[%s1304_s11 + $0x30] sm:$0xff] }
  0x11   : > { %v168_v8 = vand.u32 15, %v120_v2  ;;  %v182_v9 = vand.u32 15, %v122_v3  ;;  %vm1306_vm0 = vcmp.ne.s32.totalorder %v154_v4, 0  ;;  %v161_v15 = vand.u32 15, %v119_v5  ;;  %v662_v22 = vld [vmem:[%s1304_s11 + $0x1] sm:$0xff]  ;;  %v664_v23 = vld [vmem:[%s1304_s11 + $0x11] sm:$0xff] }
  0x12   : > { %v196_v16 = vand.u32 15, %v124_v6  ;;  %v630_v21 = vsel %vm1306_vm0, %v598_v12, -inf  ;;  %v1342_v26 = vld [vmem:[%s1304_s11 + $0x21] sm:$0xff]  ;;  %v728_v29 = vld [vmem:[%s1304_s11 + $0x12] sm:$0xff]  ;;  %v175_v30 = vand.u32 15, %v1299_v7  ;;  %v824_v34 = vsel %vm1306_vm0, %v600_v13, -inf }
  0x13   : > { %vm1321_vm1 = vcmp.ne.s32.totalorder %v168_v8, 0  ;;  %vm1325_vm2 = vcmp.ne.s32.totalorder %v182_v9, 0  ;;  %v694_v27 = vmax.f32 %v630_v21, %v662_v22  ;;  %v726_v28 = vld [vmem:[%s1304_s11 + $0x2] sm:$0xff]  ;;  %vm1360_vm3 = vcmp.ne.s32.totalorder %v161_v15, 15  ;;  %v727_v47 = vld [vmem:[%s1304_s11 + $0xa] sm:$0xff]  ;;  %v601_v51 = vld [vmem:[%s1304_s11 + $0x18] sm:$0xff] }
  0x14   : > { %v632_v24 = vsel %vm1321_vm1, %v600_v13, -inf  ;;  %v634_v25 = vsel %vm1325_vm2, %v1316_v14, -inf  ;;  %v1349_v33 = vld [vmem:[%s1304_s11 + $0x22] sm:$0xff]  ;;  %v826_v35 = vsel %vm1321_vm1, %v1316_v14, -inf  ;;  %v828_v38 = vsel %vm1325_vm2, %v1330_v20, -inf  ;;  %v665_v52 = vld [vmem:[%s1304_s11 + $0x19] sm:$0xff] }
  0x15   : > { %v696_v31 = vmax.f32 %v632_v24, %v664_v23  ;;  %v698_v32 = vmax.f32 %v634_v25, %v1342_v26  ;;  %v599_v36 = vld [vmem:[%s1304_s11 + $0x8] sm:$0xff]  ;;  %v790_v37 = vmax.f32 %v694_v27, %v726_v28  ;;  %vm1368_vm4 = vcmp.ne.s32.totalorder %v196_v16, 0  ;;  %v668_v54 = vld [vmem:[%s1304_s11 + $0x31] sm:$0xff]  ;;  %v729_v59 = vld [vmem:[%s1304_s11 + $0x1a] sm:$0xff] }
  0x16   : > { %v1365_v40 = vld [vmem:[%s1304_s11 + $0x28] sm:$0xff]  ;;  %v636_v48 = vsel %vm1368_vm4, %v1330_v20, -inf  ;;  %v990_v50 = vsel %vm1306_vm0, %v1316_v14, -inf  ;;  %v759_v53 = vsel %vm1360_vm3, %v727_v47, -inf  ;;  %v210_v55 = vand.u32 15, %v1311_v11  ;;  %v606_v61 = vld [vmem:[%s1304_s11 + $0x40] sm:$0xff] }
  0x17   : > { %v663_v41 = vld [vmem:[%s1304_s11 + $0x9] sm:$0xff]  ;;  %v792_v43 = vmax.f32 %v696_v31, %v728_v29  ;;  %v794_v44 = vmax.f32 %v698_v32, %v1349_v33  ;;  %v856_v49 = vmax.f32 %v790_v37, %v824_v34  ;;  %v732_v62 = vld [vmem:[%s1304_s11 + $0x32] sm:$0xff]  ;;  %v925_v0 = vsel %vm1360_vm3, %v729_v59, -inf  ;;  %v670_v25 = vld [vmem:[%s1304_s11 + $0x41] sm:$0xff] }
  0x18   : > { %v1374_v45 = vld [vmem:[%s1304_s11 + $0x29] sm:$0xff]  ;;  %v695_v46 = vmax.f32 %v599_v36, %v663_v41  ;;  %v700_v2 = vmax.f32 %v636_v48, %v668_v54  ;;  %v830_v3 = vsel %vm1368_vm4, %v606_v61, -inf  ;;  %vm1399_vm6 = vcmp.ne.s32.totalorder %v175_v30, 15  ;;  %v1439_v41 = vld [vmem:[%s1304_s11 + $0x38] sm:$0xff] }
  0x19   : > { %v858_v56 = vmax.f32 %v792_v43, %v826_v35  ;;  %v860_v57 = vmax.f32 %v794_v44, %v828_v38  ;;  %v699_v58 = vmax.f32 %v1365_v40, %v1374_v45  ;;  %v890_v63 = vmax.f32 %v856_v49, %v664_v23  ;;  %v731_v9 = vld [vmem:[%s1304_s11 + $0x2a] sm:$0xff]  ;;  %v734_v34 = vld [vmem:[%s1304_s11 + $0x42] sm:$0xff]  ;;  %v1442_v43 = vld [vmem:[%s1304_s11 + $0x39] sm:$0xff] }
  0x1a   : > { %v791_v60 = vmax.f32 %v695_v46, %v759_v53  ;;  %v796_v10 = vmax.f32 %v700_v2, %v732_v62  ;;  %v992_v11 = vsel %vm1321_vm1, %v1330_v20, -inf  ;;  %v697_v12 = vmax.f32 %v601_v51, %v665_v52  ;;  %v733_v19 = vld [vmem:[%s1304_s11 + $0x3a] sm:$0xff]  ;;  %v671_v7 = vld [vmem:[%s1304_s11 + $0x49] sm:$0xff] }
  0x1b   : > { %v892_v4 = vmax.f32 %v858_v56, %v1342_v26  ;;  %v894_v6 = vmax.f32 %v860_v57, %v668_v54  ;;  %v956_v8 = vmax.f32 %v890_v63, %v728_v29  ;;  %v1091_v15 = vsel %vm1360_vm3, %v731_v9, -inf  ;;  %v1421_v29 = vld [vmem:[%s1304_s11 + $0x50] sm:$0xff] }
  0x1c   : > { %v857_v5 = vmax.f32 %v791_v60, %v601_v51  ;;  %v761_v16 = vsel %vm1399_vm6, %v729_v59, -inf  ;;  %v862_v22 = vmax.f32 %v796_v10, %v830_v3  ;;  %v927_v27 = vsel %vm1399_vm6, %v731_v9, -inf }
  0x1d   : > { %v958_v13 = vmax.f32 %v892_v4, %v1349_v33  ;;  %v1022_v21 = vmax.f32 %v956_v8, %v990_v50  ;;  %v960_v23 = vmax.f32 %v894_v6, %v732_v62  ;;  %v793_v24 = vmax.f32 %v697_v12, %v761_v16  ;;  %v607_v6 = vld [vmem:[%s1304_s11 + $0x48] sm:$0xff] }
  0x1e   : > { %v891_v14 = vmax.f32 %v857_v5, %v665_v52  ;;  %vm1416_vm7 = vcmp.ne.s32.totalorder %v210_v55, 0  ;;  %v896_v38 = vmax.f32 %v862_v22, %v670_v25  ;;  %v994_v46 = vsel %vm1325_vm2, %v606_v61, -inf  ;;  %v611_v16 = vld [vmem:[%s1304_s11 + $0x68] sm:$0xff] }
  0x1f   : > { %v1024_v20 = vmax.f32 %v958_v13, %v992_v11  ;;  %v1056_v30 = vmax.f32 %v1022_v21, %v1342_v26  ;;  %v859_v31 = vmax.f32 %v793_v24, %v1365_v40  ;;  %v638_v32 = vsel %vm1416_vm7, %v606_v61, -inf  ;;  %v610_v13 = vld [vmem:[%s1304_s11 + $0x60] sm:$0xff]  ;;  %v675_v21 = vld [vmem:[%s1304_s11 + $0x69] sm:$0xff] }
  0x20   : > { %v957_v18 = vmax.f32 %v891_v14, %v925_v0  ;;  %v832_v35 = vsel %vm1416_vm7, %v1421_v29, -inf  ;;  %v702_v26 = vmax.f32 %v638_v32, %v670_v25  ;;  %v189_v47 = vand.u32 15, %v1319_v17 }
  0x21   : > { %v1058_v37 = vmax.f32 %v1024_v20, %v668_v54  ;;  %v1122_v39 = vmax.f32 %v1056_v30, %v1349_v33  ;;  %v893_v44 = vmax.f32 %v859_v31, %v1374_v45  ;;  %v962_v51 = vmax.f32 %v896_v38, %v734_v34  ;;  %v1506_v30 = vld [vmem:[%s1304_s11 + $0x58] sm:$0xff] }
  0x22   : > { %v1023_v36 = vmax.f32 %v957_v18, %v1365_v40  ;;  %v798_v50 = vmax.f32 %v702_v26, %v734_v34  ;;  %v1026_v52 = vmax.f32 %v960_v23, %v994_v46  ;;  %vm1451_vm8 = vcmp.ne.s32.totalorder %v189_v47, 15  ;;  %v1509_v31 = vld [vmem:[%s1304_s11 + $0x59] sm:$0xff] }
  0x23   : > { %v1124_v49 = vmax.f32 %v1058_v37, %v732_v62  ;;  %1155 = vst.msk [vmem:[%s1434_s15] sm:$0xff] %vm1154_vm5, %v1122_v39  ;;  %v959_v33 = vmax.f32 %v893_v44, %v927_v27  ;;  %v701_v17 = vmax.f32 %v1439_v41, %v1442_v43  ;;  %v763_v56 = vsel %vm1451_vm8, %v731_v9, -inf  ;;  %v672_v62 = vld [vmem:[%s1304_s11 + $0x51] sm:$0xff] }
  0x24   : > { %v1057_v48 = vmax.f32 %v1023_v36, %v1374_v45  ;;  %v864_v55 = vmax.f32 %v798_v50, %v832_v35  ;;  %v1093_v59 = vsel %vm1399_vm6, %v733_v19, -inf  ;;  %v1060_v60 = vmax.f32 %v1026_v52, %v670_v25  ;;  %v736_v45 = vld [vmem:[%s1304_s11 + $0x52] sm:$0xff]  ;;  %v735_v25 = vld [vmem:[%s1304_s11 + $0x4a] sm:$0xff]  ;;  %v738_v52 = vld [vmem:[%s1304_s11 + $0x62] sm:$0xff] }
  0x25   : > { %1157 = vst.msk [vmem:[%s1434_s15 + $0x10] sm:$0xff] %vm1154_vm5, %v1124_v49  ;;  %v1025_v57 = vmax.f32 %v959_v33, %v1439_v41  ;;  %v795_v61 = vmax.f32 %v699_v58, %v763_v56  ;;  %v128_v63 = vadd.s32 80, %v1290_v1  ;;  %v996_v2 = vsel %vm1368_vm4, %v1421_v29, -inf }
  0x26   : > { %v1123_v54 = vmax.f32 %v1057_v48, %v1091_v15  ;;  %v898_v0 = vmax.f32 %v864_v55, %v672_v62  ;;  %v125_v3 = vadd.s32 56, %v1290_v1  ;;  %v1126_v5 = vmax.f32 %v1060_v60, %v734_v34  ;;  %v612_v55 = vld [vmem:[%s1304_s11 + $0x70] sm:$0xff]  ;;  %v678_v48 = vld [vmem:[%s1304_s11 + $0x81] sm:$0xff] }
  0x27   : > { %v1059_v4 = vmax.f32 %v1025_v57, %v1442_v43  ;;  %v861_v40 = vmax.f32 %v795_v61, %v1439_v41  ;;  %v1028_v58 = vmax.f32 %v962_v51, %v996_v2  ;;  %v929_v8 = vsel %vm1451_vm8, %v733_v19, -inf  ;;  %v674_v41 = vld [vmem:[%s1304_s11 + $0x61] sm:$0xff] }
  0x28   : > { %1156 = vst.msk [vmem:[%s1434_s15 + $0x8] sm:$0xff] %vm1154_vm5, %v1123_v54  ;;  %v224_v9 = vand.u32 15, %v128_v63  ;;  %v964_v42 = vmax.f32 %v898_v0, %v736_v45  ;;  %v203_v10 = vand.u32 15, %v125_v3  ;;  %1159 = vst.msk [vmem:[%s1434_s15 + $0x20] sm:$0xff] %vm1154_vm5, %v1126_v5  ;;  %v130_v15 = vadd.s32 96, %v1290_v1 }
  0x29   : > { %v1125_v11 = vmax.f32 %v1059_v4, %v1093_v59  ;;  %v895_v12 = vmax.f32 %v861_v40, %v1442_v43  ;;  %v1062_v14 = vmax.f32 %v1028_v58, %v672_v62  ;;  %v998_v22 = vsel %vm1416_vm7, %v610_v13, -inf  ;;  %v676_v40 = vld [vmem:[%s1304_s11 + $0x71] sm:$0xff] }
  0x2a   : > { %vm1488_vm9 = vcmp.ne.s32.totalorder %v224_v9, 0  ;;  %vm1492_vm10 = vcmp.ne.s32.totalorder %v203_v10, 15  ;;  %v127_v23 = vadd.s32 72, %v1290_v1  ;;  %v703_v24 = vmax.f32 %v607_v6, %v671_v7  ;;  %v748_v9 = vld [vmem:[%s1304_s11 + $0xb2] sm:$0xff] }
  0x2b   : > { %1158 = vst.msk [vmem:[%s1434_s15 + $0x18] sm:$0xff] %vm1154_vm5, %v1125_v11  ;;  %v961_v18 = vmax.f32 %v895_v12, %v929_v8  ;;  %v640_v20 = vsel %vm1488_vm9, %v1421_v29, -inf  ;;  %v1128_v27 = vmax.f32 %v1062_v14, %v736_v45  ;;  %v1095_v28 = vsel %vm1451_vm8, %v735_v25, -inf  ;;  %v740_v11 = vld [vmem:[%s1304_s11 + $0x72] sm:$0xff] }
  0x2c   : > { %v704_v32 = vmax.f32 %v640_v20, %v672_v62  ;;  %v834_v34 = vsel %vm1488_vm9, %v610_v13, -inf  ;;  %v765_v35 = vsel %vm1492_vm10, %v733_v19, -inf  ;;  %v238_v37 = vand.u32 15, %v130_v15 }
  0x2d   : > { %v1027_v36 = vmax.f32 %v961_v18, %v607_v6  ;;  %1161 = vst.msk [vmem:[%s1434_s15 + $0x30] sm:$0xff] %vm1154_vm5, %v1128_v27  ;;  %v797_v29 = vmax.f32 %v701_v17, %v765_v35  ;;  %v1030_v26 = vmax.f32 %v964_v42, %v998_v22  ;;  %v705_v39 = vmax.f32 %v1506_v30, %v1509_v31  ;;  %v737_v17 = vld [vmem:[%s1304_s11 + $0x5a] sm:$0xff] }
  0x2e   : > { %v800_v38 = vmax.f32 %v704_v32, %v736_v45  ;;  %v217_v43 = vand.u32 15, %v127_v23  ;;  %v132_v44 = vadd.s32 112, %v1290_v1  ;;  %vm1523_vm11 = vcmp.ne.s32.totalorder %v238_v37, 0  ;;  %v614_v42 = vld [vmem:[%s1304_s11 + $0x80] sm:$0xff]  ;;  %v739_v32 = vld [vmem:[%s1304_s11 + $0x6a] sm:$0xff] }
  0x2f   : > { %v1061_v46 = vmax.f32 %v1027_v36, %v671_v7  ;;  %v863_v47 = vmax.f32 %v797_v29, %v607_v6  ;;  %v1064_v49 = vmax.f32 %v1030_v26, %v674_v41  ;;  %v931_v33 = vsel %vm1492_vm10, %v735_v25, -inf }
  0x30   : > { %v866_v50 = vmax.f32 %v800_v38, %v834_v34  ;;  %v642_v51 = vsel %vm1523_vm11, %v610_v13, -inf  ;;  %vm1532_vm12 = vcmp.ne.s32.totalorder %v217_v43, 15  ;;  %v1097_v59 = vsel %vm1492_vm10, %v737_v17, -inf }
  0x31   : > { %v1127_v54 = vmax.f32 %v1061_v46, %v1095_v28  ;;  %v897_v19 = vmax.f32 %v863_v47, %v671_v7  ;;  %v706_v56 = vmax.f32 %v642_v51, %v674_v41  ;;  %v1130_v57 = vmax.f32 %v1064_v49, %v738_v52 }
  0x32   : > { %v836_v60 = vsel %vm1523_vm11, %v612_v55, -inf  ;;  %v900_v61 = vmax.f32 %v866_v50, %v674_v41  ;;  %v767_v62 = vsel %vm1532_vm12, %v735_v25, -inf  ;;  %v252_v3 = vand.u32 15, %v132_v44 }
  0x33   : > { %1160 = vst.msk [vmem:[%s1434_s15 + $0x28] sm:$0xff] %vm1154_vm5, %v1127_v54  ;;  %v963_v63 = vmax.f32 %v897_v19, %v931_v33  ;;  %v802_v0 = vmax.f32 %v706_v56, %v738_v52  ;;  %1163 = vst.msk [vmem:[%s1434_s15 + $0x40] sm:$0xff] %vm1154_vm5, %v1130_v57  ;;  %v799_v2 = vmax.f32 %v703_v24, %v767_v62  ;;  %v933_v5 = vsel %vm1532_vm12, %v737_v17, -inf  ;;  %v1603_v54 = vld [vmem:[%s1304_s11 + $0x79] sm:$0xff]  ;;  %v742_v19 = vld [vmem:[%s1304_s11 + $0x82] sm:$0xff] }
  0x34   : > { %v966_v4 = vmax.f32 %v900_v61, %v738_v52  ;;  %v1000_v45 = vsel %vm1488_vm9, %v612_v55, -inf  ;;  %v129_v58 = vadd.s32 88, %v1290_v1  ;;  %vm1556_vm13 = vcmp.ne.s32.totalorder %v252_v3, 0 }
  0x35   : > { %v1029_v6 = vmax.f32 %v963_v63, %v1506_v30  ;;  %v868_v7 = vmax.f32 %v802_v0, %v836_v60  ;;  %v865_v8 = vmax.f32 %v799_v2, %v1506_v30  ;;  %v644_v10 = vsel %vm1556_vm13, %v612_v55, -inf  ;;  %v616_v30 = vld [vmem:[%s1304_s11 + $0x90] sm:$0xff] }
  0x36   : > { %v838_v12 = vsel %vm1556_vm13, %v614_v42, -inf  ;;  %v1032_v13 = vmax.f32 %v966_v4, %v1000_v45  ;;  %v231_v14 = vand.u32 15, %v129_v58  ;;  %v708_v23 = vmax.f32 %v644_v10, %v676_v40 }
  0x37   : > { %v1063_v15 = vmax.f32 %v1029_v6, %v1509_v31  ;;  %v899_v22 = vmax.f32 %v865_v8, %v1509_v31  ;;  %v902_v24 = vmax.f32 %v868_v7, %v676_v40  ;;  %v134_v20 = vadd.s32 128, %v1290_v1  ;;  %v680_v6 = vld [vmem:[%s1304_s11 + $0x91] sm:$0xff] }
  0x38   : > { %v1066_v25 = vmax.f32 %v1032_v13, %v676_v40  ;;  %vm1570_vm14 = vcmp.ne.s32.totalorder %v231_v14, 15  ;;  %v1002_v27 = vsel %vm1523_vm11, %v614_v42, -inf  ;;  %v804_v35 = vmax.f32 %v708_v23, %v740_v11  ;;  %v744_v14 = vld [vmem:[%s1304_s11 + $0x92] sm:$0xff] }
  0x39   : > { %v1129_v28 = vmax.f32 %v1063_v15, %v1097_v59  ;;  %v965_v34 = vmax.f32 %v899_v22, %v933_v5  ;;  %v968_v36 = vmax.f32 %v902_v24, %v740_v11  ;;  %v707_v29 = vmax.f32 %v611_v16, %v675_v21  ;;  %v741_v5 = vld [vmem:[%s1304_s11 + $0x7a] sm:$0xff] }
  0x3a   : > { %v1099_v37 = vsel %vm1532_vm12, %v739_v32, -inf  ;;  %v1132_v26 = vmax.f32 %v1066_v25, %v740_v11  ;;  %v769_v38 = vsel %vm1570_vm14, %v737_v17, -inf  ;;  %v870_v43 = vmax.f32 %v804_v35, %v838_v12 }
  0x3b   : > { %1162 = vst.msk [vmem:[%s1434_s15 + $0x38] sm:$0xff] %vm1154_vm5, %v1129_v28  ;;  %v1031_v41 = vmax.f32 %v965_v34, %v611_v16  ;;  %v801_v44 = vmax.f32 %v705_v39, %v769_v38  ;;  %v266_v46 = vand.u32 15, %v134_v20  ;;  %v935_v47 = vsel %vm1570_vm14, %v739_v32, -inf  ;;  %v1600_v39 = vld [vmem:[%s1304_s11 + $0x78] sm:$0xff]  ;;  %v679_v28 = vld [vmem:[%s1304_s11 + $0x89] sm:$0xff] }
  0x3c   : > { %1165 = vst.msk [vmem:[%s1434_s15 + $0x50] sm:$0xff] %vm1154_vm5, %v1132_v26  ;;  %v1034_v49 = vmax.f32 %v968_v36, %v1002_v27  ;;  %v131_v50 = vadd.s32 104, %v1290_v1  ;;  %v136_v33 = vadd.s32 144, %v1290_v1  ;;  %v904_v31 = vmax.f32 %v870_v43, %v678_v48  ;;  %v615_v27 = vld [vmem:[%s1304_s11 + $0x88] sm:$0xff] }
  0x3d   : > { %v1065_v51 = vmax.f32 %v1031_v41, %v675_v21  ;;  %v867_v52 = vmax.f32 %v801_v44, %v611_v16  ;;  %vm1594_vm15 = vcmp.ne.s32.totalorder %v266_v46, 0  ;;  %v1004_v3 = vsel %vm1556_vm13, %v616_v30, -inf  ;;  %v618_v16 = vld [vmem:[%s1304_s11 + $0xa0] sm:$0xff]  ;;  %v743_v41 = vld [vmem:[%s1304_s11 + $0x8a] sm:$0xff] }
  0x3e   : > { %v646_v17 = vsel %vm1594_vm15, %v614_v42, -inf  ;;  %v840_v55 = vsel %vm1594_vm15, %v616_v30, -inf  ;;  %v1068_v56 = vmax.f32 %v1034_v49, %v678_v48  ;;  %v245_v57 = vand.u32 15, %v131_v50 }
  0x3f   : > { %v1131_v59 = vmax.f32 %v1065_v51, %v1099_v37  ;;  %v901_v60 = vmax.f32 %v867_v52, %v675_v21  ;;  %v710_v61 = vmax.f32 %v646_v17, %v678_v48  ;;  %v970_v62 = vmax.f32 %v904_v31, %v742_v19  ;;  %v681_v17 = vld [vmem:[%s1304_s11 + $0x99] sm:$0xff] }
  0x40   : > { %v1134_v63 = vmax.f32 %v1068_v56, %v742_v19  ;;  %vm1610_vm0 = vcmp.ne.s32.totalorder %v245_v57, 15  ;;  %v280_v2 = vand.u32 15, %v136_v33  ;;  %v709_v4 = vmax.f32 %v1600_v39, %v1603_v54 }
  0x41   : > { %1164 = vst.msk [vmem:[%s1434_s15 + $0x48] sm:$0xff] %vm1154_vm5, %v1131_v59  ;;  %v967_v40 = vmax.f32 %v901_v60, %v935_v47  ;;  %v806_v45 = vmax.f32 %v710_v61, %v742_v19  ;;  %v771_v58 = vsel %vm1610_vm0, %v739_v32, -inf  ;;  %v1101_v7 = vsel %vm1570_vm14, %v741_v5, -inf  ;;  %v682_v47 = vld [vmem:[%s1304_s11 + $0xa1] sm:$0xff]  ;;  %v620_v19 = vld [vmem:[%s1304_s11 + $0xb0] sm:$0xff] }
  0x42   : > { %1167 = vst.msk [vmem:[%s1434_s15 + $0x60] sm:$0xff] %vm1154_vm5, %v1134_v63  ;;  %v803_v8 = vmax.f32 %v707_v29, %v771_v58  ;;  %vm1628_vm1 = vcmp.ne.s32.totalorder %v280_v2, 0  ;;  %v1036_v42 = vmax.f32 %v970_v62, %v1004_v3  ;;  %v937_v12 = vsel %vm1610_vm0, %v741_v5, -inf }
  0x43   : > { %v1033_v10 = vmax.f32 %v967_v40, %v1600_v39  ;;  %v872_v11 = vmax.f32 %v806_v45, %v840_v55  ;;  %v648_v13 = vsel %vm1628_vm1, %v616_v30, -inf  ;;  %v133_v23 = vadd.s32 120, %v1290_v1  ;;  %v745_v45 = vld [vmem:[%s1304_s11 + $0x9a] sm:$0xff] }
  0x44   : > { %v869_v15 = vmax.f32 %v803_v8, %v1600_v39  ;;  %v712_v21 = vmax.f32 %v648_v13, %v680_v6  ;;  %v1070_v22 = vmax.f32 %v1036_v42, %v680_v6  ;;  %v842_v25 = vsel %vm1628_vm1, %v618_v16, -inf  ;;  %v746_v39 = vld [vmem:[%s1304_s11 + $0xa2] sm:$0xff] }
  0x45   : > { %v1067_v24 = vmax.f32 %v1033_v10, %v1603_v54  ;;  %v906_v18 = vmax.f32 %v872_v11, %v680_v6  ;;  %v138_v20 = vadd.s32 160, %v1290_v1  ;;  %v259_v36 = vand.u32 15, %v133_v23  ;;  %v1686_v6 = vld [vmem:[%s1304_s11 + $0xa8] sm:$0xff] }
  0x46   : > { %v903_v32 = vmax.f32 %v869_v15, %v1603_v54  ;;  %v808_v34 = vmax.f32 %v712_v21, %v744_v14  ;;  %v1136_v35 = vmax.f32 %v1070_v22, %v744_v14  ;;  %v1006_v38 = vsel %vm1594_vm15, %v618_v16, -inf  ;;  %v617_v54 = vld [vmem:[%s1304_s11 + $0x98] sm:$0xff] }
  0x47   : > { %v1133_v29 = vmax.f32 %v1067_v24, %v1101_v7  ;;  %v972_v37 = vmax.f32 %v906_v18, %v744_v14  ;;  %v294_v26 = vand.u32 15, %v138_v20  ;;  %vm1653_vm2 = vcmp.ne.s32.totalorder %v259_v36, 15  ;;  %v1689_v7 = vld [vmem:[%s1304_s11 + $0xa9] sm:$0xff]  ;;  %v684_v15 = vld [vmem:[%s1304_s11 + $0xb1] sm:$0xff] }
  0x48   : > { %v969_v43 = vmax.f32 %v903_v32, %v937_v12  ;;  %v874_v44 = vmax.f32 %v808_v34, %v842_v25  ;;  %1169 = vst.msk [vmem:[%s1434_s15 + $0x70] sm:$0xff] %vm1154_vm5, %v1136_v35  ;;  %v135_v48 = vadd.s32 136, %v1290_v1  ;;  %v711_v49 = vmax.f32 %v615_v27, %v679_v28 }
  0x49   : > { %1166 = vst.msk [vmem:[%s1434_s15 + $0x58] sm:$0xff] %vm1154_vm5, %v1133_v29  ;;  %v1103_v50 = vsel %vm1610_vm0, %v743_v41, -inf  ;;  %v773_v33 = vsel %vm1653_vm2, %v741_v5, -inf  ;;  %vm1665_vm3 = vcmp.ne.s32.totalorder %v294_v26, 0  ;;  %v939_v30 = vsel %vm1653_vm2, %v743_v41, -inf  ;;  %v622_v26 = vld [vmem:[%s1304_s11 + $0xc0] sm:$0xff] }
  0x4a   : > { %v1035_v52 = vmax.f32 %v969_v43, %v615_v27  ;;  %v805_v53 = vmax.f32 %v709_v4, %v773_v33  ;;  %v650_v31 = vsel %vm1665_vm3, %v618_v16, -inf  ;;  %v908_v56 = vmax.f32 %v874_v44, %v682_v47 }
  0x4b   : > { %v714_v55 = vmax.f32 %v650_v31, %v682_v47  ;;  %v1038_v57 = vmax.f32 %v972_v37, %v1006_v38  ;;  %v273_v59 = vand.u32 15, %v135_v48  ;;  %v844_v62 = vsel %vm1665_vm3, %v620_v19, -inf  ;;  %v747_v37 = vld [vmem:[%s1304_s11 + $0xaa] sm:$0xff]  ;;  %v1726_v48 = vld [vmem:[%s1304_s11 + $0xb8] sm:$0xff] }
  0x4c   : > { %v1069_v60 = vmax.f32 %v1035_v52, %v679_v28  ;;  %v871_v61 = vmax.f32 %v805_v53, %v615_v27  ;;  %v140_v63 = vadd.s32 176, %v1290_v1  ;;  %v974_v2 = vmax.f32 %v908_v56, %v746_v39 }
  0x4d   : > { %v810_v0 = vmax.f32 %v714_v55, %v746_v39  ;;  %v1072_v3 = vmax.f32 %v1038_v57, %v682_v47  ;;  %vm1680_vm4 = vcmp.ne.s32.totalorder %v273_v59, 15  ;;  %v713_v40 = vmax.f32 %v617_v54, %v681_v17  ;;  %v686_v57 = vld [vmem:[%s1304_s11 + $0xc1] sm:$0xff] }
  0x4e   : > { %v1135_v5 = vmax.f32 %v1069_v60, %v1103_v50  ;;  %v905_v58 = vmax.f32 %v871_v61, %v679_v28  ;;  %v775_v8 = vsel %vm1680_vm4, %v743_v41, -inf  ;;  %v1105_v42 = vsel %vm1653_vm2, %v745_v45, -inf }
  0x4f   : > { %v876_v10 = vmax.f32 %v810_v0, %v844_v62  ;;  %v1138_v11 = vmax.f32 %v1072_v3, %v746_v39  ;;  %v807_v12 = vmax.f32 %v711_v49, %v775_v8  ;;  %v308_v14 = vand.u32 15, %v140_v63  ;;  %v1729_v49 = vld [vmem:[%s1304_s11 + $0xb9] sm:$0xff] }
  0x50   : > { %1168 = vst.msk [vmem:[%s1434_s15 + $0x68] sm:$0xff] %vm1154_vm5, %v1135_v5  ;;  %v971_v13 = vmax.f32 %v905_v58, %v939_v30  ;;  %v1008_v16 = vsel %vm1628_vm1, %v620_v19, -inf  ;;  %v137_v21 = vadd.s32 152, %v1290_v1  ;;  %v715_v22 = vmax.f32 %v1686_v6, %v1689_v7 }
  0x51   : > { %1171 = vst.msk [vmem:[%s1434_s15 + $0x80] sm:$0xff] %vm1154_vm5, %v1138_v11  ;;  %v873_v23 = vmax.f32 %v807_v12, %v617_v54  ;;  %v910_v24 = vmax.f32 %v876_v10, %v684_v15  ;;  %v1040_v25 = vmax.f32 %v974_v2, %v1008_v16  ;;  %v941_v20 = vsel %vm1680_vm4, %v745_v45, -inf  ;;  %v750_v2 = vld [vmem:[%s1304_s11 + $0xc2] sm:$0xff] }
  0x52   : > { %v1037_v18 = vmax.f32 %v971_v13, %v617_v54  ;;  %vm1707_vm6 = vcmp.ne.s32.totalorder %v308_v14, 0  ;;  %v287_v28 = vand.u32 15, %v137_v21  ;;  %v142_v36 = vadd.s32 192, %v1290_v1  ;;  %v1766_v13 = vld [vmem:[%s1304_s11 + $0xc8] sm:$0xff] }
  0x53   : > { %v907_v32 = vmax.f32 %v873_v23, %v681_v17  ;;  %v652_v34 = vsel %vm1707_vm6, %v620_v19, -inf  ;;  %v976_v35 = vmax.f32 %v910_v24, %v748_v9  ;;  %v1074_v41 = vmax.f32 %v1040_v25, %v684_v15  ;;  %v1769_v14 = vld [vmem:[%s1304_s11 + $0xc9] sm:$0xff] }
  0x54   : > { %v1071_v29 = vmax.f32 %v1037_v18, %v681_v17  ;;  %v716_v38 = vmax.f32 %v652_v34, %v684_v15  ;;  %vm1717_vm7 = vcmp.ne.s32.totalorder %v287_v28, 15  ;;  %v1107_v46 = vsel %vm1680_vm4, %v747_v37, -inf }
  0x55   : > { %v973_v44 = vmax.f32 %v907_v32, %v941_v20  ;;  %v846_v47 = vsel %vm1707_vm6, %v622_v26, -inf  ;;  %v777_v50 = vsel %vm1717_vm7, %v745_v45, -inf  ;;  %v1140_v53 = vmax.f32 %v1074_v41, %v748_v9 }
  0x56   : > { %v1137_v33 = vmax.f32 %v1071_v29, %v1105_v42  ;;  %v812_v52 = vmax.f32 %v716_v38, %v748_v9  ;;  %v809_v30 = vmax.f32 %v713_v40, %v777_v50  ;;  %v322_v39 = vand.u32 15, %v142_v36  ;;  %v624_v40 = vld [vmem:[%s1304_s11 + $0xd0] sm:$0xff]  ;;  %v749_v42 = vld [vmem:[%s1304_s11 + $0xba] sm:$0xff] }
  0x57   : > { %v1039_v31 = vmax.f32 %v973_v44, %v1686_v6  ;;  %v1010_v54 = vsel %vm1665_vm3, %v622_v26, -inf  ;;  %v139_v17 = vadd.s32 168, %v1290_v1  ;;  %1173 = vst.msk [vmem:[%s1434_s15 + $0x90] sm:$0xff] %vm1154_vm5, %v1140_v53  ;;  %v717_v55 = vmax.f32 %v1726_v48, %v1729_v49  ;;  %v626_v44 = vld [vmem:[%s1304_s11 + $0xe0] sm:$0xff] }
  0x58   : > { %1170 = vst.msk [vmem:[%s1434_s15 + $0x78] sm:$0xff] %vm1154_vm5, %v1137_v33  ;;  %v878_v19 = vmax.f32 %v812_v52, %v846_v47  ;;  %v875_v56 = vmax.f32 %v809_v30, %v1686_v6  ;;  %v1042_v59 = vmax.f32 %v976_v35, %v1010_v54  ;;  %v943_v60 = vsel %vm1717_vm7, %v747_v37, -inf  ;;  %v688_v6 = vld [vmem:[%s1304_s11 + $0xd1] sm:$0xff] }
  0x59   : > { %v1073_v51 = vmax.f32 %v1039_v31, %v1689_v7  ;;  %vm1748_vm8 = vcmp.ne.s32.totalorder %v322_v39, 0  ;;  %v301_v62 = vand.u32 15, %v139_v17  ;;  %v144_v4 = vadd.s32 208, %v1290_v1  ;;  %v751_v33 = vld [vmem:[%s1304_s11 + $0xca] sm:$0xff]  ;;  %v1811_v31 = vld [vmem:[%s1304_s11 + $0xd8] sm:$0xff] }
  0x5a   : > { %v909_v63 = vmax.f32 %v875_v56, %v1689_v7  ;;  %v654_v0 = vsel %vm1748_vm8, %v622_v26, -inf  ;;  %v912_v3 = vmax.f32 %v878_v19, %v686_v57  ;;  %v1076_v58 = vmax.f32 %v1042_v59, %v686_v57  ;;  %v752_v26 = vld [vmem:[%s1304_s11 + $0xd2] sm:$0xff] }
  0x5b   : > { %v1139_v5 = vmax.f32 %v1073_v51, %v1107_v46  ;;  %v718_v45 = vmax.f32 %v654_v0, %v686_v57  ;;  %vm1758_vm9 = vcmp.ne.s32.totalorder %v301_v62, 15  ;;  %v848_v11 = vsel %vm1748_vm8, %v624_v40, -inf  ;;  %v1814_v39 = vld [vmem:[%s1304_s11 + $0xd9] sm:$0xff] }
  0x5c   : > { %v975_v10 = vmax.f32 %v909_v63, %v943_v60  ;;  %v978_v12 = vmax.f32 %v912_v3, %v750_v2  ;;  %v779_v15 = vsel %vm1758_vm9, %v747_v37, -inf  ;;  %v1109_v16 = vsel %vm1717_vm7, %v749_v42, -inf }
  0x5d   : > { %1172 = vst.msk [vmem:[%s1434_s15 + $0x88] sm:$0xff] %vm1154_vm5, %v1139_v5  ;;  %v814_v21 = vmax.f32 %v718_v45, %v750_v2  ;;  %v1142_v23 = vmax.f32 %v1076_v58, %v750_v2  ;;  %v811_v24 = vmax.f32 %v715_v22, %v779_v15  ;;  %v336_v18 = vand.u32 15, %v144_v4  ;;  %v754_v45 = vld [vmem:[%s1304_s11 + $0xe2] sm:$0xff] }
  0x5e   : > { %v1041_v25 = vmax.f32 %v975_v10, %v1726_v48  ;;  %v1012_v20 = vsel %vm1707_vm6, %v624_v40, -inf  ;;  %v141_v9 = vadd.s32 184, %v1290_v1  ;;  %v719_v32 = vmax.f32 %v1766_v13, %v1769_v14  ;;  %v628_v10 = vld [vmem:[%s1304_s11 + $0xf0] sm:$0xff] }
  0x5f   : > { %v880_v28 = vmax.f32 %v814_v21, %v848_v11  ;;  %1175 = vst.msk [vmem:[%s1434_s15 + $0xa0] sm:$0xff] %vm1154_vm5, %v1142_v23  ;;  %v877_v34 = vmax.f32 %v811_v24, %v1726_v48  ;;  %v1044_v7 = vmax.f32 %v978_v12, %v1012_v20  ;;  %v945_v27 = vsel %vm1758_vm9, %v749_v42, -inf  ;;  %v690_v48 = vld [vmem:[%s1304_s11 + $0xe1] sm:$0xff] }
  0x60   : > { %v1075_v22 = vmax.f32 %v1041_v25, %v1729_v49  ;;  %vm1793_vm10 = vcmp.ne.s32.totalorder %v336_v18, 0  ;;  %v315_v36 = vand.u32 15, %v141_v9  ;;  %v146_v41 = vadd.s32 224, %v1290_v1 }
  0x61   : > { %v911_v29 = vmax.f32 %v877_v34, %v1729_v49  ;;  %v656_v37 = vsel %vm1793_vm10, %v624_v40, -inf  ;;  %v914_v38 = vmax.f32 %v880_v28, %v688_v6  ;;  %v1078_v47 = vmax.f32 %v1044_v7, %v688_v6 }
  0x62   : > { %v1141_v43 = vmax.f32 %v1075_v22, %v1109_v16  ;;  %v720_v46 = vmax.f32 %v656_v37, %v688_v6  ;;  %vm1803_vm11 = vcmp.ne.s32.totalorder %v315_v36, 15  ;;  %v850_v53 = vsel %vm1793_vm10, %v626_v44, -inf  ;;  %v753_v16 = vld [vmem:[%s1304_s11 + $0xda] sm:$0xff] }
  0x63   : > { %v977_v52 = vmax.f32 %v911_v29, %v945_v27  ;;  %v980_v30 = vmax.f32 %v914_v38, %v752_v26  ;;  %v781_v54 = vsel %vm1803_vm11, %v749_v42, -inf  ;;  %v1111_v17 = vsel %vm1758_vm9, %v751_v33, -inf  ;;  %v822_v29 = vld [vmem:[%s1304_s11 + $0x100] sm:$0xff] }
  0x64   : > { %1174 = vst.msk [vmem:[%s1434_s15 + $0x98] sm:$0xff] %vm1154_vm5, %v1141_v43  ;;  %v816_v19 = vmax.f32 %v720_v46, %v752_v26  ;;  %v1144_v56 = vmax.f32 %v1078_v47, %v752_v26  ;;  %v813_v57 = vmax.f32 %v717_v55, %v781_v54  ;;  %v350_v51 = vand.u32 15, %v146_v41  ;;  %v627_v41 = vld [vmem:[%s1304_s11 + $0xe8] sm:$0xff]  ;;  %v756_v47 = vld [vmem:[%s1304_s11 + $0xf2] sm:$0xff] }
  0x65   : > { %v1043_v59 = vmax.f32 %v977_v52, %v1766_v13  ;;  %v1014_v60 = vsel %vm1748_vm8, %v626_v44, -inf  ;;  %v143_v62 = vadd.s32 200, %v1290_v1  ;;  %v721_v0 = vmax.f32 %v1811_v31, %v1814_v39  ;;  %v691_v43 = vld [vmem:[%s1304_s11 + $0xe9] sm:$0xff] }
  0x66   : > { %v882_v63 = vmax.f32 %v816_v19, %v850_v53  ;;  %1177 = vst.msk [vmem:[%s1434_s15 + $0xb0] sm:$0xff] %vm1154_vm5, %v1144_v56  ;;  %v879_v2 = vmax.f32 %v813_v57, %v1766_v13  ;;  %v1046_v49 = vmax.f32 %v980_v30, %v1014_v60  ;;  %v947_v61 = vsel %vm1803_vm11, %v751_v33, -inf  ;;  %v1055_v30 = vld [vmem:[%s1304_s11 + $0x119] sm:$0xff] }
  0x67   : > { %v1077_v55 = vmax.f32 %v1043_v59, %v1769_v14  ;;  %vm1838_vm12 = vcmp.ne.s32.totalorder %v350_v51, 0  ;;  %v329_v4 = vand.u32 15, %v143_v62  ;;  %v148_v8 = vadd.s32 240, %v1290_v1  ;;  %v629_v59 = vld [vmem:[%s1304_s11 + $0xf8] sm:$0xff] }
  0x68   : > { %v913_v5 = vmax.f32 %v879_v2, %v1769_v14  ;;  %v658_v40 = vsel %vm1838_vm12, %v626_v44, -inf  ;;  %v916_v58 = vmax.f32 %v882_v63, %v690_v48  ;;  %v1080_v12 = vmax.f32 %v1046_v49, %v690_v48  ;;  %v692_v14 = vld [vmem:[%s1304_s11 + $0xf1] sm:$0xff]  ;;  %v693_v51 = vld [vmem:[%s1304_s11 + $0xf9] sm:$0xff] }
  0x69   : > { %v1143_v42 = vmax.f32 %v1077_v55, %v1111_v17  ;;  %v722_v11 = vmax.f32 %v658_v40, %v690_v48  ;;  %vm1848_vm13 = vcmp.ne.s32.totalorder %v329_v4, 15  ;;  %v852_v23 = vsel %vm1838_vm12, %v628_v10, -inf  ;;  %v755_v17 = vld [vmem:[%s1304_s11 + $0xea] sm:$0xff]  ;;  %v888_v55 = vld [vmem:[%s1304_s11 + $0x101] sm:$0xff] }
  0x6a   : > { %v979_v21 = vmax.f32 %v913_v5, %v947_v61  ;;  %v982_v24 = vmax.f32 %v916_v58, %v754_v45  ;;  %v783_v25 = vsel %vm1848_vm13, %v751_v33, -inf  ;;  %v1113_v18 = vsel %vm1803_vm11, %v753_v16, -inf  ;;  %v988_v5 = vld [vmem:[%s1304_s11 + $0x110] sm:$0xff] }
  0x6b   : > { %1176 = vst.msk [vmem:[%s1434_s15 + $0xa8] sm:$0xff] %vm1154_vm5, %v1143_v42  ;;  %v818_v20 = vmax.f32 %v722_v11, %v754_v45  ;;  %v1146_v9 = vmax.f32 %v1080_v12, %v754_v45  ;;  %v815_v28 = vmax.f32 %v719_v32, %v783_v25  ;;  %v364_v6 = vand.u32 15, %v148_v8 }
  0x6c   : > { %v1045_v34 = vmax.f32 %v979_v21, %v1811_v31  ;;  %v1016_v7 = vsel %vm1793_vm10, %v628_v10, -inf  ;;  %v145_v22 = vadd.s32 216, %v1290_v1  ;;  %v949_v13 = vsel %vm1848_vm13, %v753_v16, -inf }
  0x6d   : > { %v884_v27 = vmax.f32 %v818_v20, %v852_v23  ;;  %1179 = vst.msk [vmem:[%s1434_s15 + $0xc0] sm:$0xff] %vm1154_vm5, %v1146_v9  ;;  %v881_v36 = vmax.f32 %v815_v28, %v1811_v31  ;;  %v1048_v32 = vmax.f32 %v982_v24, %v1016_v7  ;;  %vm1876_vm14 = vcmp.ne.s32.totalorder %v364_v6, 0  ;;  %v922_v31 = vld [vmem:[%s1304_s11 + $0x102] sm:$0xff]  ;;  %v923_v7 = vld [vmem:[%s1304_s11 + $0x10a] sm:$0xff] }
  0x6e   : > { %v1079_v37 = vmax.f32 %v1045_v34, %v1814_v39  ;;  %v343_v26 = vand.u32 15, %v145_v22  ;;  %v1018_v38 = vsel %vm1838_vm12, %v822_v29, -inf  ;;  %v660_v46 = vsel %vm1876_vm14, %v628_v10, -inf  ;;  %v757_v10 = vld [vmem:[%s1304_s11 + $0xfa] sm:$0xff]  ;;  %v823_v28 = vld [vmem:[%s1304_s11 + $0x108] sm:$0xff]  ;;  %v1054_v22 = vld [vmem:[%s1304_s11 + $0x111] sm:$0xff] }
  0x6f   : > { %v915_v44 = vmax.f32 %v881_v36, %v1814_v39  ;;  %v918_v50 = vmax.f32 %v884_v27, %v692_v14  ;;  %v1082_v33 = vmax.f32 %v1048_v32, %v692_v14  ;;  %v724_v53 = vmax.f32 %v660_v46, %v692_v14  ;;  %v889_v36 = vld [vmem:[%s1304_s11 + $0x109] sm:$0xff] }
  0x70   : > { %v1145_v52 = vmax.f32 %v1079_v37, %v1113_v18  ;;  %vm1888_vm15 = vcmp.ne.s32.totalorder %v343_v26, 15  ;;  %v854_v54 = vsel %vm1876_vm14, %v822_v29, -inf  ;;  %v723_v62 = vmax.f32 %v627_v41, %v691_v43  ;;  %v1088_v37 = vld [vmem:[%s1304_s11 + $0x112] sm:$0xff] }
  0x71   : > { %v981_v19 = vmax.f32 %v915_v44, %v949_v13  ;;  %v984_v56 = vmax.f32 %v918_v50, %v756_v47  ;;  %v1148_v57 = vmax.f32 %v1082_v33, %v756_v47  ;;  %v785_v60 = vsel %vm1888_vm15, %v753_v16, -inf  ;;  %v989_v50 = vld [vmem:[%s1304_s11 + $0x118] sm:$0xff] }
  0x72   : > { %1178 = vst.msk [vmem:[%s1434_s15 + $0xb8] sm:$0xff] %vm1154_vm5, %v1145_v52  ;;  %v1115_v63 = vsel %vm1848_vm13, %v755_v17, -inf  ;;  %v820_v2 = vmax.f32 %v724_v53, %v756_v47  ;;  %v817_v48 = vmax.f32 %v721_v0, %v785_v60  ;;  %v147_v3 = vadd.s32 232, %v1290_v1  ;;  %v1089_v53 = vld [vmem:[%s1304_s11 + $0x11a] sm:$0xff] }
  0x73   : > { %v1047_v49 = vmax.f32 %v981_v19, %v627_v41  ;;  %1181 = vst.msk [vmem:[%s1434_s15 + $0xd0] sm:$0xff] %vm1154_vm5, %v1148_v57  ;;  %v1050_v61 = vmax.f32 %v984_v56, %v1018_v38  ;;  %v149_v4 = vadd.s32 248, %v1290_v1  ;;  %v725_v40 = vmax.f32 %v629_v59, %v693_v51 }
  0x74   : > { %v883_v45 = vmax.f32 %v817_v48, %v627_v41  ;;  %v951_v58 = vsel %vm1888_vm15, %v755_v17, -inf  ;;  %v886_v8 = vmax.f32 %v820_v2, %v854_v54  ;;  %v357_v0 = vand.u32 15, %v147_v3 }
  0x75   : > { %v1081_v42 = vmax.f32 %v1047_v49, %v691_v43  ;;  %v1084_v39 = vmax.f32 %v1050_v61, %v888_v55  ;;  %v371_v11 = vand.u32 15, %v149_v4  ;;  %v1020_v1 = vsel %vm1876_vm14, %v988_v5, -inf }
  0x76   : > { %v917_v12 = vmax.f32 %v883_v45, %v691_v43  ;;  %v920_v15 = vmax.f32 %v886_v8, %v888_v55  ;;  %vm1918_vm0 = vcmp.ne.s32.totalorder %v357_v0, 15  ;;  %v1117_v14 = vsel %vm1888_vm15, %v757_v10, -inf }
  0x77   : > { %v1147_v16 = vmax.f32 %v1081_v42, %v1115_v63  ;;  %v1150_v21 = vmax.f32 %v1084_v39, %v922_v31  ;;  %vm1922_vm1 = vcmp.ne.s32.totalorder %v371_v11, 15  ;;  %v787_v20 = vsel %vm1918_vm0, %v755_v17, -inf }
  0x78   : > { %v983_v25 = vmax.f32 %v917_v12, %v951_v58  ;;  %v986_v18 = vmax.f32 %v920_v15, %v922_v31  ;;  %v789_v9 = vsel %vm1922_vm1, %v757_v10, -inf  ;;  %v819_v34 = vmax.f32 %v723_v62, %v787_v20 }
  0x79   : > { %1180 = vst.msk [vmem:[%s1434_s15 + $0xc8] sm:$0xff] %vm1154_vm5, %v1147_v16  ;;  %1183 = vst.msk [vmem:[%s1434_s15 + $0xe0] sm:$0xff] %vm1154_vm5, %v1150_v21  ;;  %v821_v6 = vmax.f32 %v725_v40, %v789_v9  ;;  %v953_v26 = vsel %vm1918_vm0, %v757_v10, -inf  ;;  %v955_v38 = vsel %vm1922_vm1, %v923_v7, -inf  ;;  %v1119_v19 = vsel %vm1918_vm0, %v923_v7, -inf }
  0x7a   : > { %v1049_v27 = vmax.f32 %v983_v25, %v629_v59  ;;  %v1052_v13 = vmax.f32 %v986_v18, %v1020_v1  ;;  %v885_v32 = vmax.f32 %v819_v34, %v629_v59  ;;  %v1121_v56 = vsel %vm1922_vm1, %v1089_v53, -inf }
  0x7b   : > { %v887_v29 = vmax.f32 %v821_v6, %v823_v28 }
  0x7c   : > { %v1083_v35 = vmax.f32 %v1049_v27, %v693_v51  ;;  %v1086_v41 = vmax.f32 %v1052_v13, %v1054_v22  ;;  %v919_v43 = vmax.f32 %v885_v32, %v693_v51 }
  0x7d   : > { %v921_v44 = vmax.f32 %v887_v29, %v889_v36 }
  0x7e   : > { %v1149_v46 = vmax.f32 %v1083_v35, %v1117_v14  ;;  %v1152_v47 = vmax.f32 %v1086_v41, %v1088_v37  ;;  %v985_v33 = vmax.f32 %v919_v43, %v953_v26 }
  0x7f   : > { %v987_v52 = vmax.f32 %v921_v44, %v955_v38 }
  0x80   : > { %1182 = vst.msk [vmem:[%s1434_s15 + $0xd8] sm:$0xff] %vm1154_vm5, %v1149_v46  ;;  %1185 = vst.msk [vmem:[%s1434_s15 + $0xf0] sm:$0xff] %vm1154_vm5, %v1152_v47  ;;  %v1051_v54 = vmax.f32 %v985_v33, %v823_v28 }
  0x81   : > { %v1053_v17 = vmax.f32 %v987_v52, %v989_v50 }
  0x82   : > { %v1085_v57 = vmax.f32 %v1051_v54, %v889_v36 }
  0x83   : > { %v1087_v59 = vmax.f32 %v1053_v17, %v1055_v30 }
  0x84   : > { %v1151_v51 = vmax.f32 %v1085_v57, %v1119_v19 }
  0x85   : > { %v1153_v60 = vmax.f32 %v1087_v59, %v1121_v56 }
  0x86   : > { %1184 = vst.msk [vmem:[%s1434_s15 + $0xe8] sm:$0xff] %vm1154_vm5, %v1151_v51 }
  0x87   : > { %1186 = vst.msk [vmem:[%s1434_s15 + $0xf8] sm:$0xff] %vm1154_vm5, %v1153_v60 }
  0x88 PF: > { %s11_s6 = sadd.s32 1, %s1268_s6  }
  0x89   : > { %p8_p4 = scmp.ge.s32.totalorder %s11_s6, 4  }
  0x8b   :  { %10 = sbr.rel (!%p8_p4) target bundleno = 1 (0x1), region = 54 }

// kernel: inception_downsample.15
= control target key start
LH: loop header
LB: loop body
LE: loop exit
PB: predicated region body
PF: predicated region fallthrough
CT: control target
= control target key end

     0   :  { %vm75_vm0 = vcmask 1043456   ;;  %vm50_vm1 = vcmask 588800   ;;  %s401_s1 = inlined_call_operand.vmem [shape: f32[72,128], index: 1, kind: input, shape index: {}]   ;;  %s402_s0 = inlined_call_operand.vmem [shape: f32[128,72], index: 0, kind: input, shape index: {}]   ;;  %s403_s2 = inlined_call_operand.vmem [shape: f32[128,128], index: 2, kind: output, shape index: {}]  }
   0x1   :  { %v44_v0 = vld [vmem:[%s401_s1 + $0x40] sm:$0xff]  ;;  %v42_v1 = vld [vmem:[%s401_s1 + $0x30] sm:$0xff]  ;;  %v43_v2 = vld [vmem:[%s401_s1 + $0x38] sm:$0xff] }
   0x2   :  { %v49_v3 = vpack.c.bf16 %v44_v0, %v44_v0  ;;  %v48_v4 = vpack.c.bf16 %v43_v2, %v42_v1  ;;  %v40_v5 = vld [vmem:[%s401_s1 + $0x20] sm:$0xff]  ;;  %v41_v6 = vld [vmem:[%s401_s1 + $0x28] sm:$0xff]  ;;  %v38_v15 = vld [vmem:[%s401_s1 + $0x10] sm:$0xff] }
   0x3   :  { %v12_v8 = vld [vmem:[%s402_s0] sm:$0xff]  ;;  %v13_v9 = vld [vmem:[%s402_s0 + $0x8] sm:$0xff]  ;;  %v47_v13 = vpack.c.bf16 %v41_v6, %v40_v5  ;;  %v39_v16 = vld [vmem:[%s401_s1 + $0x18] sm:$0xff] }
   0x4   :  { %253 = vmatprep.subr.msk.bf16.mxu0 %vm75_vm0, %v49_v3  ;;  %254 = vmatprep.subr.msk.bf16.mxu1 %vm75_vm0, %v49_v3  ;;  %v77_v7 = vsel %vm75_vm0, %v49_v3, 0  ;;  %v20_v10 = vld [vmem:[%s402_s0 + $0x40] sm:$0xff]  ;;  %v28_v11 = vpack.c.bf16 %v13_v9, %v12_v8  ;;  %v21_v12 = vld [vmem:[%s402_s0 + $0x48] sm:$0xff]  ;;  %v46_v17 = vpack.c.bf16 %v39_v16, %v38_v15  ;;  %v14_v21 = vld [vmem:[%s402_s0 + $0x10] sm:$0xff] }
   0x5   :  { %218 = vmatpush3.bf16.msra.mxu0 %v77_v7  ;;  %248 = vmatpush3.bf16.msra.mxu1 %v77_v7  ;;  %v32_v14 = vpack.c.bf16 %v21_v12, %v20_v10  ;;  %v36_v18 = vld [vmem:[%s401_s1] sm:$0xff]  ;;  %v37_v19 = vld [vmem:[%s401_s1 + $0x8] sm:$0xff]  ;;  %v15_v22 = vld [vmem:[%s402_s0 + $0x18] sm:$0xff] }
   0x6   :  { %219 = vmatprep.subr.bf16.mxu0 %v48_v4  ;;  %244 = vmatprep.subr.bf16.mxu1 %v48_v4  ;;  %v45_v20 = vpack.c.bf16 %v37_v19, %v36_v18  ;;  %v22_v23 = vld [vmem:[%s402_s0 + $0x50] sm:$0xff]  ;;  %v23_v24 = vld [vmem:[%s402_s0 + $0x58] sm:$0xff]  ;;  %v16_v25 = vld [vmem:[%s402_s0 + $0x20] sm:$0xff]  ;;  %v29_v29 = vpack.c.bf16 %v15_v22, %v14_v21 }
   0x7   :  { %227 = vmatprep.mubr.msk.bf16.mxu0 %vm50_vm1, %v28_v11  ;;  %235 = vmatprep.mubr.msk.bf16.mxu1 %vm50_vm1, %v32_v14  ;;  %v17_v26 = vld [vmem:[%s402_s0 + $0x28] sm:$0xff]  ;;  %v24_v27 = vld [vmem:[%s402_s0 + $0x60] sm:$0xff]  ;;  %v33_v30 = vpack.c.bf16 %v23_v24, %v22_v23  ;;  %v18_v33 = vld [vmem:[%s402_s0 + $0x30] sm:$0xff] }
   0x8   :  { %v25_v28 = vld [vmem:[%s402_s0 + $0x68] sm:$0xff]  ;;  %v30_v31 = vpack.c.bf16 %v17_v26, %v16_v25  ;;  %v19_v34 = vld [vmem:[%s402_s0 + $0x38] sm:$0xff]  ;;  %v26_v35 = vld [vmem:[%s402_s0 + $0x70] sm:$0xff] }
   0x9   :  { %220 = vmatpush3.bf16.msra.mxu0 %v48_v4  ;;  %249 = vmatpush3.bf16.msra.mxu1 %v48_v4  ;;  %v34_v32 = vpack.c.bf16 %v25_v28, %v24_v27  ;;  %v27_v36 = vld [vmem:[%s402_s0 + $0x78] sm:$0xff]  ;;  %v31_v37 = vpack.c.bf16 %v19_v34, %v18_v33 }
   0xa   :  { %221 = vmatprep.subr.bf16.mxu0 %v47_v13  ;;  %245 = vmatprep.subr.bf16.mxu1 %v47_v13  ;;  %v35_v38 = vpack.c.bf16 %v27_v36, %v26_v35 }
   0xd   :  { %222 = vmatpush3.bf16.msra.mxu0 %v47_v13  ;;  %250 = vmatpush3.bf16.msra.mxu1 %v47_v13 }
   0xe   :  { %223 = vmatprep.subr.bf16.mxu0 %v46_v17  ;;  %246 = vmatprep.subr.bf16.mxu1 %v46_v17 }
  0x11   :  { %224 = vmatpush3.bf16.msra.mxu0 %v46_v17  ;;  %251 = vmatpush3.bf16.msra.mxu1 %v46_v17 }
  0x12   :  { %225 = vmatprep.subr.bf16.mxu0 %v45_v20  ;;  %247 = vmatprep.subr.bf16.mxu1 %v45_v20 }
  0x15   :  { %226 = vmatpush3.bf16.msra.mxu0 %v45_v20  ;;  %252 = vmatpush3.bf16.msra.mxu1 %v45_v20 }
  0x18   :  { %228 = vmatmul.mubr.msk.bf16.vlgmr.msra.gmra.mxu0 %vm50_vm1, %v29_v29  ;;  %236 = vmatmul.mubr.msk.bf16.vlgmr.msra.gmra.mxu1 %vm50_vm1, %v33_v30 }
  0x19   :  { %231 = vmatprep.mubr.msk.bf16.mxu0 %vm50_vm1, %v30_v31  ;;  %239 = vmatprep.mubr.msk.bf16.mxu1 %vm50_vm1, %v34_v32 }
  0x20   :  { %232 = vmatmul.mubr.msk.bf16.gmra.mxu0 %vm50_vm1, %v31_v37  ;;  %240 = vmatmul.mubr.msk.bf16.gmra.mxu1 %vm50_vm1, %v35_v38 }
  0xd8   :  { %v229_v39 = vpop.f32.mrf.mxu0  ;;  %v237_v40 = vpop.f32.mrf.mxu1 }
  0xd9   :  { %178 = vst [vmem:[%s403_s2 + $0x10] sm:$0xff] %v229_v39  ;;  %186 = vst [vmem:[%s403_s2 + $0x50] sm:$0xff] %v237_v40 }
  0xda   :  { %v113_v41 = vpop.f32.mrf.mxu0  ;;  %v145_v42 = vpop.f32.mrf.mxu1 }
  0xdb   :  { %176 = vst [vmem:[%s403_s2] sm:$0xff] %v113_v41  ;;  %184 = vst [vmem:[%s403_s2 + $0x40] sm:$0xff] %v145_v42 }
  0xdc   :  { %v230_v43 = vpop.f32.mrf.mxu0  ;;  %v238_v44 = vpop.f32.mrf.mxu1 }
  0xdd   :  { %179 = vst [vmem:[%s403_s2 + $0x18] sm:$0xff] %v230_v43  ;;  %187 = vst [vmem:[%s403_s2 + $0x58] sm:$0xff] %v238_v44 }
  0xde   :  { %v116_v45 = vpop.f32.mrf.mxu0  ;;  %v148_v46 = vpop.f32.mrf.mxu1 }
  0xdf   :  { %177 = vst [vmem:[%s403_s2 + $0x8] sm:$0xff] %v116_v45  ;;  %185 = vst [vmem:[%s403_s2 + $0x48] sm:$0xff] %v148_v46 }
  0xe0   :  { %v233_v47 = vpop.f32.mrf.mxu0  ;;  %v241_v48 = vpop.f32.mrf.mxu1 }
  0xe1   :  { %182 = vst [vmem:[%s403_s2 + $0x30] sm:$0xff] %v233_v47  ;;  %190 = vst [vmem:[%s403_s2 + $0x70] sm:$0xff] %v241_v48 }
  0xe2   :  { %v129_v49 = vpop.f32.mrf.mxu0  ;;  %v161_v50 = vpop.f32.mrf.mxu1 }
  0xe3   :  { %180 = vst [vmem:[%s403_s2 + $0x20] sm:$0xff] %v129_v49  ;;  %188 = vst [vmem:[%s403_s2 + $0x60] sm:$0xff] %v161_v50 }
  0xe4   :  { %v234_v51 = vpop.f32.mrf.mxu0  ;;  %v242_v52 = vpop.f32.mrf.mxu1 }
  0xe5   :  { %183 = vst [vmem:[%s403_s2 + $0x38] sm:$0xff] %v234_v51  ;;  %191 = vst [vmem:[%s403_s2 + $0x78] sm:$0xff] %v242_v52 }
  0xe6   :  { %v132_v53 = vpop.f32.mrf.mxu0  ;;  %v164_v54 = vpop.f32.mrf.mxu1 }
  0xe7   :  { %181 = vst [vmem:[%s403_s2 + $0x28] sm:$0xff] %v132_v53  ;;  %189 = vst [vmem:[%s403_s2 + $0x68] sm:$0xff] %v164_v54 }

// kernel: inception_downsample.16
= control target key start
LH: loop header
LB: loop body
LE: loop exit
PB: predicated region body
PF: predicated region fallthrough
CT: control target
= control target key end

     0   :  { %s254_s0 = inlined_call_operand.vmem [shape: f32[128,128], index: 0, kind: input, shape index: {}]   ;;  %s255_s1 = inlined_call_operand.vmem [shape: f32[1,128], index: 1, kind: input, shape index: {}]   ;;  %s256_s2 = inlined_call_operand.vmem [shape: f32[1,128], index: 2, kind: input, shape index: {}]   ;;  %s257_s3 = inlined_call_operand.vmem [shape: f32[128,128], index: 3, kind: output, shape index: {}]  }
   0x1   :  { %v14_v0 = vld [vmem:[%s254_s0] sm:$0xff]  ;;  %v15_v4 = vld [vmem:[%s254_s0 + $0x8] sm:$0xff]  ;;  %v16_v5 = vld [vmem:[%s254_s0 + $0x10] sm:$0xff] }
   0x2   :  { %v112_v1 = vld [vmem:[%s255_s1] ss:$0 sm:$0xff]  ;;  %v17_v6 = vld [vmem:[%s254_s0 + $0x18] sm:$0xff]  ;;  %v19_v11 = vld [vmem:[%s254_s0 + $0x28] sm:$0xff] }
   0x3   :  { %v143_v2 = vld [vmem:[%s256_s2] ss:$0 sm:$0xff]  ;;  %v37_v3 = vmul.f32 %v112_v1, %v14_v0  ;;  %v38_v7 = vmul.f32 %v112_v1, %v15_v4  ;;  %v39_v8 = vmul.f32 %v112_v1, %v16_v5  ;;  %v40_v9 = vmul.f32 %v112_v1, %v17_v6  ;;  %v20_v12 = vld [vmem:[%s254_s0 + $0x30] sm:$0xff]  ;;  %v21_v17 = vld [vmem:[%s254_s0 + $0x38] sm:$0xff] }
   0x4   :  { %v18_v10 = vld [vmem:[%s254_s0 + $0x20] sm:$0xff]  ;;  %v42_v15 = vmul.f32 %v112_v1, %v19_v11  ;;  %v43_v16 = vmul.f32 %v112_v1, %v20_v12  ;;  %v44_v21 = vmul.f32 %v112_v1, %v21_v17  ;;  %v23_v27 = vld [vmem:[%s254_s0 + $0x48] sm:$0xff]  ;;  %v24_v28 = vld [vmem:[%s254_s0 + $0x50] sm:$0xff] }
   0x5   :  { %v60_v13 = vadd.f32 %v143_v2, %v37_v3  ;;  %v41_v14 = vmul.f32 %v112_v1, %v18_v10  ;;  %v61_v18 = vadd.f32 %v143_v2, %v38_v7  ;;  %v62_v19 = vadd.f32 %v143_v2, %v39_v8  ;;  %v22_v22 = vld [vmem:[%s254_s0 + $0x40] sm:$0xff]  ;;  %v25_v29 = vld [vmem:[%s254_s0 + $0x58] sm:$0xff]  ;;  %v27_v35 = vld [vmem:[%s254_s0 + $0x68] sm:$0xff] }
   0x6   :  { %v63_v20 = vadd.f32 %v143_v2, %v40_v9  ;;  %v65_v25 = vadd.f32 %v143_v2, %v42_v15  ;;  %v66_v26 = vadd.f32 %v143_v2, %v43_v16  ;;  %v67_v33 = vadd.f32 %v143_v2, %v44_v21  ;;  %v26_v34 = vld [vmem:[%s254_s0 + $0x60] sm:$0xff]  ;;  %v28_v36 = vld [vmem:[%s254_s0 + $0x70] sm:$0xff]  ;;  %v29_v41 = vld [vmem:[%s254_s0 + $0x78] sm:$0xff] }
   0x7   :  { %v76_v23 = vmax.f32 %v60_v13, 0.0  ;;  %v64_v24 = vadd.f32 %v143_v2, %v41_v14  ;;  %v77_v30 = vmax.f32 %v61_v18, 0.0  ;;  %v78_v31 = vmax.f32 %v62_v19, 0.0 }
   0x8   :  { %v79_v32 = vmax.f32 %v63_v20, 0.0  ;;  %v81_v38 = vmax.f32 %v65_v25, 0.0  ;;  %v82_v39 = vmax.f32 %v66_v26, 0.0  ;;  %v45_v40 = vmul.f32 %v112_v1, %v22_v22 }
   0x9   :  { %92 = vst [vmem:[%s257_s3] sm:$0xff] %v76_v23  ;;  %v80_v37 = vmax.f32 %v64_v24, 0.0  ;;  %93 = vst [vmem:[%s257_s3 + $0x8] sm:$0xff] %v77_v30  ;;  %v83_v42 = vmax.f32 %v67_v33, 0.0  ;;  %v46_v43 = vmul.f32 %v112_v1, %v23_v27  ;;  %v47_v44 = vmul.f32 %v112_v1, %v24_v28 }
   0xa   :  { %94 = vst [vmem:[%s257_s3 + $0x10] sm:$0xff] %v78_v31  ;;  %95 = vst [vmem:[%s257_s3 + $0x18] sm:$0xff] %v79_v32  ;;  %v48_v45 = vmul.f32 %v112_v1, %v25_v29  ;;  %v68_v46 = vadd.f32 %v143_v2, %v45_v40  ;;  %v49_v47 = vmul.f32 %v112_v1, %v26_v34 }
   0xb   :  { %96 = vst [vmem:[%s257_s3 + $0x20] sm:$0xff] %v80_v37  ;;  %97 = vst [vmem:[%s257_s3 + $0x28] sm:$0xff] %v81_v38  ;;  %v50_v48 = vmul.f32 %v112_v1, %v27_v35  ;;  %v51_v49 = vmul.f32 %v112_v1, %v28_v36  ;;  %v69_v50 = vadd.f32 %v143_v2, %v46_v43 }
   0xc   :  { %98 = vst [vmem:[%s257_s3 + $0x30] sm:$0xff] %v82_v39  ;;  %99 = vst [vmem:[%s257_s3 + $0x38] sm:$0xff] %v83_v42  ;;  %v70_v51 = vadd.f32 %v143_v2, %v47_v44  ;;  %v71_v52 = vadd.f32 %v143_v2, %v48_v45  ;;  %v52_v53 = vmul.f32 %v112_v1, %v29_v41  ;;  %v84_v54 = vmax.f32 %v68_v46, 0.0 }
   0xd   :  { %v72_v55 = vadd.f32 %v143_v2, %v49_v47  ;;  %v73_v56 = vadd.f32 %v143_v2, %v50_v48  ;;  %v74_v57 = vadd.f32 %v143_v2, %v51_v49  ;;  %v85_v58 = vmax.f32 %v69_v50, 0.0 }
   0xe   :  { %v86_v59 = vmax.f32 %v70_v51, 0.0  ;;  %v87_v60 = vmax.f32 %v71_v52, 0.0  ;;  %v75_v61 = vadd.f32 %v143_v2, %v52_v53  ;;  %100 = vst [vmem:[%s257_s3 + $0x40] sm:$0xff] %v84_v54 }
   0xf   :  { %v88_v62 = vmax.f32 %v72_v55, 0.0  ;;  %v89_v63 = vmax.f32 %v73_v56, 0.0  ;;  %v90_v0 = vmax.f32 %v74_v57, 0.0  ;;  %101 = vst [vmem:[%s257_s3 + $0x48] sm:$0xff] %v85_v58 }
  0x10   :  { %102 = vst [vmem:[%s257_s3 + $0x50] sm:$0xff] %v86_v59  ;;  %103 = vst [vmem:[%s257_s3 + $0x58] sm:$0xff] %v87_v60  ;;  %v91_v1 = vmax.f32 %v75_v61, 0.0 }
  0x11   :  { %104 = vst [vmem:[%s257_s3 + $0x60] sm:$0xff] %v88_v62  ;;  %105 = vst [vmem:[%s257_s3 + $0x68] sm:$0xff] %v89_v63 }
  0x12   :  { %106 = vst [vmem:[%s257_s3 + $0x70] sm:$0xff] %v90_v0  ;;  %107 = vst [vmem:[%s257_s3 + $0x78] sm:$0xff] %v91_v1 }

// kernel: inception_downsample.13
= control target key start
LH: loop header
LB: loop body
LE: loop exit
PB: predicated region body
PF: predicated region fallthrough
CT: control target
= control target key end

     0   :  { %s4469_s9 = smov 0   ;;  %s4471_s10 = smov 0   ;;  %s6476_s0 = inlined_call_operand.vmem [shape: f32[2,290,8], index: 0, kind: input, shape index: {}]   ;;  %s6477_s1 = inlined_call_operand.vmem [shape: f32[9,8,128], index: 1, kind: input, shape index: {}]   ;;  %s6478_s2 = inlined_call_operand.vmem [shape: f32[2,256,128], index: 2, kind: output, shape index: {}]  }
   0x1   :  { %s4473_s11 = smov 0  }
   0x2 LB: > { %s24_s12 = sadd.s32 1, %s4446_s10  ;;  %p3739_p0 = scmp.ge.s32.totalorder %s4450_s11, 1  ;;  %s4450_s11 = sphi %s4473_s11, %s12_s11   ;;  %s4446_s10 = sphi %s4471_s10, %s7029_s10   ;;  %s4442_s9 = sphi %s4469_s9, %s7028_s9  }
   0x3   : > { %p26_p1 = scmp.ge.s32.totalorder %s24_s12, 2  ;;  %p135_p2 = scmp.lt.s32.totalorder %s4450_s11, 3 }
   0x5   : > { %s7031_s12 = smov (%p26_p1, %s24_s12), 0  ;;  %p136_p3 = pnand %p3739_p0, %p135_p2 }
   0x7   : > { %139 = sbr.rel (%p136_p3) target bundleno = 508 (0x1fc), region = 28 }
   0xc   : > { %v3759_v0 = vld [vmem:[%s6477_s1 + $0x8] sm:$0xff]  ;;  %vm6479_vm0 = vcmask 1043456   ;;  %p164_p4 = scmp.lt.s32.totalorder %s4442_s9, 1  ;;  %v857_v1 = vld [vmem:[%s6477_s1] sm:$0xff]  ;;  %v3808_v2 = vld [vmem:[%s6477_s1 + $0x10] sm:$0xff]  ;;  %v184_v6 = vlaneseq  ;;  %vm6480_vm1 = vcmask 64512  }
   0xd   : > { %v909_v3 = vpack.c.bf16 %v3759_v0, %v3759_v0  ;;  %v858_v4 = vpack.c.bf16 %v857_v1, %v857_v1  ;;  %v1530_v5 = vpack.c.bf16 %v3808_v2, %v3808_v2  ;;  %v3825_v9 = vld [vmem:[%s6477_s1 + $0x18] sm:$0xff]  ;;  %v3842_v10 = vld [vmem:[%s6477_s1 + $0x20] sm:$0xff]  ;;  %vm4452_vm4 = vmmov 1  }
   0xe   : > { %s7033_s9 = smov (!%p164_p4, %s4442_s9), 1  ;;  %v4504_v8 = vshrl.u32 %v184_v6, 7  ;;  %v4535_v30 = vpack.c.bf16 %v3825_v9, %v3825_v9  ;;  %v4542_v33 = vpack.c.bf16 %v3842_v10, %v3842_v10  ;;  %vm4577_vm5 = vmpackc.low %vm4452_vm4, %vm4452_vm4 }
   0xf   : > { %4392 = vmatprep.subr.msk.bf16.mxu1 %vm6479_vm0, %v909_v3  ;;  %4391 = vmatprep.subr.msk.bf16.mxu0 %vm6479_vm0, %v909_v3  ;;  %v961_v7 = vsel %vm6479_vm0, %v909_v3, 0  ;;  %s4401_s19 = smul.u32 296, %s7033_s9  ;;  %v1580_v22 = vsel %vm6479_vm0, %v1530_v5, 0  ;;  %v1173_v26 = vsel %vm6479_vm0, %v858_v4, 0  ;;  %s3929_s7 = sshll.u32 %s7033_s9, 8 }
  0x10   : > { %4390 = vmatpush3.bf16.msra.mxu1 %v961_v7  ;;  %4084 = vmatpush3.bf16.msra.mxu0 %v961_v7  ;;  %v186_v24 = vadd.s32 8, %v4504_v8  ;;  %v187_v41 = vadd.s32 16, %v4504_v8  ;;  %v188_v42 = vadd.s32 24, %v4504_v8  ;;  %v221_v45 = vand.u32 15, %v4504_v8  ;;  %s6347_s14 = scalar_lea.vmem %s6478_s2, %s3929_s7 }
  0x11   : > { %4393 = vmatprep.subr.msk.bf16.mxu1 %vm6479_vm0, %v858_v4  ;;  %4394 = vmatprep.subr.msk.bf16.mxu0 %vm6479_vm0, %v1530_v5  ;;  %s4509_s22 = scalar_lea.vmem %s6476_s0, %s4401_s19  ;;  %v189_v46 = vadd.s32 32, %v4504_v8  ;;  %v190_v50 = vadd.s32 40, %v4504_v8  ;;  %v191_v58 = vadd.s32 48, %v4504_v8  ;;  %v192_v59 = vadd.s32 56, %v4504_v8 }
  0x12   : > { %v859_v11 = vld [vmem:[%s4509_s22 + $0x1] sm:$0xff]  ;;  %v860_v12 = vld [vmem:[%s4509_s22 + $0x9] sm:$0xff]  ;;  %v861_v16 = vld [vmem:[%s4509_s22 + $0x11] sm:$0xff]  ;;  %v228_v40 = vand.u32 15, %v186_v24  ;;  %v235_v53 = vand.u32 15, %v187_v41  ;;  %v242_v54 = vand.u32 15, %v188_v42 }
  0x13   : > { %v875_v13 = vld [vmem:[%s4509_s22 + $0x81] sm:$0xff]  ;;  %v891_v14 = vpack.c.bf16 %v860_v12, %v859_v11  ;;  %v876_v15 = vld [vmem:[%s4509_s22 + $0x89] sm:$0xff]  ;;  %v862_v17 = vld [vmem:[%s4509_s22 + $0x19] sm:$0xff]  ;;  %vm4573_vm3 = vcmp.ne.s32.totalorder %v221_v45, 0  ;;  %v249_v57 = vand.u32 15, %v189_v46  ;;  %v193_v62 = vadd.s32 64, %v4504_v8 }
  0x14   : > { %v899_v18 = vpack.c.bf16 %v876_v15, %v875_v13  ;;  %v4523_v19 = vpack.c.bf16 %v862_v17, %v861_v16  ;;  %v877_v20 = vld [vmem:[%s4509_s22 + $0x91] sm:$0xff]  ;;  %v878_v21 = vld [vmem:[%s4509_s22 + $0x99] sm:$0xff]  ;;  %v863_v23 = vld [vmem:[%s4509_s22 + $0x21] sm:$0xff]  ;;  %vm4569_vm2 = vcmp.ne.s32.totalorder %v228_v40, 15  ;;  %v194_v63 = vadd.s32 72, %v4504_v8 }
  0x15   : > { %4085 = vmatprep.mubr.msk.bf16.mxu0 %vm6480_vm1, %v891_v14  ;;  %v900_v25 = vpack.c.bf16 %v878_v21, %v877_v20  ;;  %v864_v27 = vld [vmem:[%s4509_s22 + $0x29] sm:$0xff]  ;;  %v879_v28 = vld [vmem:[%s4509_s22 + $0xa1] sm:$0xff]  ;;  %v865_v34 = vld [vmem:[%s4509_s22 + $0x31] sm:$0xff]  ;;  %v6493_v4 = vmov 0   ;;  %vm4608_vm8 = vcmp.ne.s32.totalorder %v235_v53, 0  ;;  %vm4612_vm9 = vcmp.ne.s32.totalorder %v242_v54, 15 }
  0x16   : > { %v880_v29 = vld [vmem:[%s4509_s22 + $0xa9] sm:$0xff]  ;;  %4101 = vmatprep.mubr.msk.bf16.mxu1 %vm6480_vm1, %v899_v18  ;;  %4086 = vmatmul.mubr.msk.bf16.vlgmr.msra.gmra.mxu0 %vm6480_vm1, %v4523_v19  ;;  %v4540_v31 = vpack.c.bf16 %v864_v27, %v863_v23  ;;  %v866_v35 = vld [vmem:[%s4509_s22 + $0x39] sm:$0xff]  ;;  %v881_v36 = vld [vmem:[%s4509_s22 + $0xb1] sm:$0xff]  ;;  %v4606_v5 = vsel %vm4577_vm5, 65537, %v6493_v4  ;;  %v256_v9 = vand.u32 15, %v190_v50  ;;  %vm4618_vm10 = vcmp.ne.s32.totalorder %v249_v57, 0 }
  0x17   : > { %v901_v32 = vpack.c.bf16 %v880_v29, %v879_v28  ;;  %4102 = vmatmul.mubr.msk.bf16.vlgmr.msra.gmra.mxu1 %vm6480_vm1, %v900_v25  ;;  %4152 = vmatpush3.bf16.msra.mxu0 %v1580_v22  ;;  %v882_v37 = vld [vmem:[%s4509_s22 + $0xb9] sm:$0xff]  ;;  %v867_v38 = vld [vmem:[%s4509_s22 + $0x41] sm:$0xff]  ;;  %v868_v39 = vld [vmem:[%s4509_s22 + $0x49] sm:$0xff]  ;;  %v4562_v47 = vpack.c.bf16 %v866_v35, %v865_v34  ;;  %v263_v13 = vand.u32 15, %v191_v58  ;;  %v270_v14 = vand.u32 15, %v192_v59 }
  0x18   : > { %4118 = vmatpush3.bf16.msra.mxu1 %v1173_v26  ;;  %4089 = vmatprep.mubr.msk.bf16.mxu0 %vm6480_vm1, %v4540_v31  ;;  %v883_v43 = vld [vmem:[%s4509_s22 + $0xc1] sm:$0xff]  ;;  %v884_v44 = vld [vmem:[%s4509_s22 + $0xc9] sm:$0xff]  ;;  %v902_v48 = vpack.c.bf16 %v882_v37, %v881_v36  ;;  %v4566_v49 = vpack.c.bf16 %v868_v39, %v867_v38  ;;  %v869_v60 = vld [vmem:[%s4509_s22 + $0x51] sm:$0xff]  ;;  %v4623_v15 = vadd.s32 80, %v4504_v8  ;;  %v277_v18 = vand.u32 15, %v193_v62 }
  0x19   : > { %4105 = vmatprep.mubr.msk.bf16.mxu1 %vm6480_vm1, %v901_v32  ;;  %4395 = vmatprep.subr.msk.bf16.mxu1 %vm6479_vm0, %v4535_v30  ;;  %v903_v51 = vpack.c.bf16 %v884_v44, %v883_v43  ;;  %v870_v61 = vld [vmem:[%s4509_s22 + $0x59] sm:$0xff]  ;;  %v885_v0 = vld [vmem:[%s4509_s22 + $0xd1] sm:$0xff]  ;;  %vm1385_vm6 = vmpackc.low %vm4569_vm2, %vm4569_vm2  ;;  %v284_v20 = vand.u32 15, %v194_v63  ;;  %v196_v25 = vadd.s32 88, %v4504_v8  ;;  %v4652_v29 = vsel %vm6479_vm0, %v4535_v30, 0 }
  0x1a   : > { %4396 = vmatprep.subr.msk.bf16.mxu0 %vm6479_vm0, %v4542_v33  ;;  %v886_v1 = vld [vmem:[%s4509_s22 + $0xd9] sm:$0xff]  ;;  %v871_v2 = vld [vmem:[%s4509_s22 + $0x61] sm:$0xff]  ;;  %v872_v3 = vld [vmem:[%s4509_s22 + $0x69] sm:$0xff]  ;;  %v4625_v16 = vpack.c.bf16 %v870_v61, %v869_v60  ;;  %v1417_v17 = vsel %vm1385_vm6, 65537, %v6493_v4  ;;  %vm4654_vm12 = vcmp.ne.s32.totalorder %v256_v9, 15  ;;  %v4666_v37 = vsel %vm6479_vm0, %v4542_v33, 0 }
  0x1b   : > { %vm713_vm7 = vmpackc.low %vm4573_vm3, %vm4573_vm3  ;;  %v887_v10 = vld [vmem:[%s4509_s22 + $0xe1] sm:$0xff]  ;;  %v888_v11 = vld [vmem:[%s4509_s22 + $0xe9] sm:$0xff]  ;;  %v904_v22 = vpack.c.bf16 %v886_v1, %v885_v0  ;;  %v4636_v23 = vpack.c.bf16 %v872_v3, %v871_v2  ;;  %v3792_v36 = vcombine.low %v4606_v5, %v1417_v17  ;;  %vm4668_vm14 = vcmp.ne.s32.totalorder %v263_v13, 0 }
  0x1c   : > { %v3859_v21 = vld [vmem:[%s6477_s1 + $0x28] sm:$0xff]  ;;  %v745_v24 = vsel %vm713_vm7, 65537, %v6493_v4  ;;  %v905_v26 = vpack.c.bf16 %v888_v11, %v887_v10  ;;  %v873_v27 = vld [vmem:[%s4509_s22 + $0x71] sm:$0xff]  ;;  %v874_v28 = vld [vmem:[%s4509_s22 + $0x79] sm:$0xff]  ;;  %vm4682_vm2 = vcmp.ne.s32.totalorder %v270_v14, 15  ;;  %v291_v42 = vand.u32 15, %v4623_v15 }
  0x1d   : > { %vm715_vm11 = vmpackc.low %vm4608_vm8, %vm4608_vm8  ;;  %v1336_v34 = vld [vmem:[%s4509_s22 + $0x2] sm:$0xff]  ;;  %v1337_v35 = vld [vmem:[%s4509_s22 + $0xa] sm:$0xff]  ;;  %v4672_v30 = vpack.c.bf16 %v3859_v21, %v3859_v21  ;;  %v3743_v41 = vcombine.low %v745_v24, %v4606_v5  ;;  %v197_v43 = vadd.s32 96, %v4504_v8  ;;  %vm4694_vm4 = vcmp.ne.s32.totalorder %v277_v18, 0 }
  0x1e   : > { %4090 = vmatmul.mubr.msk.bf16.gmra.mxu0 %vm6480_vm1, %v4562_v47  ;;  %vm1387_vm13 = vmpackc.low %vm4612_vm9, %vm4612_vm9  ;;  %v665_v39 = vld [vmem:[%s4509_s22] sm:$0xff]  ;;  %v666_v40 = vld [vmem:[%s4509_s22 + $0x8] sm:$0xff]  ;;  %vm4698_vm5 = vcmp.ne.s32.totalorder %v284_v20, 15  ;;  %v298_v46 = vand.u32 15, %v196_v25  ;;  %v4704_v50 = vpack.c.bf16 %v874_v28, %v873_v27  ;;  %v1368_v53 = vpack.c.bf16 %v1337_v35, %v1336_v34 }
  0x1f   : > { %4106 = vmatmul.mubr.msk.bf16.gmra.mxu1 %vm6480_vm1, %v902_v48  ;;  %4093 = vmatprep.mubr.msk.bf16.mxu0 %vm6480_vm1, %v4566_v49  ;;  %vm717_vm15 = vmpackc.low %vm4618_vm10, %vm4618_vm10  ;;  %v198_v48 = vadd.s32 104, %v4504_v8  ;;  %v890_v52 = vld [vmem:[%s4509_s22 + $0xf9] sm:$0xff]  ;;  %v747_v54 = vsel %vm715_vm11, 65537, %v6493_v4  ;;  %v1419_v55 = vsel %vm1387_vm13, 65537, %v6493_v4  ;;  %v697_v56 = vpack.c.bf16 %v666_v40, %v665_v39  ;;  %v667_v61 = vld [vmem:[%s4509_s22 + $0x10] sm:$0xff] }
  0x20   : > { %4109 = vmatprep.mubr.msk.bf16.mxu1 %vm6480_vm1, %v903_v51  ;;  %vm1389_vm3 = vmpackc.low %vm4654_vm12, %vm4654_vm12  ;;  %v889_v51 = vld [vmem:[%s4509_s22 + $0xf1] sm:$0xff]  ;;  %vm4720_vm6 = vcmp.ne.s16.totalorder %v3792_v36, 0  ;;  %v6594_v57 = vmov 0  ;;  %v749_v58 = vsel %vm717_vm15, 65537, %v6493_v4  ;;  %v4731_v59 = vadd.s32 112, %v4504_v8  ;;  %v1339_v7 = vld [vmem:[%s4509_s22 + $0x1a] sm:$0xff] }
  0x21   : > { %v6595_v57 = vsel %vm4720_vm6, 4294967295, %v6594_v57  ;;  %vm4733_vm7 = vcmp.ne.s16.totalorder %v3743_v41, 0  ;;  %v1421_v62 = vsel %vm1389_vm3, 65537, %v6493_v4  ;;  %vm719_vm8 = vmpackc.low %vm4668_vm14, %vm4668_vm14  ;;  %v305_v63 = vand.u32 15, %v197_v43  ;;  %v668_v2 = vld [vmem:[%s4509_s22 + $0x18] sm:$0xff]  ;;  %v669_v12 = vld [vmem:[%s4509_s22 + $0x20] sm:$0xff] }
  0x22   : > { %v4748_v0 = vadd.s32 120, %v4504_v8  ;;  %v906_v1 = vpack.c.bf16 %v890_v52, %v889_v51  ;;  %v3744_v3 = vcombine.low %v747_v54, %v4606_v5  ;;  %v1338_v6 = vld [vmem:[%s4509_s22 + $0x12] sm:$0xff]  ;;  %v3793_v9 = vcombine.low %v4606_v5, %v1419_v55  ;;  %v670_v13 = vld [vmem:[%s4509_s22 + $0x28] sm:$0xff]  ;;  %vm1391_vm9 = vmpackc.low %vm4682_vm2, %vm4682_vm2 }
  0x23   : > { %v312_v10 = vand.u32 15, %v198_v48  ;;  %v1512_v11 = vsel %vm4720_vm6, %v1368_v53, 0  ;;  %v3745_v14 = vcombine.low %v749_v58, %v4606_v5  ;;  %vm4763_vm10 = vcmp.ne.s32.totalorder %v291_v42, 0  ;;  %v1340_v20 = vld [vmem:[%s4509_s22 + $0x22] sm:$0xff]  ;;  %v1341_v21 = vld [vmem:[%s4509_s22 + $0x2a] sm:$0xff]  ;;  %vm721_vm12 = vmpackc.low %vm4694_vm4, %vm4694_vm4 }
  0x24   : > { %vm4767_vm11 = vcmp.ne.s32.totalorder %v298_v46, 15  ;;  %v841_v18 = vsel %vm4733_vm7, %v697_v56, 0  ;;  %v751_v24 = vsel %vm719_vm8, 65537, %v6493_v4  ;;  %v319_v25 = vand.u32 15, %v4731_v59  ;;  %v671_v38 = vld [vmem:[%s4509_s22 + $0x30] sm:$0xff]  ;;  %v672_v39 = vld [vmem:[%s4509_s22 + $0x38] sm:$0xff]  ;;  %vm723_vm8 = vmpackc.low %vm4763_vm10, %vm4763_vm10 }
  0x25   : > { %v4790_v27 = vpack.c.bf16 %v1339_v7, %v1338_v6  ;;  %vm4795_vm14 = vcmp.ne.s32.totalorder %v305_v63, 0  ;;  %v326_v32 = vand.u32 15, %v4748_v0  ;;  %vm4802_vm15 = vcmp.ne.s16.totalorder %v3744_v3, 0  ;;  %v1342_v46 = vld [vmem:[%s4509_s22 + $0x32] sm:$0xff]  ;;  %v1343_v48 = vld [vmem:[%s4509_s22 + $0x3a] sm:$0xff]  ;;  %v674_v54 = vld [vmem:[%s4509_s22 + $0x48] sm:$0xff] }
  0x26   : > { %4094 = vmatmul.mubr.msk.bf16.gmra.mxu0 %vm6480_vm1, %v4625_v16  ;;  %vm4806_vm3 = vcmp.ne.s16.totalorder %v3793_v9, 0  ;;  %v6606_v35 = vmov 0  ;;  %v4810_v36 = vpack.c.bf16 %v670_v13, %v669_v12  ;;  %vm4817_vm0 = vcmp.ne.s32.totalorder %v312_v10, 15  ;;  %v673_v53 = vld [vmem:[%s4509_s22 + $0x40] sm:$0xff]  ;;  %vm6616_vm2 = vmpackc.low %vm4698_vm5, %vm4698_vm5  ;;  %v675_v10 = vld [vmem:[%s4509_s22 + $0x50] sm:$0xff] }
  0x27   : > { %4110 = vmatmul.mubr.msk.bf16.gmra.mxu1 %vm6480_vm1, %v904_v22  ;;  %4097 = vmatprep.mubr.msk.bf16.mxu0 %vm6480_vm1, %v4636_v23  ;;  %v3794_v22 = vcombine.low %v4606_v5, %v1421_v62  ;;  %v6607_v35 = vsel %vm4806_vm3, 4294967295, %v6606_v35  ;;  %vm4822_vm13 = vcmp.ne.s16.totalorder %v3745_v14, 0  ;;  %v6611_v41 = vmov 0  ;;  %v1345_v62 = vld [vmem:[%s4509_s22 + $0x4a] sm:$0xff]  ;;  %vm1395_vm4 = vmpackc.low %vm4767_vm11, %vm4767_vm11 }
  0x28   : > { %4113 = vmatprep.mubr.msk.bf16.mxu1 %vm6480_vm1, %v905_v26  ;;  %v4788_v26 = vpack.c.bf16 %v668_v2, %v667_v61  ;;  %6608 = vst [vmem:[#allocation2_spill] sm:$0xff] %v6607_v35  ;;  %v6612_v41 = vsel %vm4822_vm13, 4294967295, %v6611_v41  ;;  %v4826_v42 = vpack.c.bf16 %v1341_v21, %v1340_v20  ;;  %v3746_v43 = vcombine.low %v751_v24, %v4606_v5  ;;  %v1344_v61 = vld [vmem:[%s4509_s22 + $0x42] sm:$0xff]  ;;  %vm725_vm5 = vmpackc.low %vm4795_vm14, %vm4795_vm14 }
  0x29   : > { %v1423_v51 = vsel %vm1391_vm9, 65537, %v6493_v4  ;;  %v6613_v52 = vmov 0  ;;  %v753_v55 = vsel %vm721_vm12, 65537, %v6493_v4  ;;  %v1425_v33 = vsel %vm6616_vm2, 65537, %v6493_v4 }
  0x2a   : > { %v201_v56 = vadd.s32 128, %v4504_v8  ;;  %v842_v58 = vsel %vm4802_vm15, %v4788_v26, 0  ;;  %v1513_v44 = vsel %vm4806_vm3, %v4790_v27, 0  ;;  %v4862_v59 = vpack.c.bf16 %v672_v39, %v671_v38 }
  0x2b   : > { %v755_v45 = vsel %vm723_vm8, 65537, %v6493_v4  ;;  %v843_v63 = vsel %vm4822_vm13, %v4810_v36, 0  ;;  %v4878_v0 = vpack.c.bf16 %v1343_v48, %v1342_v46  ;;  %v202_v2 = vadd.s32 136, %v4504_v8 }
  0x2c   : > { %v4888_v6 = vpack.c.bf16 %v674_v54, %v673_v53  ;;  %v3747_v7 = vcombine.low %v753_v55, %v4606_v5  ;;  %v3796_v9 = vcombine.low %v4606_v5, %v1425_v33  ;;  %vm4894_vm9 = vcmp.ne.s16.totalorder %v3746_v43, 0  ;;  %v1347_v43 = vld [vmem:[%s4509_s22 + $0x5a] sm:$0xff]  ;;  %v678_v54 = vld [vmem:[%s4509_s22 + $0x68] sm:$0xff] }
  0x2d   : > { %6617 = vst [vmem:[#allocation4_spill] sm:$0xff] %v4878_v0  ;;  %v4898_v13 = vpack.c.bf16 %v1345_v62, %v1344_v61  ;;  %v3748_v14 = vcombine.low %v755_v45, %v4606_v5  ;;  %v333_v15 = vand.u32 15, %v201_v56  ;;  %vm6621_vm10 = vcmask 64512   ;;  %v677_v53 = vld [vmem:[%s4509_s22 + $0x60] sm:$0xff]  ;;  %v1349_v56 = vld [vmem:[%s4509_s22 + $0x6a] sm:$0xff] }
  0x2e   : > { %4098 = vmatmul.mubr.msk.bf16.gmra.mxu0 %vm6480_vm1, %v4704_v50  ;;  %v757_v20 = vsel %vm725_vm5, 65537, %v6493_v4  ;;  %v340_v21 = vand.u32 15, %v202_v2  ;;  %vm6622_vm12 = vmmov %vm6621_vm10  ;;  %v6623_v24 = vmov 0  ;;  %vm4921_vm8 = vcmp.ne.s32.totalorder %v319_v25, 0  ;;  %v1346_v25 = vld [vmem:[%s4509_s22 + $0x52] sm:$0xff] }
  0x2f   : > { %4114 = vmatmul.mubr.msk.bf16.gmra.mxu1 %vm6480_vm1, %v906_v1  ;;  %4153 = vmatprep.mubr.msk.bf16.mxu0 %vm6480_vm1, %v1512_v11  ;;  %v3795_v1 = vcombine.low %v4606_v5, %v1423_v51  ;;  %v676_v11 = vld [vmem:[%s4509_s22 + $0x58] sm:$0xff]  ;;  %6620 = vst [vmem:[#allocation5_spill] sm:$0xff] %v4898_v13  ;;  %v204_v38 = vadd.s32 152, %v4504_v8  ;;  %vm6628_vm2 = vmmov %vm6621_vm10  ;;  %vm4932_vm5 = vcmp.ne.s16.totalorder %v3796_v9, 0  ;;  %v6631_v39 = vmov 0 }
  0x30   : > { %4119 = vmatprep.mubr.msk.bf16.mxu1 %vm6480_vm1, %v841_v18  ;;  %vm4837_vm1 = vcmp.ne.s16.totalorder %v3794_v22, 0  ;;  %v1427_v18 = vsel %vm1395_vm4, 65537, %v6493_v4  ;;  %v203_v22 = vadd.s32 144, %v4504_v8  ;;  %v4916_v28 = vpack.c.bf16 %v676_v11, %v675_v10 }
  0x31   : > { %v6614_v52 = vsel %vm4837_vm1, 4294967295, %v6613_v52  ;;  %v1514_v3 = vsel %vm4837_vm1, %v4826_v42, 0  ;;  %vm4912_vm14 = vcmp.ne.s16.totalorder %v3795_v1, 0  ;;  %vm4928_vm4 = vcmp.ne.s16.totalorder %v3747_v7, 0 }
  0x32   : > { %6615 = vst [vmem:[#allocation3_spill] sm:$0xff] %v6614_v52  ;;  %v6624_v24 = vsel %vm4912_vm14, 4294967295, %v6623_v24  ;;  %v6632_v39 = vsel %vm4932_vm5, 4294967295, %v6631_v39  ;;  %v6637_v48 = vmov 0  ;;  %v3797_v51 = vcombine.low %v4606_v5, %v1427_v18  ;;  %v679_v18 = vld [vmem:[%s4509_s22 + $0x70] sm:$0xff]  ;;  %v1360_v52 = vld [vmem:[%s4509_s22 + $0xc2] sm:$0xff] }
  0x33   : > { %6625 = vst [vmem:[#allocation6_spill] sm:$0xff] %v6624_v24  ;;  %6633 = vst [vmem:[#allocation7_spill] sm:$0xff] %v6632_v39  ;;  %v3749_v55 = vcombine.low %v757_v20, %v4606_v5  ;;  %vm4952_vm11 = vcmp.ne.s32.totalorder %v333_v15, 0  ;;  %vm6641_vm1 = vcmask 1043456   ;;  %vm4969_vm6 = vcmp.ne.s32.totalorder %v340_v21, 15  ;;  %v680_v20 = vld [vmem:[%s4509_s22 + $0x78] sm:$0xff] }
  0x34   : > { %v347_v61 = vand.u32 15, %v203_v22  ;;  %v205_v62 = vadd.s32 160, %v4504_v8  ;;  %v844_v45 = vsel %vm4894_vm9, %v4862_v59, 0  ;;  %v1515_v40 = vsel %vm4912_vm14, %v4878_v0, 0 }
  0x35   : > { %v354_v1 = vand.u32 15, %v204_v38  ;;  %v845_v2 = vsel %vm4928_vm4, %v4888_v6, 0  ;;  %v4991_v7 = vpack.c.bf16 %v678_v54, %v677_v53  ;;  %v6646_v11 = vmov 0  ;;  %v1350_v38 = vld [vmem:[%s4509_s22 + $0x72] sm:$0xff] }
  0x36   : > { %4154 = vmatmul.mubr.msk.bf16.vlgmr.msra.gmra.mxu0 %vm6621_vm10, %v1513_v44  ;;  %vm4938_vm10 = vcmp.ne.s32.totalorder %v326_v32, 15  ;;  %v1348_v32 = vld [vmem:[%s4509_s22 + $0x62] sm:$0xff]  ;;  %vm5012_vm3 = vcmp.ne.s16.totalorder %v3749_v55, 0  ;;  %v6651_v21 = vmov 0  ;;  %vm5024_vm14 = vcmp.ne.s32.totalorder %v347_v61, 0 }
  0x37   : > { %4120 = vmatmul.mubr.msk.bf16.vlgmr.msra.gmra.mxu1 %vm6622_vm12, %v842_v58  ;;  %4220 = vmatpush3.bf16.msra.mxu0 %v4666_v37  ;;  %v6629_v37 = vmov 0  ;;  %vm6636_vm12 = vmmov %vm6628_vm2  ;;  %v6652_v21 = vsel %vm5012_vm3, 4294967295, %v6651_v21  ;;  %v207_v54 = vadd.s32 176, %v4504_v8  ;;  %v5051_v55 = vpack.c.bf16 %v680_v20, %v679_v18 }
  0x38   : > { %4186 = vmatpush3.bf16.msra.mxu1 %v4652_v29  ;;  %4123 = vmatprep.mubr.msk.bf16.mxu1 %vm6628_vm2, %v843_v63  ;;  %v6630_v37 = vsel %vm4928_vm4, 4294967295, %v6629_v37  ;;  %v206_v29 = vadd.s32 168, %v4504_v8  ;;  %vm4944_vm2 = vcmp.ne.s16.totalorder %v3748_v14, 0  ;;  %v4980_v63 = vpack.c.bf16 %v1347_v43, %v1346_v25  ;;  %v1351_v25 = vld [vmem:[%s4509_s22 + $0x7a] sm:$0xff] }
  0x39   : > { %4157 = vmatprep.mubr.msk.bf16.mxu0 %vm6636_vm12, %v1514_v3  ;;  %v6638_v48 = vsel %vm4944_vm2, 4294967295, %v6637_v48  ;;  %4397 = vmatprep.subr.msk.bf16.mxu1 %vm6641_vm1, %v4672_v30  ;;  %vm6642_vm12 = vmpackc.low %vm4817_vm0, %vm4817_vm0  ;;  %v1516_v3 = vsel %vm4932_vm5, %v4898_v13, 0  ;;  %v846_v10 = vsel %vm4944_vm2, %v4916_v28, 0  ;;  %v5003_v14 = vpack.c.bf16 %v1349_v56, %v1348_v32  ;;  %v681_v32 = vld [vmem:[%s4509_s22 + $0x80] sm:$0xff]  ;;  %v682_v56 = vld [vmem:[%s4509_s22 + $0x88] sm:$0xff] }
  0x3a   : > { %v1429_v58 = vsel %vm6642_vm12, 65537, %v6493_v4  ;;  %6645 = vst [vmem:[#allocation8_spill] sm:$0xff] %v4980_v63  ;;  %v368_v9 = vand.u32 15, %v206_v29  ;;  %vm4999_vm12 = vcmp.ne.s16.totalorder %v3797_v51, 0  ;;  %vm6650_vm1 = vcmask 64512   ;;  %vm6653_vm5 = vmpackc.low %vm4921_vm8, %vm4921_vm8  ;;  %v688_v13 = vld [vmem:[%s4509_s22 + $0xb8] sm:$0xff] }
  0x3b   : > { %v6647_v11 = vsel %vm4999_vm12, 4294967295, %v6646_v11  ;;  %6649 = vst [vmem:[#allocation10_spill] sm:$0xff] %v5003_v14  ;;  %v3798_v15 = vcombine.low %v4606_v5, %v1429_v58  ;;  %v759_v22 = vsel %vm6653_vm5, 65537, %v6493_v4  ;;  %v361_v29 = vand.u32 15, %v205_v62  ;;  %vm6656_vm0 = vmmov %vm6650_vm1 }
  0x3c   : > { %6648 = vst [vmem:[#allocation9_spill] sm:$0xff] %v6647_v11  ;;  %vm6657_vm8 = vmpackc.low %vm4938_vm10, %vm4938_vm10  ;;  %vm5042_vm4 = vcmp.ne.s32.totalorder %v354_v1, 15  ;;  %v1517_v46 = vsel %vm4999_vm12, %v4980_v63, 0  ;;  %vm5061_vm10 = vcmp.ne.s32.totalorder %v368_v9, 15  ;;  %v6664_v61 = vmov 0  ;;  %v1353_v1 = vld [vmem:[%s4509_s22 + $0x8a] sm:$0xff] }
  0x3d   : > { %v1431_v17 = vsel %vm6657_vm8, 65537, %v6493_v4  ;;  %vm6658_vm5 = vmpackc.low %vm4952_vm11, %vm4952_vm11  ;;  %v3750_v62 = vcombine.low %v759_v22, %v4606_v5  ;;  %v208_v44 = vadd.s32 184, %v4504_v8  ;;  %v5090_v18 = vpack.c.bf16 %v682_v56, %v681_v32  ;;  %v683_v22 = vld [vmem:[%s4509_s22 + $0x90] sm:$0xff]  ;;  %v694_v63 = vld [vmem:[%s4509_s22 + $0xe8] sm:$0xff] }
  0x3e   : > { %4158 = vmatmul.mubr.msk.bf16.gmra.mxu0 %vm6650_vm1, %v1515_v40  ;;  %v761_v51 = vsel %vm6658_vm5, 65537, %v6493_v4  ;;  %vm6661_vm11 = vmpackc.low %vm4969_vm6, %vm4969_vm6  ;;  %v1352_v40 = vld [vmem:[%s4509_s22 + $0x82] sm:$0xff]  ;;  %vm5086_vm5 = vcmp.ne.s32.totalorder %v361_v29, 0  ;;  %v210_v32 = vadd.s32 200, %v4504_v8  ;;  %v209_v43 = vadd.s32 192, %v4504_v8 }
  0x3f   : > { %4124 = vmatmul.mubr.msk.bf16.gmra.mxu1 %vm6650_vm1, %v844_v45  ;;  %4161 = vmatprep.mubr.msk.bf16.mxu0 %vm6656_vm0, %v1516_v3  ;;  %v1433_v33 = vsel %vm6661_vm11, 65537, %v6493_v4  ;;  %vm5065_vm1 = vcmp.ne.s16.totalorder %v3798_v15, 0  ;;  %v5070_v45 = vpack.c.bf16 %v1351_v25, %v1350_v38  ;;  %vm731_vm6 = vmpackc.low %vm5024_vm14, %vm5024_vm14  ;;  %v3799_v3 = vcombine.low %v4606_v5, %v1431_v17  ;;  %v684_v38 = vld [vmem:[%s4509_s22 + $0x98] sm:$0xff] }
  0x40   : > { %4127 = vmatprep.mubr.msk.bf16.mxu1 %vm6656_vm0, %v845_v2  ;;  %v6665_v61 = vsel %vm5065_vm1, 4294967295, %v6664_v61  ;;  %v847_v2 = vsel %vm5012_vm3, %v4991_v7, 0  ;;  %v3751_v9 = vcombine.low %v761_v51, %v4606_v5  ;;  %vm1403_vm8 = vmpackc.low %vm5042_vm4, %vm5042_vm4  ;;  %v3800_v20 = vcombine.low %v4606_v5, %v1433_v33 }
  0x41   : > { %6666 = vst [vmem:[#allocation11_spill] sm:$0xff] %v6665_v61  ;;  %6667 = vst [vmem:[#allocation12_spill] sm:$0xff] %v5070_v45  ;;  %v375_v25 = vand.u32 15, %v207_v54  ;;  %v211_v17 = vadd.s32 208, %v4504_v8  ;;  %v1518_v29 = vsel %vm5065_vm1, %v5003_v14, 0  ;;  %v5102_v51 = vpack.c.bf16 %v1353_v1, %v1352_v40 }
  0x42   : > { %v763_v53 = vsel %vm731_vm6, 65537, %v6493_v4  ;;  %vm5111_vm4 = vcmp.ne.s16.totalorder %v3750_v62, 0  ;;  %v6671_v54 = vmov 0  ;;  %v1435_v56 = vsel %vm1403_vm8, 65537, %v6493_v4  ;;  %vm6673_vm14 = vmmov %vm6656_vm0  ;;  %v1354_v4 = vld [vmem:[%s4509_s22 + $0x92] sm:$0xff] }
  0x43   : > { %6670 = vst [vmem:[#allocation13_spill] sm:$0xff] %v5102_v51  ;;  %v6672_v54 = vsel %vm5111_vm4, 4294967295, %v6671_v54  ;;  %v382_v33 = vand.u32 15, %v208_v44  ;;  %vm5121_vm6 = vcmp.ne.s16.totalorder %v3799_v3, 0  ;;  %v6674_v40 = vmov 0  ;;  %vm6680_vm8 = vmpackc.low %vm5061_vm10, %vm5061_vm10 }
  0x44   : > { %v6675_v40 = vsel %vm5121_vm6, 4294967295, %v6674_v40  ;;  %vm5125_vm0 = vcmp.ne.s16.totalorder %v3751_v9, 0  ;;  %v6677_v62 = vmov 0  ;;  %v5129_v1 = vpack.c.bf16 %v684_v38, %v683_v22  ;;  %vm6681_vm11 = vmmov %vm6673_vm14  ;;  %v1355_v9 = vld [vmem:[%s4509_s22 + $0x9a] sm:$0xff]  ;;  %v1356_v22 = vld [vmem:[%s4509_s22 + $0xa2] sm:$0xff] }
  0x45   : > { %6676 = vst [vmem:[#allocation14_spill] sm:$0xff] %v6675_v40  ;;  %v6678_v62 = vsel %vm5125_vm0, 4294967295, %v6677_v62  ;;  %v6679_v61 = vmov 0   ;;  %vm5140_vm1 = vcmp.ne.s16.totalorder %v3800_v20, 0  ;;  %v3752_v3 = vcombine.low %v763_v53, %v4606_v5  ;;  %v1357_v38 = vld [vmem:[%s4509_s22 + $0xaa] sm:$0xff]  ;;  %vm6688_vm10 = vmmov %vm6681_vm11 }
  0x46   : > { %4162 = vmatmul.mubr.msk.bf16.gmra.mxu0 %vm6673_vm14, %v1517_v46  ;;  %v1437_v44 = vsel %vm6680_vm8, 65537, %v6679_v61  ;;  %vm6682_vm14 = vmmov %vm6681_vm11  ;;  %v6683_v46 = vmov 0  ;;  %vm5148_vm12 = vcmp.ne.s32.totalorder %v375_v25, 0  ;;  %v403_v58 = vand.u32 15, %v211_v17 }
  0x47   : > { %4128 = vmatmul.mubr.msk.bf16.gmra.mxu1 %vm6681_vm11, %v846_v10  ;;  %4165 = vmatprep.mubr.msk.bf16.mxu0 %vm6682_vm14, %v1518_v29  ;;  %v6684_v46 = vsel %vm5140_vm1, 4294967295, %v6683_v46  ;;  %v848_v10 = vsel %vm5111_vm4, %v5051_v55, 0  ;;  %v3801_v20 = vcombine.low %v4606_v5, %v1435_v56  ;;  %vm6689_vm11 = vmpackc.low %vm5086_vm5, %vm5086_vm5  ;;  %v396_v29 = vand.u32 15, %v210_v32 }
  0x48   : > { %6685 = vst [vmem:[#allocation15_spill] sm:$0xff] %v6684_v46  ;;  %4131 = vmatprep.mubr.msk.bf16.mxu1 %vm6688_vm10, %v847_v2  ;;  %v765_v25 = vsel %vm6689_vm11, 65537, %v6679_v61  ;;  %v1519_v17 = vsel %vm5121_vm6, %v5070_v45, 0  ;;  %v3802_v2 = vcombine.low %v4606_v5, %v1437_v44  ;;  %vm5167_vm8 = vcmp.ne.s32.totalorder %v382_v33, 15  ;;  %vm735_vm5 = vmpackc.low %vm5148_vm12, %vm5148_vm12  ;;  %v686_v44 = vld [vmem:[%s4509_s22 + $0xa8] sm:$0xff] }
  0x49   : > { %v389_v14 = vand.u32 15, %v209_v43  ;;  %v849_v56 = vsel %vm5125_vm0, %v5090_v18, 0  ;;  %v1520_v15 = vsel %vm5140_vm1, %v5102_v51, 0  ;;  %v5177_v32 = vpack.c.bf16 %v1355_v9, %v1354_v4  ;;  %v685_v43 = vld [vmem:[%s4509_s22 + $0xa0] sm:$0xff]  ;;  %vm6713_vm3 = vmpackc.low %vm5167_vm8, %vm5167_vm8  ;;  %v6842_v12 = vld [vmem:[#allocation11_spill] sm:$0xff] }
  0x4a   : > { %v5179_v39 = vpack.c.bf16 %v1357_v38, %v1356_v22  ;;  %vm5184_vm14 = vcmp.ne.s16.totalorder %v3752_v3, 0  ;;  %v6694_v33 = vmov 0  ;;  %v3753_v40 = vcombine.low %v765_v25, %v4606_v5 }
  0x4b   : > { %6692 = vst [vmem:[#allocation16_spill] sm:$0xff] %v5177_v32  ;;  %v6695_v33 = vsel %vm5184_vm14, 4294967295, %v6694_v33  ;;  %vm5191_vm10 = vcmp.ne.s32.totalorder %v403_v58, 0  ;;  %v212_v4 = vadd.s32 216, %v4504_v8  ;;  %vm5196_vm11 = vcmp.ne.s16.totalorder %v3801_v20, 0  ;;  %v693_v20 = vld [vmem:[%s4509_s22 + $0xe0] sm:$0xff] }
  0x4c   : > { %6693 = vst [vmem:[#allocation17_spill] sm:$0xff] %v5179_v39  ;;  %v6698_v9 = vmov 0  ;;  %vm5203_vm1 = vcmp.ne.s32.totalorder %v396_v29, 15  ;;  %v214_v3 = vadd.s32 232, %v4504_v8  ;;  %v215_v22 = vadd.s32 240, %v4504_v8 }
  0x4d   : > { %v6699_v9 = vsel %vm5196_vm11, 4294967295, %v6698_v9  ;;  %vm5209_vm6 = vcmp.ne.s16.totalorder %v3802_v2, 0  ;;  %v6703_v38 = vmov 0  ;;  %v767_v58 = vsel %vm735_vm5, 65537, %v6679_v61 }
  0x4e   : > { %6700 = vst [vmem:[#allocation18_spill] sm:$0xff] %v6699_v9  ;;  %v6704_v38 = vsel %vm5209_vm6, 4294967295, %v6703_v38  ;;  %vm5214_vm0 = vcmp.ne.s32.totalorder %v389_v14, 0  ;;  %v213_v25 = vadd.s32 224, %v4504_v8  ;;  %vm6708_vm12 = vcmask 64512   ;;  %v3876_v14 = vld [vmem:[%s6477_s1 + $0x30] sm:$0xff] }
  0x4f   : > { %6705 = vst [vmem:[#allocation19_spill] sm:$0xff] %v6704_v38  ;;  %4166 = vmatmul.mubr.msk.bf16.gmra.mxu0 %vm6708_vm12, %v1519_v17  ;;  %v850_v29 = vsel %vm5184_vm14, %v5129_v1, 0  ;;  %v5223_v46 = vpack.c.bf16 %v686_v44, %v685_v43  ;;  %v431_v2 = vand.u32 15, %v215_v22  ;;  %vm6709_vm5 = vmmov %vm6708_vm12  ;;  %v1521_v17 = vsel %vm5196_vm11, %v5177_v32, 0  ;;  %v690_v38 = vld [vmem:[%s4509_s22 + $0xc8] sm:$0xff]  ;;  %v687_v22 = vld [vmem:[%s4509_s22 + $0xb0] sm:$0xff] }
  0x50   : > { %4132 = vmatmul.mubr.msk.bf16.gmra.mxu1 %vm6709_vm5, %v848_v10  ;;  %vm6710_vm13 = vmmov %vm6709_vm5  ;;  %vm5236_vm12 = vcmp.ne.s16.totalorder %v3753_v40, 0  ;;  %v6711_v43 = vmov 0  ;;  %v1439_v44 = vsel %vm6713_vm3, 65537, %v6679_v61  ;;  %v410_v10 = vand.u32 15, %v212_v4  ;;  %v1359_v32 = vld [vmem:[%s4509_s22 + $0xba] sm:$0xff]  ;;  %v691_v9 = vld [vmem:[%s4509_s22 + $0xd0] sm:$0xff] }
  0x51   : > { %4169 = vmatprep.mubr.msk.bf16.mxu0 %vm6710_vm13, %v1520_v15  ;;  %v6712_v43 = vsel %vm5236_vm12, 4294967295, %v6711_v43  ;;  %4135 = vmatprep.mubr.msk.bf16.mxu1 %vm6709_vm5, %v849_v56  ;;  %v1522_v40 = vsel %vm5209_vm6, %v5179_v39, 0  ;;  %v3754_v15 = vcombine.low %v767_v58, %v4606_v5  ;;  %vm737_vm3 = vmpackc.low %vm5214_vm0, %vm5214_vm0  ;;  %v424_v53 = vand.u32 15, %v214_v3 }
  0x52   : > { %vm631_vm8 = vcmp.ne.s32.totalorder %v431_v2, 0  ;;  %vm6714_vm5 = vmpackc.low %vm5191_vm10, %vm5191_vm10  ;;  %v417_v4 = vand.u32 15, %v213_v25  ;;  %v5266_v58 = vpack.c.bf16 %v3876_v14, %v3876_v14  ;;  %v3803_v3 = vcombine.low %v4606_v5, %v1439_v44  ;;  %v689_v2 = vld [vmem:[%s4509_s22 + $0xc0] sm:$0xff]  ;;  %v1358_v44 = vld [vmem:[%s4509_s22 + $0xb2] sm:$0xff] }
  0x53   : > { %v771_v56 = vsel %vm6714_vm5, 65537, %v6679_v61  ;;  %vm743_vm13 = vmpackc.low %vm631_vm8, %vm631_vm8  ;;  %v769_v11 = vsel %vm737_vm3, 65537, %v6679_v61  ;;  %v216_v14 = vadd.s32 248, %v4504_v8  ;;  %vm5304_vm0 = vcmp.ne.s32.totalorder %v424_v53, 15  ;;  %v1361_v53 = vld [vmem:[%s4509_s22 + $0xca] sm:$0xff] }
  0x54   : > { %vm6715_vm10 = vmpackc.low %vm5203_vm1, %vm5203_vm1  ;;  %v5278_v25 = vsel %vm743_vm13, 65537, %v6679_v61  ;;  %vm5291_vm1 = vcmp.ne.s32.totalorder %v410_v10, 15  ;;  %vm6718_vm13 = vcmask 1043456   ;;  %v3756_v51 = vcombine.low %v771_v56, %v4606_v5 }
  0x55   : > { %v1441_v45 = vsel %vm6715_vm10, 65537, %v6679_v61  ;;  %4398 = vmatprep.subr.msk.bf16.mxu0 %vm6718_vm13, %v5266_v58  ;;  %v851_v39 = vsel %vm5236_vm12, %v5223_v46, 0  ;;  %v5318_v56 = vpack.c.bf16 %v690_v38, %v689_v2  ;;  %vm5323_vm3 = vcmp.ne.s32.totalorder %v417_v4, 0  ;;  %vm6735_vm11 = vmpackc.low %vm5291_vm1, %vm5291_vm1 }
  0x56   : > { %v3804_v0 = vcombine.low %v4606_v5, %v1441_v45  ;;  %vm6723_vm8 = vcmask 64512   ;;  %vm5328_vm5 = vcmp.ne.s16.totalorder %v3754_v15, 0  ;;  %v6724_v10 = vmov 0 }
  0x57   : > { %4170 = vmatmul.mubr.msk.bf16.gmra.mxu0 %vm6723_vm8, %v1521_v17  ;;  %v6725_v10 = vsel %vm5328_vm5, 4294967295, %v6724_v10  ;;  %v3755_v8 = vcombine.low %v769_v11, %v4606_v5  ;;  %vm6726_vm13 = vmmov %vm6723_vm8  ;;  %v5341_v4 = vpack.c.bf16 %v1359_v32, %v1358_v44  ;;  %v5343_v17 = vpack.c.bf16 %v694_v63, %v693_v20  ;;  %v692_v11 = vld [vmem:[%s4509_s22 + $0xd8] sm:$0xff] }
  0x58   : > { %4136 = vmatmul.mubr.msk.bf16.gmra.mxu1 %vm6726_vm13, %v850_v29  ;;  %vm6727_vm6 = vmmov %vm6723_vm8  ;;  %v438_v15 = vand.u32 15, %v216_v14  ;;  %v5352_v45 = vpack.c.bf16 %v688_v13, %v687_v22  ;;  %vm5354_vm13 = vcmp.ne.s16.totalorder %v3803_v3, 0  ;;  %v6729_v29 = vmov 0  ;;  %v1362_v20 = vld [vmem:[%s4509_s22 + $0xd2] sm:$0xff] }
  0x59   : > { %4173 = vmatprep.mubr.msk.bf16.mxu0 %vm6727_vm6, %v1522_v40  ;;  %vm1413_vm8 = vmpackc.low %vm5304_vm0, %vm5304_vm0  ;;  %v6730_v29 = vsel %vm5354_vm13, 4294967295, %v6729_v29  ;;  %v5358_v63 = vpack.c.bf16 %v1361_v53, %v1360_v52  ;;  %v6731_v24 = vmov 0  ;;  %v6733_v13 = vmov 0 }
  0x5a   : > { %vm6728_vm10 = vmmov %vm6727_vm6  ;;  %vm5360_vm6 = vcmp.ne.s16.totalorder %v3756_v51, 0  ;;  %v1443_v52 = vsel %vm6735_vm11, 65537, %v6679_v61  ;;  %vm5380_vm12 = vcmp.ne.s16.totalorder %v3755_v8, 0  ;;  %v1523_v32 = vsel %vm5354_vm13, %v5341_v4, 0  ;;  %v1363_v8 = vld [vmem:[%s4509_s22 + $0xda] sm:$0xff]  ;;  %v1364_v51 = vld [vmem:[%s4509_s22 + $0xe2] sm:$0xff] }
  0x5b   : > { %4139 = vmatprep.mubr.msk.bf16.mxu1 %vm6728_vm10, %v851_v39  ;;  %v6732_v24 = vsel %vm5360_vm6, 4294967295, %v6731_v24  ;;  %vm741_vm0 = vmpackc.low %vm5323_vm3, %vm5323_vm3  ;;  %vm5367_vm10 = vcmp.ne.s16.totalorder %v3804_v0, 0  ;;  %v1445_v0 = vsel %vm1413_vm8, 65537, %v6679_v61  ;;  %vm5393_vm11 = vcmp.ne.s32.totalorder %v438_v15, 15  ;;  %v1365_v39 = vld [vmem:[%s4509_s22 + $0xea] sm:$0xff] }
  0x5c   : > { %v6734_v13 = vsel %vm5367_vm10, 4294967295, %v6733_v13  ;;  %v773_v40 = vsel %vm741_vm0, 65537, %v6679_v61  ;;  %v852_v14 = vsel %vm5328_vm5, %v5352_v45, 0  ;;  %v1524_v44 = vsel %vm5367_vm10, %v5358_v63, 0 }
  0x5d   : > { %v3805_v53 = vcombine.low %v4606_v5, %v1443_v52  ;;  %vm6740_vm1 = vnez %v6612_v41  ;;  %v853_v3 = vsel %vm5380_vm12, %v5318_v56, 0  ;;  %v3806_v2 = vcombine.low %v4606_v5, %v1445_v0 }
  0x5e   : > { %vm6741_vm3 = vcmask 64512   ;;  %v3757_v52 = vcombine.low %v773_v40, %v4606_v5  ;;  %vm6742_vm0 = vnez %v6630_v37  ;;  %v5437_v40 = vpack.c.bf16 %v1363_v8, %v1362_v20  ;;  %v696_v20 = vld [vmem:[%s4509_s22 + $0xf8] sm:$0xff] }
  0x5f   : > { %4174 = vmatmul.mubr.msk.bf16.gmra.mxu0 %vm6741_vm3, %v1523_v32  ;;  %vm6743_vm10 = vmmov %vm6741_vm3  ;;  %v5435_v32 = vpack.c.bf16 %v692_v11, %v691_v9  ;;  %vm5446_vm2 = vcmp.ne.s16.totalorder %v3805_v53, 0  ;;  %v6747_v0 = vmov 0  ;;  %v5450_v9 = vpack.c.bf16 %v1365_v39, %v1364_v51 }
  0x60   : > { %4140 = vmatmul.mubr.msk.bf16.gmra.mxu1 %vm6743_vm10, %v852_v14  ;;  %vm6744_vm13 = vmmov %vm6741_vm3  ;;  %vm6745_vm3 = vnez %v6652_v21  ;;  %v6748_v0 = vsel %vm5446_vm2, 4294967295, %v6747_v0  ;;  %v6750_v11 = vmov 0  ;;  %vm6753_vm4 = vnez %v6712_v43 }
  0x61   : > { %4177 = vmatprep.mubr.msk.bf16.mxu0 %vm6744_vm13, %v1524_v44  ;;  %vm6746_vm8 = vmmov %vm6743_vm10  ;;  %vm6749_vm13 = vnez %v6678_v62  ;;  %vm5458_vm10 = vcmp.ne.s16.totalorder %v3806_v2, 0  ;;  %vm5476_vm14 = vcmp.ne.s16.totalorder %v3757_v52, 0  ;;  %v6754_v8 = vmov 0  ;;  %v1366_v44 = vld [vmem:[%s4509_s22 + $0xf2] sm:$0xff]  ;;  %v1367_v2 = vld [vmem:[%s4509_s22 + $0xfa] sm:$0xff] }
  0x62   : > { %4143 = vmatprep.mubr.msk.bf16.mxu1 %vm6746_vm8, %v853_v3  ;;  %v6751_v11 = vsel %vm5458_vm10, 4294967295, %v6750_v11  ;;  %v695_v3 = vld [vmem:[%s4509_s22 + $0xf0] sm:$0xff]  ;;  %vm6752_vm8 = vmpackc.low %vm5393_vm11, %vm5393_vm11  ;;  %v6755_v8 = vsel %vm5476_vm14, 4294967295, %v6754_v8  ;;  %v1525_v53 = vsel %vm5446_vm2, %v5437_v40, 0  ;;  %v1526_v22 = vsel %vm5458_vm10, %v5450_v9, 0 }
  0x63   : > { %v1447_v39 = vsel %vm6752_vm8, 65537, %v6679_v61  ;;  %v854_v61 = vsel %vm5360_vm6, %v5435_v32, 0  ;;  %v5489_v51 = vpack.c.bf16 %v696_v20, %v695_v3  ;;  %v855_v14 = vsel %vm5476_vm14, %v5343_v17, 0 }
  0x64   : > { %v3807_v52 = vcombine.low %v4606_v5, %v1447_v39  ;;  %v2752_v15 = vsel %vm5380_vm12, %v5343_v17, 0  ;;  %vm6756_vm11 = vcmask 64512   ;;  %v5506_v3 = vpack.c.bf16 %v1367_v2, %v1366_v44 }
  0x65   : > { %vm6757_vm8 = vmmov %vm6756_vm11  ;;  %v6760_v20 = vmov 0  ;;  %v6763_v39 = vcombine.low %v5278_v25, %v4606_v5  ;;  %v3893_v5 = vld [vmem:[%s6477_s1 + $0x38] sm:$0xff]  ;;  %v3910_v25 = vld [vmem:[%s6477_s1 + $0x40] sm:$0xff] }
  0x66   : > { %vm6758_vm10 = vmmov %vm6757_vm8  ;;  %vm5509_vm5 = vcmp.ne.s16.totalorder %v3807_v52, 0  ;;  %v5551_v52 = vpack.c.bf16 %v3910_v25, %v3910_v25  ;;  %v2104_v25 = vld [vmem:[%s4509_s22 + $0xa1] sm:$0xff] }
  0x67   : > { %4178 = vmatmul.mubr.msk.bf16.gmra.mxu0 %vm6756_vm11, %v1525_v53  ;;  %vm6759_vm2 = vmmov %vm6757_vm8  ;;  %v6761_v20 = vsel %vm5509_vm5, 4294967295, %v6760_v20  ;;  %vm5516_vm11 = vcmp.ne.s16.totalorder %v6763_v39, 0  ;;  %v6764_v53 = vmov 0  ;;  %v6771_v39 = vsel %vm4802_vm15, %v4810_v36, 0 }
  0x68   : > { %4144 = vmatmul.mubr.msk.bf16.gmra.mxu1 %vm6757_vm8, %v854_v61  ;;  %4181 = vmatprep.mubr.msk.bf16.mxu0 %vm6758_vm10, %v1526_v22  ;;  %6762 = vst [vmem:[#allocation20_spill] sm:$0xff] %v6761_v20  ;;  %v6765_v53 = vsel %vm5516_vm11, 4294967295, %v6764_v53  ;;  %v1527_v61 = vsel %vm5509_vm5, %v5506_v3, 0  ;;  %v856_v44 = vsel %vm5516_vm11, %v5489_v51, 0  ;;  %vm6766_vm10 = vmmov %vm6759_vm2  ;;  %vm6769_vm5 = vcmask 1043456  }
  0x69   : > { %4147 = vmatprep.mubr.msk.bf16.mxu1 %vm6759_vm2, %v855_v14  ;;  %v1823_v14 = vsel %vm4733_vm7, %v4788_v26, 0  ;;  %vm6767_vm8 = vmmov %vm6759_vm2  ;;  %v2808_v26 = vsel %vm6769_vm5, %v5266_v58, 0  ;;  %v5547_v22 = vpack.c.bf16 %v3893_v5, %v3893_v5  ;;  %v2101_v58 = vld [vmem:[%s4509_s22 + $0x89] sm:$0xff]  ;;  %v1831_v5 = vsel %vm6749_vm13, %v5129_v1, 0 }
  0x6a   : > { %vm6768_vm6 = vmmov %vm6759_vm2 }
  0x6f   : > { %4182 = vmatmul.mubr.msk.bf16.gmra.mxu0 %vm6759_vm2, %v1527_v61  ;;  %vm6770_vm2 = vmmov %vm6769_vm5  ;;  %v2102_v61 = vld [vmem:[%s4509_s22 + $0x91] sm:$0xff] }
  0x70   : > { %4148 = vmatmul.mubr.msk.bf16.gmra.mxu1 %vm6766_vm10, %v856_v44  ;;  %4221 = vmatprep.mubr.msk.bf16.mxu0 %vm6767_vm8, %v4523_v19  ;;  %v2497_v2 = vsel %vm6770_vm2, %v4672_v30, 0  ;;  %v1825_v19 = vsel %vm6740_vm1, %v4862_v59, 0  ;;  %vm6772_vm10 = vmmov %vm6768_vm6  ;;  %v6777_v30 = vsel %vm4894_vm9, %v4888_v6, 0  ;;  %v2103_v44 = vld [vmem:[%s4509_s22 + $0x99] sm:$0xff] }
  0x71   : > { %4187 = vmatprep.mubr.msk.bf16.mxu1 %vm6768_vm6, %v1823_v14  ;;  %vm6773_vm5 = vmmov %vm6768_vm6 }
  0x72   : > { %vm6774_vm8 = vmmov %vm6773_vm5 }
  0x77   : > { %4222 = vmatmul.mubr.msk.bf16.vlgmr.msra.gmra.mxu0 %vm6768_vm6, %v4540_v31  ;;  %vm6775_vm6 = vmmov %vm6770_vm2  ;;  %v1827_v31 = vsel %vm6742_vm0, %v4916_v28, 0 }
  0x78   : > { %4188 = vmatmul.mubr.msk.bf16.vlgmr.msra.gmra.mxu1 %vm6772_vm10, %v6771_v39  ;;  %4288 = vmatpush3.bf16.msra.mxu0 %v2808_v26  ;;  %vm6776_vm10 = vmmov %vm6773_vm5  ;;  %v2105_v26 = vld [vmem:[%s4509_s22 + $0xa9] sm:$0xff] }
  0x79   : > { %4254 = vmatpush3.bf16.msra.mxu1 %v2497_v2  ;;  %4191 = vmatprep.mubr.msk.bf16.mxu1 %vm6773_vm5, %v1825_v19  ;;  %v2106_v2 = vld [vmem:[%s4509_s22 + $0xb1] sm:$0xff]  ;;  %v2107_v19 = vld [vmem:[%s4509_s22 + $0xb9] sm:$0xff]  ;;  %v5616_v39 = vpack.c.bf16 %v2105_v26, %v2104_v25  ;;  %v2112_v26 = vld [vmem:[%s4509_s22 + $0xe1] sm:$0xff] }
  0x7a   : > { %4225 = vmatprep.mubr.msk.bf16.mxu0 %vm6774_vm8, %v4562_v47  ;;  %4399 = vmatprep.subr.msk.bf16.mxu1 %vm6770_vm2, %v5547_v22  ;;  %vm6778_vm8 = vmmov %vm6773_vm5  ;;  %v1829_v47 = vsel %vm6745_vm3, %v5051_v55, 0 }
  0x7b   : > { %4400 = vmatprep.subr.msk.bf16.mxu0 %vm6775_vm6, %v5551_v52  ;;  %vm6779_vm2 = vmmov %vm6773_vm5 }
  0x7c   : > { %vm6780_vm6 = vmmov %vm6779_vm2 }
  0x7d   : > { %vm6783_vm0 = vmmov %vm6779_vm2 }
  0x7e   : > { %vm6795_vm13 = vmmov %vm6783_vm0 }
  0x7f   : > { %4226 = vmatmul.mubr.msk.bf16.gmra.mxu0 %vm6776_vm10, %v4566_v49  ;;  %vm6781_vm10 = vnez %v6638_v48  ;;  %v6853_v48 = vld [vmem:[#allocation15_spill] sm:$0xff] }
  0x80   : > { %4192 = vmatmul.mubr.msk.bf16.gmra.mxu1 %vm6773_vm5, %v6777_v30  ;;  %4229 = vmatprep.mubr.msk.bf16.mxu0 %vm6778_vm8, %v4625_v16  ;;  %v6782_v49 = vsel %vm6781_vm10, %v4991_v7, 0  ;;  %vm6784_vm5 = vmmov %vm6783_vm0  ;;  %v2100_v16 = vld [vmem:[%s4509_s22 + $0x81] sm:$0xff]  ;;  %v1833_v30 = vsel %vm6753_vm4, %v5352_v45, 0 }
  0x81   : > { %4195 = vmatprep.mubr.msk.bf16.mxu1 %vm6779_vm2, %v1827_v31  ;;  %vm6785_vm8 = vmmov %vm6783_vm0  ;;  %v5595_v14 = vpack.c.bf16 %v2101_v58, %v2100_v16  ;;  %vm6786_vm2 = vnez %v6672_v54  ;;  %v5618_v31 = vpack.c.bf16 %v2107_v19, %v2106_v2  ;;  %v2109_v16 = vld [vmem:[%s4509_s22 + $0xc9] sm:$0xff]  ;;  %v2110_v58 = vld [vmem:[%s4509_s22 + $0xd1] sm:$0xff] }
  0x82   : > { %v2113_v2 = vld [vmem:[%s4509_s22 + $0xe9] sm:$0xff]  ;;  %vm6800_vm4 = vmmov %vm6783_vm0  ;;  %v2114_v19 = vld [vmem:[%s4509_s22 + $0xf1] sm:$0xff] }
  0x83   : > { %v6865_v54 = vld [vmem:[#allocation19_spill] sm:$0xff] }
  0x87   : > { %4230 = vmatmul.mubr.msk.bf16.gmra.mxu0 %vm6780_vm6, %v4636_v23  ;;  %v5597_v23 = vpack.c.bf16 %v2103_v44, %v2102_v61  ;;  %vm6788_vm6 = vmmov %vm6783_vm0  ;;  %v2111_v61 = vld [vmem:[%s4509_s22 + $0xd9] sm:$0xff] }
  0x88   : > { %4196 = vmatmul.mubr.msk.bf16.gmra.mxu1 %vm6783_vm0, %v6782_v49  ;;  %4233 = vmatprep.mubr.msk.bf16.mxu0 %vm6784_vm5, %v4704_v50  ;;  %v6787_v50 = vsel %vm6786_vm2, %v5090_v18, 0  ;;  %vm6789_vm5 = vmmov %vm6783_vm0  ;;  %v2108_v49 = vld [vmem:[%s4509_s22 + $0xc1] sm:$0xff] }
  0x89   : > { %4199 = vmatprep.mubr.msk.bf16.mxu1 %vm6785_vm8, %v1829_v47  ;;  %vm6790_vm8 = vmmov %vm6783_vm0  ;;  %v5637_v44 = vpack.c.bf16 %v2109_v16, %v2108_v49  ;;  %v1837_v16 = vsel %vm5476_vm14, %v5489_v51, 0  ;;  %vm6815_vm14 = vcmask 1043456  }
  0x8f   : > { %4234 = vmatmul.mubr.msk.bf16.gmra.mxu0 %vm6783_vm0, %v5595_v14 }
  0x90   : > { %4200 = vmatmul.mubr.msk.bf16.gmra.mxu1 %vm6788_vm6, %v6787_v50  ;;  %4237 = vmatprep.mubr.msk.bf16.mxu0 %vm6789_vm5, %v5597_v23  ;;  %vm6791_vm6 = vnez %v6695_v33  ;;  %vm6793_vm5 = vmmov %vm6783_vm0  ;;  %v1835_v50 = vsel %vm5380_vm12, %v5435_v32, 0 }
  0x91   : > { %4203 = vmatprep.mubr.msk.bf16.mxu1 %vm6790_vm8, %v1831_v5  ;;  %v6792_v47 = vsel %vm6791_vm6, %v5223_v46, 0  ;;  %vm6794_vm8 = vmmov %vm6783_vm0  ;;  %v5639_v5 = vpack.c.bf16 %v2111_v61, %v2110_v58  ;;  %v1805_v58 = vld [vmem:[%s4509_s22 + $0x100] sm:$0xff]  ;;  %v1806_v61 = vld [vmem:[%s4509_s22 + $0x108] sm:$0xff] }
  0x92   : > { %vm6806_vm12 = vmmov %vm6783_vm0 }
  0x97   : > { %4238 = vmatmul.mubr.msk.bf16.gmra.mxu0 %vm6783_vm0, %v5616_v39 }
  0x98   : > { %4204 = vmatmul.mubr.msk.bf16.gmra.mxu1 %vm6793_vm5, %v6792_v47  ;;  %4241 = vmatprep.mubr.msk.bf16.mxu0 %vm6794_vm8, %v5618_v31  ;;  %vm6796_vm5 = vnez %v6725_v10  ;;  %vm6799_vm8 = vmmov %vm6783_vm0  ;;  %v5658_v47 = vpack.c.bf16 %v2113_v2, %v2112_v26  ;;  %v2117_v26 = vld [vmem:[%s4509_s22 + $0x109] sm:$0xff]  ;;  %v5679_v2 = vpack.c.bf16 %v1806_v61, %v1805_v58  ;;  %v6813_v58 = vld [vmem:[#allocation2_spill] sm:$0xff] }
  0x99   : > { %4207 = vmatprep.mubr.msk.bf16.mxu1 %vm6795_vm13, %v1833_v30  ;;  %v6797_v25 = vsel %vm6796_vm5, %v5318_v56, 0  ;;  %vm6798_vm13 = vmmov %vm6783_vm0  ;;  %v2115_v30 = vld [vmem:[%s4509_s22 + $0xf9] sm:$0xff] }
  0x9a   : > { %v5660_v49 = vpack.c.bf16 %v2115_v30, %v2114_v19  ;;  %v1838_v30 = vsel %vm5516_vm11, %v5679_v2, 0  ;;  %vm6814_vm11 = vnez %v6813_v58 }
  0x9b   : > { %v2430_v61 = vsel %vm6814_vm11, %v4826_v42, 0  ;;  %v6824_v42 = vsel %vm6740_vm1, %v4888_v6, 0  ;;  %vm6834_vm1 = vnez %v6630_v37  ;;  %v6838_v6 = vld [vmem:[#allocation10_spill] sm:$0xff]  ;;  %v6847_v37 = vsel %vm6745_vm3, %v5090_v18, 0  ;;  %v6862_v18 = vld [vmem:[#allocation17_spill] sm:$0xff] }
  0x9c   : > { %6801 = vst [vmem:[#allocation21_spill] sm:$0xff] %v5660_v49  ;;  %v6835_v41 = vsel %vm6834_vm1, %v4991_v7, 0  ;;  %v6849_v7 = vld [vmem:[#allocation13_spill] sm:$0xff]  ;;  %vm6858_vm3 = vnez %v6678_v62  ;;  %v6867_v62 = vsel %vm6791_vm6, %v5352_v45, 0  ;;  %vm6874_vm6 = vnez %v6730_v29 }
  0x9d   : > { %v6859_v21 = vsel %vm6858_vm3, %v5223_v46, 0 }
  0x9f   : > { %4242 = vmatmul.mubr.msk.bf16.gmra.mxu0 %vm6783_vm0, %v5637_v44 }
  0xa0   : > { %4208 = vmatmul.mubr.msk.bf16.gmra.mxu1 %vm6798_vm13, %v6797_v25  ;;  %4245 = vmatprep.mubr.msk.bf16.mxu0 %vm6799_vm8, %v5639_v5  ;;  %vm6802_vm13 = vnez %v6732_v24  ;;  %vm6805_vm8 = vmmov %vm6783_vm0 }
  0xa1   : > { %4211 = vmatprep.mubr.msk.bf16.mxu1 %vm6800_vm4, %v1835_v50  ;;  %v6803_v25 = vsel %vm6802_vm13, %v5343_v17, 0  ;;  %vm6804_vm4 = vmmov %vm6783_vm0  ;;  %v2116_v50 = vld [vmem:[%s4509_s22 + $0x101] sm:$0xff] }
  0xa2   : > { %v5681_v19 = vpack.c.bf16 %v2117_v26, %v2116_v50  ;;  %vm6812_vm13 = vmmov %vm6804_vm4  ;;  %v6817_v50 = vld [vmem:[#allocation4_spill] sm:$0xff]  ;;  %v6818_v26 = vld [vmem:[#allocation3_spill] sm:$0xff] }
  0xa4   : > { %6807 = vst [vmem:[#allocation22_spill] sm:$0xff] %v5681_v19 }
  0xa7   : > { %4246 = vmatmul.mubr.msk.bf16.gmra.mxu0 %vm6783_vm0, %v5658_v47  ;;  %vm6808_vm0 = vnez %v6595_v57 }
  0xa8   : > { %4212 = vmatmul.mubr.msk.bf16.gmra.mxu1 %vm6804_vm4, %v6803_v25  ;;  %4249 = vmatprep.mubr.msk.bf16.mxu0 %vm6805_vm8, %v5660_v49  ;;  %v2429_v38 = vsel %vm6808_vm0, %v4790_v27, 0  ;;  %vm6809_vm8 = vmmov %vm6804_vm4  ;;  %v3414_v27 = vsel %vm6815_vm14, %v5551_v52, 0  ;;  %v6829_v52 = vld [vmem:[#allocation8_spill] sm:$0xff] }
  0xa9   : > { %4215 = vmatprep.mubr.msk.bf16.mxu1 %vm6806_vm12, %v1837_v16  ;;  %v6810_v16 = vsel %vm4733_vm7, %v4810_v36, 0  ;;  %vm6811_vm12 = vmmov %vm6804_vm4  ;;  %v6820_v36 = vsel %vm4802_vm15, %v4862_v59, 0  ;;  %v6830_v59 = vld [vmem:[#allocation7_spill] sm:$0xff] }
  0xaa   : > { %vm6816_vm0 = vmmov %vm6815_vm14  ;;  %vm6831_vm15 = vnez %v6830_v59 }
  0xab   : > { %v3103_v25 = vsel %vm6816_vm0, %v5547_v22, 0  ;;  %vm6821_vm7 = vmmov %vm6809_vm8  ;;  %v6827_v22 = vld [vmem:[#allocation6_spill] sm:$0xff] }
  0xac   : > { %vm6825_vm14 = vmmov %vm6821_vm7  ;;  %vm6828_vm0 = vnez %v6827_v22 }
  0xad   : > { %vm6848_vm1 = vmmov %vm6821_vm7 }
  0xaf   : > { %4250 = vmatmul.mubr.msk.bf16.gmra.mxu0 %vm6804_vm4, %v5681_v19  ;;  %vm6819_vm4 = vnez %v6818_v26  ;;  %v3011_v19 = vld [vmem:[%s4509_s22 + $0x61] sm:$0xff] }
  0xb0   : > { %4216 = vmatmul.mubr.msk.bf16.gmra.mxu1 %vm6809_vm8, %v1838_v30  ;;  %4289 = vmatprep.mubr.msk.bf16.mxu0 %vm6811_vm12, %v6810_v16  ;;  %v2431_v60 = vsel %vm6819_vm4, %v6817_v50, 0  ;;  %vm6823_vm8 = vmmov %vm6821_vm7  ;;  %v2433_v30 = vsel %vm6831_vm15, %v6829_v52, 0  ;;  %v6832_v16 = vsel %vm4894_vm9, %v4916_v28, 0  ;;  %vm6843_vm15 = vnez %v6842_v12 }
  0xb1   : > { %4255 = vmatprep.mubr.msk.bf16.mxu1 %vm6812_vm13, %v2429_v38  ;;  %vm6822_vm13 = vmmov %vm6821_vm7  ;;  %v6826_v38 = vld [vmem:[#allocation5_spill] sm:$0xff]  ;;  %v6844_v50 = vsel %vm6781_vm10, %v5051_v55, 0 }
  0xb2   : > { %v2432_v34 = vsel %vm6828_vm0, %v6826_v38, 0  ;;  %vm6833_vm12 = vmmov %vm6821_vm7  ;;  %v6855_v38 = vsel %vm6786_vm2, %v5129_v1, 0 }
  0xb3   : > { %vm6845_vm9 = vmmov %vm6821_vm7 }
  0xb4   : > { %vm6856_vm10 = vmmov %vm6848_vm1 }
  0xb7   : > { %4290 = vmatmul.mubr.msk.bf16.vlgmr.msra.gmra.mxu0 %vm6821_vm7, %v6820_v36 }
  0xb8   : > { %4256 = vmatmul.mubr.msk.bf16.vlgmr.msra.gmra.mxu1 %vm6822_vm13, %v2430_v61  ;;  %4356 = vmatpush3.bf16.msra.mxu0 %v3414_v27  ;;  %vm6836_vm13 = vmmov %vm6821_vm7  ;;  %v6839_v61 = vld [vmem:[#allocation9_spill] sm:$0xff] }
  0xb9   : > { %4322 = vmatpush3.bf16.msra.mxu1 %v3103_v25  ;;  %4259 = vmatprep.mubr.msk.bf16.mxu1 %vm6823_vm8, %v2431_v60  ;;  %vm6837_vm8 = vmmov %vm6821_vm7  ;;  %v6841_v25 = vld [vmem:[#allocation12_spill] sm:$0xff]  ;;  %v6850_v60 = vld [vmem:[#allocation14_spill] sm:$0xff] }
  0xba   : > { %4293 = vmatprep.mubr.msk.bf16.mxu0 %vm6825_vm14, %v6824_v42  ;;  %vm6840_vm14 = vnez %v6839_v61  ;;  %v2435_v28 = vsel %vm6843_vm15, %v6841_v25, 0  ;;  %v6852_v42 = vld [vmem:[#allocation16_spill] sm:$0xff] }
  0xbb   : > { %v2434_v27 = vsel %vm6840_vm14, %v6838_v6, 0 }
  0xbf   : > { %4294 = vmatmul.mubr.msk.bf16.gmra.mxu0 %vm6833_vm12, %v6832_v16  ;;  %vm6846_vm12 = vmmov %vm6821_vm7 }
  0xc0   : > { %4260 = vmatmul.mubr.msk.bf16.gmra.mxu1 %vm6821_vm7, %v2432_v34  ;;  %4297 = vmatprep.mubr.msk.bf16.mxu0 %vm6836_vm13, %v6835_v41  ;;  %vm6851_vm13 = vnez %v6850_v60  ;;  %v6863_v34 = vld [vmem:[#allocation18_spill] sm:$0xff] }
  0xc1   : > { %4263 = vmatprep.mubr.msk.bf16.mxu1 %vm6837_vm8, %v2433_v30  ;;  %v2436_v36 = vsel %vm6851_vm13, %v6849_v7, 0  ;;  %vm6854_vm8 = vnez %v6853_v48  ;;  %v2722_v7 = vld [vmem:[%s4509_s22 + $0x110] sm:$0xff] }
  0xc2   : > { %v2437_v55 = vsel %vm6854_vm8, %v6852_v42, 0  ;;  %vm6866_vm8 = vnez %v6865_v54 }
  0xc3   : > { %v2439_v1 = vsel %vm6866_vm8, %v5341_v4, 0 }
  0xc7   : > { %4298 = vmatmul.mubr.msk.bf16.gmra.mxu0 %vm6845_vm9, %v6844_v50  ;;  %vm6857_vm9 = vmmov %vm6848_vm1 }
  0xc8   : > { %4264 = vmatmul.mubr.msk.bf16.gmra.mxu1 %vm6846_vm12, %v2434_v27  ;;  %4301 = vmatprep.mubr.msk.bf16.mxu0 %vm6821_vm7, %v6847_v37  ;;  %vm6860_vm12 = vmmov %vm6848_vm1 }
  0xc9   : > { %4267 = vmatprep.mubr.msk.bf16.mxu1 %vm6848_vm1, %v2435_v28  ;;  %vm6861_vm7 = vmmov %vm6848_vm1  ;;  %vm6864_vm1 = vnez %v6863_v34  ;;  %v6876_v28 = vsel %vm6796_vm5, %v5435_v32, 0  ;;  %vm6881_vm5 = vnez %v6748_v0 }
  0xca   : > { %v2438_v52 = vsel %vm6864_vm1, %v6862_v18, 0  ;;  %vm6868_vm2 = vmmov %vm6861_vm7  ;;  %v2442_v17 = vsel %vm6881_vm5, %v5450_v9, 0  ;;  %v3299_v18 = vld [vmem:[%s4509_s22 + $0x2a] sm:$0xff] }
  0xcb   : > { %vm6872_vm3 = vmmov %vm6868_vm2 }
  0xcf   : > { %4302 = vmatmul.mubr.msk.bf16.gmra.mxu0 %vm6856_vm10, %v6855_v38  ;;  %vm6869_vm10 = vmmov %vm6868_vm2  ;;  %v2412_v38 = vld [vmem:[%s4509_s22 + $0x10a] sm:$0xff] }
  0xd0   : > { %4268 = vmatmul.mubr.msk.bf16.gmra.mxu1 %vm6857_vm9, %v2436_v36  ;;  %4305 = vmatprep.mubr.msk.bf16.mxu0 %vm6860_vm12, %v6859_v21  ;;  %vm6870_vm9 = vnez %v6712_v43  ;;  %vm6873_vm12 = vmmov %vm6868_vm2  ;;  %v2440_v43 = vsel %vm6874_vm6, %v5358_v63, 0  ;;  %v2723_v36 = vld [vmem:[%s4509_s22 + $0x118] sm:$0xff]  ;;  %v3298_v21 = vld [vmem:[%s4509_s22 + $0x22] sm:$0xff] }
  0xd1   : > { %4271 = vmatprep.mubr.msk.bf16.mxu1 %vm6861_vm7, %v2437_v55  ;;  %v6871_v16 = vsel %vm6870_vm9, %v5318_v56, 0  ;;  %vm6875_vm7 = vnez %v6734_v13  ;;  %vm6885_vm9 = vnez %v6732_v24  ;;  %v3330_v24 = vpack.c.bf16 %v3299_v18, %v3298_v21  ;;  %v3303_v21 = vld [vmem:[%s4509_s22 + $0x4a] sm:$0xff] }
  0xd2   : > { %v2441_v27 = vsel %vm6875_vm7, %v5437_v40, 0  ;;  %v6886_v9 = vsel %vm6885_vm9, %v5489_v51, 0  ;;  %vm6893_vm9 = vnez %v6765_v53  ;;  %v3302_v53 = vld [vmem:[%s4509_s22 + $0x42] sm:$0xff] }
  0xd6   : > { %v5780_v30 = vpop.f32.mrf.mxu0 }
  0xd7   : > { %4306 = vmatmul.mubr.msk.bf16.gmra.mxu0 %vm6868_vm2, %v6867_v62  ;;  %v5787_v46 = vpop.f32.mrf.mxu1  ;;  %v3003_v62 = vld [vmem:[%s4509_s22 + $0x21] sm:$0xff] }
  0xd8   : > { %4272 = vmatmul.mubr.msk.bf16.gmra.mxu1 %vm6869_vm10, %v2438_v52  ;;  %4309 = vmatprep.mubr.msk.bf16.mxu0 %vm6872_vm3, %v6871_v16  ;;  %v5795_v41 = vpop.f32.mrf.mxu0  ;;  %vm6877_vm10 = vmmov %vm6868_vm2  ;;  %v3004_v16 = vld [vmem:[%s4509_s22 + $0x29] sm:$0xff] }
  0xd9   : > { %4275 = vmatprep.mubr.msk.bf16.mxu1 %vm6873_vm12, %v2439_v1  ;;  %v5798_v4 = vpop.f32.mrf.mxu1  ;;  %vm6879_vm3 = vmmov %vm6868_vm2 }
  0xda   : > { %v5800_v33 = vpop.f32.mrf.mxu0  ;;  %vm6880_vm12 = vmmov %vm6868_vm2 }
  0xdb   : > { %v5802_v45 = vpop.f32.mrf.mxu1 }
  0xdc   : > { %v5804_v6 = vpop.f32.mrf.mxu0 }
  0xdd   : > { %v5809_v56 = vpop.f32.mrf.mxu1 }
  0xde   : > { %v5814_v25 = vpop.f32.mrf.mxu0 }
  0xdf   : > { %4310 = vmatmul.mubr.msk.bf16.gmra.mxu0 %vm6868_vm2, %v6876_v28  ;;  %v5821_v50 = vpop.f32.mrf.mxu1  ;;  %vm6882_vm2 = vnez %v6755_v8 }
  0xe0   : > { %4276 = vmatmul.mubr.msk.bf16.gmra.mxu1 %vm6877_vm10, %v2440_v43  ;;  %4313 = vmatprep.mubr.msk.bf16.mxu0 %vm6879_vm3, %v2752_v15  ;;  %v5829_v63 = vpop.f32.mrf.mxu0  ;;  %v2754_v35 = vsel %vm6882_vm2, %v5679_v2, 0  ;;  %v2411_v15 = vld [vmem:[%s4509_s22 + $0x102] sm:$0xff]  ;;  %vm6884_vm10 = vnez %v6751_v11  ;;  %vm6889_vm2 = vmmov %vm6879_vm3 }
  0xe1   : > { %4279 = vmatprep.mubr.msk.bf16.mxu1 %vm6880_vm12, %v2441_v27  ;;  %v5832_v10 = vpop.f32.mrf.mxu1  ;;  %v2443_v55 = vsel %vm6884_vm10, %v5506_v3, 0  ;;  %vm6888_vm12 = vmmov %vm6879_vm3  ;;  %v2739_v3 = vpack.c.bf16 %v2723_v36, %v2722_v7  ;;  %v5871_v1 = vpack.c.bf16 %v2412_v38, %v2411_v15  ;;  %v3035_v15 = vpack.c.bf16 %v3004_v16, %v3003_v62  ;;  %v3300_v36 = vld [vmem:[%s4509_s22 + $0x32] sm:$0xff] }
  0xe2   : > { %v5834_v32 = vpop.f32.mrf.mxu0  ;;  %vm6890_vm10 = vmmov %vm6889_vm2  ;;  %v3006_v62 = vld [vmem:[%s4509_s22 + $0x39] sm:$0xff]  ;;  %v3332_v16 = vpack.c.bf16 %v3303_v21, %v3302_v53 }
  0xe3   : > { %v5836_v40 = vpop.f32.mrf.mxu1  ;;  %v2755_v28 = vsel %vm6893_vm9, %v2739_v3, 0  ;;  %vm6899_vm9 = vmmov %vm6889_vm2  ;;  %v3304_v53 = vld [vmem:[%s4509_s22 + $0x52] sm:$0xff]  ;;  %v3305_v21 = vld [vmem:[%s4509_s22 + $0x5a] sm:$0xff] }
  0xe4   : > { %v5838_v37 = vpop.f32.mrf.mxu0  ;;  %v3333_v26 = vpack.c.bf16 %v3305_v21, %v3304_v53 }
  0xe5   : > { %v5849_v42 = vpop.f32.mrf.mxu1 }
  0xe6   : > { %6883 = vst [vmem:[#allocation2_spill] sm:$0xff] %v5849_v42  ;;  %v5857_v52 = vpop.f32.mrf.mxu0  ;;  %v3308_v42 = vld [vmem:[%s4509_s22 + $0x72] sm:$0xff] }
  0xe7   : > { %4314 = vmatmul.mubr.msk.bf16.gmra.mxu0 %vm6879_vm3, %v6886_v9  ;;  %v5864_v8 = vpop.f32.mrf.mxu1  ;;  %vm6895_vm3 = vnez %v6595_v57 }
  0xe8   : > { %6887 = vst [vmem:[#allocation4_spill] sm:$0xff] %v5864_v8  ;;  %4280 = vmatmul.mubr.msk.bf16.gmra.mxu1 %vm6888_vm12, %v2442_v17  ;;  %4317 = vmatprep.mubr.msk.bf16.mxu0 %vm6889_vm2, %v2754_v35  ;;  %v5868_v2 = vpop.f32.mrf.mxu0  ;;  %v3346_v7 = vsel %vm6895_vm3, %v3330_v24, 0  ;;  %vm6897_vm12 = vmmov %vm6889_vm2  ;;  %v3005_v24 = vld [vmem:[%s4509_s22 + $0x31] sm:$0xff] }
  0xe9   : > { %4283 = vmatprep.mubr.msk.bf16.mxu1 %vm6890_vm10, %v2443_v55  ;;  %v5873_v51 = vpop.f32.mrf.mxu1  ;;  %vm6894_vm10 = vnez %v6761_v20  ;;  %v3301_v55 = vld [vmem:[%s4509_s22 + $0x3a] sm:$0xff]  ;;  %vm6900_vm3 = vmmov %vm6889_vm2  ;;  %v3348_v20 = vsel %vm6819_vm4, %v3332_v16, 0 }
  0xea   : > { %6891 = vst [vmem:[#allocation3_spill] sm:$0xff] %v5873_v51  ;;  %v5877_v43 = vpop.f32.mrf.mxu0  ;;  %v2444_v35 = vsel %vm6894_vm10, %v5871_v1, 0  ;;  %v3331_v57 = vpack.c.bf16 %v3301_v55, %v3300_v36  ;;  %v3306_v51 = vld [vmem:[%s4509_s22 + $0x62] sm:$0xff]  ;;  %vm6906_vm4 = vmmov %vm6889_vm2  ;;  %v3010_v16 = vld [vmem:[%s4509_s22 + $0x59] sm:$0xff] }
  0xeb   : > { %v5879_v27 = vpop.f32.mrf.mxu1 }
  0xec   : > { %6892 = vst [vmem:[#allocation5_spill] sm:$0xff] %v5879_v27  ;;  %v5883_v17 = vpop.f32.mrf.mxu0  ;;  %v3347_v36 = vsel %vm6814_vm11, %v3331_v57, 0  ;;  %vm6905_vm11 = vmmov %vm6889_vm2 }
  0xed   : > { %v5892_v38 = vpop.f32.mrf.mxu1 }
  0xee   : > { %6896 = vst [vmem:[#allocation6_spill] sm:$0xff] %v5892_v38  ;;  %v5896_v18 = vpop.f32.mrf.mxu0 }
  0xef   : > { %4318 = vmatmul.mubr.msk.bf16.gmra.mxu0 %vm6897_vm12, %v2755_v28  ;;  %v5899_v9 = vpop.f32.mrf.mxu1  ;;  %v3007_v28 = vld [vmem:[%s4509_s22 + $0x41] sm:$0xff]  ;;  %vm6904_vm12 = vmmov %vm6889_vm2 }
  0xf0   : > { %6898 = vst [vmem:[#allocation8_spill] sm:$0xff] %v5899_v9  ;;  %4284 = vmatmul.mubr.msk.bf16.gmra.mxu1 %vm6889_vm2, %v2444_v35  ;;  %4357 = vmatprep.mubr.msk.bf16.mxu0 %vm6899_vm9, %v3346_v7  ;;  %v5903_v3 = vpop.f32.mrf.mxu0  ;;  %v3008_v9 = vld [vmem:[%s4509_s22 + $0x49] sm:$0xff]  ;;  %v3036_v7 = vpack.c.bf16 %v3006_v62, %v3005_v24  ;;  %v3009_v62 = vld [vmem:[%s4509_s22 + $0x51] sm:$0xff]  ;;  %vm6907_vm9 = vnez %v6830_v59 }
  0xf1   : > { %4323 = vmatprep.mubr.msk.bf16.mxu1 %vm6900_vm3, %v3035_v15  ;;  %v5908_v38 = vpop.f32.mrf.mxu1  ;;  %v3037_v15 = vpack.c.bf16 %v3008_v9, %v3007_v28 }
  0xf2   : > { %6901 = vst [vmem:[#allocation7_spill] sm:$0xff] %v5908_v38  ;;  %v5912_v27 = vpop.f32.mrf.mxu0 }
  0xf3   : > { %v5914_v35 = vpop.f32.mrf.mxu1 }
  0xf4   : > { %6902 = vst [vmem:[#allocation10_spill] sm:$0xff] %v5914_v35  ;;  %v5918_v55 = vpop.f32.mrf.mxu0  ;;  %v3307_v35 = vld [vmem:[%s4509_s22 + $0x6a] sm:$0xff] }
  0xf5   : > { %v5924_v38 = vpop.f32.mrf.mxu1  ;;  %v3334_v28 = vpack.c.bf16 %v3307_v35, %v3306_v51 }
  0xf6   : > { %6903 = vst [vmem:[#allocation9_spill] sm:$0xff] %v5924_v38  ;;  %v4155_v24 = vpop.f32.mrf.mxu0 }
  0xf7   : > { %4358 = vmatmul.mubr.msk.bf16.vlgmr.msra.gmra.mxu0 %vm6904_vm12, %v3347_v36  ;;  %v4121_v58 = vpop.f32.mrf.mxu1  ;;  %v3012_v36 = vld [vmem:[%s4509_s22 + $0x69] sm:$0xff]  ;;  %v3350_v49 = vsel %vm6907_vm9, %v3334_v28, 0  ;;  %v3013_v28 = vld [vmem:[%s4509_s22 + $0x71] sm:$0xff]  ;;  %vm6916_vm9 = vnez %v6853_v48 }
  0xf8   : > { %4324 = vmatmul.mubr.msk.bf16.vlgmr.msra.gmra.mxu1 %vm6905_vm11, %v3036_v7  ;;  %4361 = vmatprep.mubr.msk.bf16.mxu0 %vm6889_vm2, %v3348_v20  ;;  %v1218_v9 = vadd.f32 %v4121_v58, %v5780_v30  ;;  %v1616_v57 = vpop.f32.mrf.mxu0  ;;  %v3038_v30 = vpack.c.bf16 %v3010_v16, %v3009_v62  ;;  %v3039_v58 = vpack.c.bf16 %v3012_v36, %v3011_v19 }
  0xf9   : > { %4327 = vmatprep.mubr.msk.bf16.mxu1 %vm6906_vm4, %v3037_v15  ;;  %v1209_v38 = vpop.f32.mrf.mxu1  ;;  %v3349_v15 = vsel %vm6828_vm0, %v3333_v26, 0  ;;  %vm6908_vm0 = vmmov %vm6889_vm2 }
  0xfa   : > { %v5937_v8 = vadd.f32 %v4155_v24, %v1218_v9  ;;  %v1210_v20 = vadd.f32 %v1209_v38, %v5795_v41  ;;  %v4156_v7 = vpop.f32.mrf.mxu0  ;;  %v3309_v24 = vld [vmem:[%s4509_s22 + $0x7a] sm:$0xff]  ;;  %v3310_v41 = vld [vmem:[%s4509_s22 + $0x82] sm:$0xff]  ;;  %v3311_v38 = vld [vmem:[%s4509_s22 + $0x8a] sm:$0xff] }
  0xfb   : > { %v4122_v53 = vpop.f32.mrf.mxu1  ;;  %vm6909_vm3 = vmmov %vm6908_vm0  ;;  %v3335_v19 = vpack.c.bf16 %v3309_v24, %v3308_v42  ;;  %v3336_v36 = vpack.c.bf16 %v3311_v38, %v3310_v41  ;;  %v3312_v24 = vld [vmem:[%s4509_s22 + $0x92] sm:$0xff]  ;;  %v3314_v38 = vld [vmem:[%s4509_s22 + $0xa2] sm:$0xff] }
  0xfc   : > { %v5942_v21 = vadd.f32 %v1616_v57, %v1210_v20  ;;  %v1221_v51 = vadd.f32 %v4122_v53, %v5800_v33  ;;  %v1619_v35 = vpop.f32.mrf.mxu0  ;;  %vm6910_vm12 = vmmov %vm6908_vm0 }
  0xfd   : > { %v1212_v9 = vpop.f32.mrf.mxu1  ;;  %vm6911_vm11 = vmmov %vm6908_vm0 }
  0xfe   : > { %v5951_v62 = vadd.f32 %v4156_v7, %v1221_v51  ;;  %v1213_v22 = vadd.f32 %v1212_v9, %v5804_v6  ;;  %v4159_v26 = vpop.f32.mrf.mxu0  ;;  %v3014_v6 = vld [vmem:[%s4509_s22 + $0x79] sm:$0xff]  ;;  %vm6912_vm2 = vmmov %vm6908_vm0 }
  0xff   : > { %4362 = vmatmul.mubr.msk.bf16.gmra.mxu0 %vm6908_vm0, %v3349_v15  ;;  %v4125_v33 = vpop.f32.mrf.mxu1  ;;  %v3313_v9 = vld [vmem:[%s4509_s22 + $0x9a] sm:$0xff]  ;;  %vm6914_vm4 = vmmov %vm6908_vm0 }
 0x100   : > { %4328 = vmatmul.mubr.msk.bf16.gmra.mxu1 %vm6909_vm3, %v3038_v30  ;;  %4365 = vmatprep.mubr.msk.bf16.mxu0 %vm6910_vm12, %v3350_v49  ;;  %v5957_v59 = vadd.f32 %v1619_v35, %v1213_v22  ;;  %v1234_v57 = vadd.f32 %v4125_v33, %v5814_v25  ;;  %v1632_v16 = vpop.f32.mrf.mxu0  ;;  %v3040_v30 = vpack.c.bf16 %v3014_v6, %v3013_v28  ;;  %v3351_v25 = vsel %vm6840_vm14, %v3335_v19, 0  ;;  %v3315_v22 = vld [vmem:[%s4509_s22 + $0xaa] sm:$0xff]  ;;  %vm6913_vm14 = vmmov %vm6908_vm0 }
 0x101   : > { %4331 = vmatprep.mubr.msk.bf16.mxu1 %vm6911_vm11, %v3039_v58  ;;  %v1225_v20 = vpop.f32.mrf.mxu1  ;;  %v3352_v58 = vsel %vm6843_vm15, %v3336_v36, 0  ;;  %vm6915_vm15 = vmmov %vm6908_vm0 }
 0x102   : > { %v5963_v7 = vadd.f32 %v4159_v26, %v1234_v57  ;;  %v1226_v49 = vadd.f32 %v1225_v20, %v5829_v63  ;;  %v4160_v42 = vpop.f32.mrf.mxu0  ;;  %vm6918_vm3 = vmmov %vm6908_vm0 }
 0x103   : > { %v4126_v53 = vpop.f32.mrf.mxu1  ;;  %vm6919_vm12 = vmmov %vm6908_vm0 }
 0x104   : > { %v5968_v15 = vadd.f32 %v1632_v16, %v1226_v49  ;;  %v1237_v51 = vadd.f32 %v4126_v53, %v5834_v32  ;;  %v1635_v35 = vpop.f32.mrf.mxu0  ;;  %v3337_v32 = vpack.c.bf16 %v3313_v9, %v3312_v24  ;;  %vm6920_vm11 = vmmov %vm6908_vm0 }
 0x105   : > { %v1228_v41 = vpop.f32.mrf.mxu1 }
 0x106   : > { %v5977_v63 = vadd.f32 %v4160_v42, %v1237_v51  ;;  %v1229_v26 = vadd.f32 %v1228_v41, %v5838_v37  ;;  %v4163_v33 = vpop.f32.mrf.mxu0  ;;  %v3338_v37 = vpack.c.bf16 %v3315_v22, %v3314_v38  ;;  %v3353_v49 = vsel %vm6851_vm13, %v3337_v32, 0  ;;  %vm6917_vm13 = vmmov %vm6908_vm0 }
 0x107   : > { %4366 = vmatmul.mubr.msk.bf16.gmra.mxu0 %vm6912_vm2, %v3351_v25  ;;  %v4129_v61 = vpop.f32.mrf.mxu1  ;;  %v3317_v25 = vld [vmem:[%s4509_s22 + $0xba] sm:$0xff]  ;;  %vm6922_vm2 = vmmov %vm6908_vm0 }
 0x108   : > { %4332 = vmatmul.mubr.msk.bf16.gmra.mxu1 %vm6913_vm14, %v3040_v30  ;;  %4369 = vmatprep.mubr.msk.bf16.mxu0 %vm6914_vm4, %v3352_v58  ;;  %v5983_v12 = vadd.f32 %v1635_v35, %v1229_v26  ;;  %v1250_v19 = vadd.f32 %v4129_v61, %v5857_v52  ;;  %v1648_v57 = vpop.f32.mrf.mxu0  ;;  %v3316_v30 = vld [vmem:[%s4509_s22 + $0xb2] sm:$0xff]  ;;  %v3318_v35 = vld [vmem:[%s4509_s22 + $0xc2] sm:$0xff]  ;;  %v3319_v58 = vld [vmem:[%s4509_s22 + $0xca] sm:$0xff] }
 0x109   : > { %4335 = vmatprep.mubr.msk.bf16.mxu1 %vm6915_vm15, %v5595_v14  ;;  %v1241_v16 = vpop.f32.mrf.mxu1  ;;  %v3354_v14 = vsel %vm6916_vm9, %v3338_v37, 0  ;;  %v3339_v48 = vpack.c.bf16 %v3317_v25, %v3316_v30  ;;  %v3320_v37 = vld [vmem:[%s4509_s22 + $0xd2] sm:$0xff]  ;;  %vm6924_vm14 = vmmov %vm6908_vm0  ;;  %vm6928_vm15 = vnez %v6751_v11 }
 0x10a   : > { %v5988_v28 = vadd.f32 %v4163_v33, %v1250_v19  ;;  %v1242_v6 = vadd.f32 %v1241_v16, %v5868_v2  ;;  %v4164_v36 = vpop.f32.mrf.mxu0  ;;  %v3321_v16 = vld [vmem:[%s4509_s22 + $0xda] sm:$0xff]  ;;  %vm6926_vm4 = vmmov %vm6908_vm0 }
 0x10b   : > { %v4130_v20 = vpop.f32.mrf.mxu1  ;;  %v3355_v32 = vsel %vm6864_vm1, %v3339_v48, 0  ;;  %vm6921_vm1 = vmmov %vm6908_vm0  ;;  %v3341_v54 = vpack.c.bf16 %v3321_v16, %v3320_v37  ;;  %v3325_v48 = vld [vmem:[%s4509_s22 + $0xfa] sm:$0xff] }
 0x10c   : > { %v5993_v42 = vadd.f32 %v1648_v57, %v1242_v6  ;;  %v1253_v52 = vadd.f32 %v4130_v20, %v5877_v43  ;;  %v1651_v53 = vpop.f32.mrf.mxu0  ;;  %v3323_v20 = vld [vmem:[%s4509_s22 + $0xea] sm:$0xff]  ;;  %v3329_v16 = vld [vmem:[%s4509_s22 + $0x11a] sm:$0xff]  ;;  %vm6932_vm9 = vmmov %vm6908_vm0 }
 0x10d   : > { %v1244_v51 = vpop.f32.mrf.mxu1 }
 0x10e   : > { %v6002_v24 = vadd.f32 %v4164_v36, %v1253_v52  ;;  %v1245_v2 = vadd.f32 %v1244_v51, %v5883_v17  ;;  %v3340_v17 = vpack.c.bf16 %v3319_v58, %v3318_v35  ;;  %v3322_v36 = vld [vmem:[%s4509_s22 + $0xe2] sm:$0xff]  ;;  %v3357_v58 = vsel %vm6874_vm6, %v3341_v54, 0  ;;  %vm6925_vm6 = vmmov %vm6908_vm0 }
 0x10f   : > { %v4167_v9 = vpop.f32.mrf.mxu0  ;;  %4370 = vmatmul.mubr.msk.bf16.gmra.mxu0 %vm6908_vm0, %v3353_v49 }
 0x110   : > { %v4133_v60 = vpop.f32.mrf.mxu1  ;;  %4336 = vmatmul.mubr.msk.bf16.gmra.mxu1 %vm6917_vm13, %v5597_v23  ;;  %4373 = vmatprep.mubr.msk.bf16.mxu0 %vm6918_vm3, %v3354_v14  ;;  %v6009_v43 = vadd.f32 %v1651_v53, %v1245_v2  ;;  %vm6935_vm13 = vmmov %vm6908_vm0 }
 0x111   : > { %v1266_v41 = vadd.f32 %v4133_v60, %v5896_v18  ;;  %v1664_v38 = vpop.f32.mrf.mxu0  ;;  %4339 = vmatprep.mubr.msk.bf16.mxu1 %vm6919_vm12, %v5616_v39  ;;  %v3356_v39 = vsel %vm6866_vm8, %v3340_v17, 0  ;;  %vm6923_vm8 = vmmov %vm6908_vm0 }
 0x112   : > { %v1257_v22 = vpop.f32.mrf.mxu1  ;;  %vm6940_vm3 = vmmov %vm6908_vm0 }
 0x113   : > { %v6014_v26 = vadd.f32 %v4167_v9, %v1266_v41  ;;  %v1258_v23 = vadd.f32 %v1257_v22, %v5903_v3  ;;  %v4168_v33 = vpop.f32.mrf.mxu0  ;;  %vm6941_vm12 = vmmov %vm6908_vm0 }
 0x114   : > { %v4134_v61 = vpop.f32.mrf.mxu1 }
 0x115   : > { %v6019_v19 = vadd.f32 %v1664_v38, %v1258_v23  ;;  %v1269_v18 = vadd.f32 %v4134_v61, %v5912_v27  ;;  %v1667_v57 = vpop.f32.mrf.mxu0 }
 0x116   : > { %v1260_v6 = vpop.f32.mrf.mxu1 }
 0x117   : > { %v6028_v49 = vadd.f32 %v4168_v33, %v1269_v18  ;;  %v1261_v3 = vadd.f32 %v1260_v6, %v5918_v55  ;;  %v4171_v52 = vpop.f32.mrf.mxu0  ;;  %4374 = vmatmul.mubr.msk.bf16.gmra.mxu0 %vm6920_vm11, %v3355_v32  ;;  %v3342_v55 = vpack.c.bf16 %v3323_v20, %v3322_v36  ;;  %v6929_v36 = vld [vmem:[#allocation2_spill] sm:$0xff] }
 0x118   : > { %v4137_v34 = vpop.f32.mrf.mxu1  ;;  %4340 = vmatmul.mubr.msk.bf16.gmra.mxu1 %vm6921_vm1, %v5618_v31  ;;  %4377 = vmatprep.mubr.msk.bf16.mxu0 %vm6922_vm2, %v3356_v39 }
 0x119   : > { %v6035_v27 = vadd.f32 %v1667_v57, %v1261_v3  ;;  %v1282_v53 = vadd.f32 %v4137_v34, %v5787_v46  ;;  %v1680_v14 = vpop.f32.mrf.mxu0  ;;  %4343 = vmatprep.mubr.msk.bf16.mxu1 %vm6923_vm8, %v5637_v44  ;;  %v3358_v60 = vsel %vm6875_vm7, %v3342_v55, 0  ;;  %v3324_v44 = vld [vmem:[%s4509_s22 + $0xf2] sm:$0xff]  ;;  %vm6927_vm7 = vmmov %vm6908_vm0 }
 0x11a   : > { %v1273_v30 = vpop.f32.mrf.mxu1  ;;  %v3034_v55 = vld [vmem:[%s4509_s22 + $0x119] sm:$0xff] }
 0x11b   : > { %v6040_v25 = vadd.f32 %v4171_v52, %v1282_v53  ;;  %v1274_v51 = vadd.f32 %v1273_v30, %v5798_v4  ;;  %v4172_v31 = vpop.f32.mrf.mxu0  ;;  %v6931_v52 = vld [vmem:[#allocation21_spill] sm:$0xff]  ;;  %v6934_v53 = vld [vmem:[#allocation22_spill] sm:$0xff] }
 0x11c   : > { %v4138_v35 = vpop.f32.mrf.mxu1 }
 0x11d   : > { %v6045_v2 = vadd.f32 %v1680_v14, %v1274_v51  ;;  %v1285_v9 = vadd.f32 %v4138_v35, %v5802_v45  ;;  %v1683_v46 = vpop.f32.mrf.mxu0  ;;  %v3343_v45 = vpack.c.bf16 %v3325_v48, %v3324_v44  ;;  %v3033_v14 = vld [vmem:[%s4509_s22 + $0x111] sm:$0xff] }
 0x11e   : > { %v1276_v41 = vpop.f32.mrf.mxu1 }
 0x11f   : > { %v6052_v38 = vadd.f32 %v4172_v31, %v1285_v9  ;;  %v1277_v4 = vadd.f32 %v1276_v41, %v5809_v56  ;;  %v4175_v17 = vpop.f32.mrf.mxu0  ;;  %4378 = vmatmul.mubr.msk.bf16.gmra.mxu0 %vm6924_vm14, %v3357_v58  ;;  %v3359_v18 = vsel %vm6881_vm5, %v3343_v45, 0  ;;  %vm6930_vm5 = vmmov %vm6908_vm0  ;;  %v6936_v31 = vld [vmem:[#allocation3_spill] sm:$0xff]  ;;  %v6938_v41 = vld [vmem:[#allocation5_spill] sm:$0xff] }
 0x120   : > { %v4141_v29 = vpop.f32.mrf.mxu1  ;;  %4344 = vmatmul.mubr.msk.bf16.gmra.mxu1 %vm6925_vm6, %v5639_v5  ;;  %4381 = vmatprep.mubr.msk.bf16.mxu0 %vm6926_vm4, %v3358_v60 }
 0x121   : > { %v6059_v13 = vadd.f32 %v1683_v46, %v1277_v4  ;;  %v1298_v22 = vadd.f32 %v4141_v29, %v5821_v50  ;;  %v1696_v23 = vpop.f32.mrf.mxu0  ;;  %4347 = vmatprep.mubr.msk.bf16.mxu1 %vm6927_vm7, %v5658_v47  ;;  %v3360_v50 = vsel %vm6928_vm15, %v5871_v1, 0  ;;  %v3328_v47 = vld [vmem:[%s4509_s22 + $0x112] sm:$0xff]  ;;  %v3050_v46 = vpack.c.bf16 %v3034_v55, %v3033_v14 }
 0x122   : > { %v1289_v56 = vpop.f32.mrf.mxu1  ;;  %v3345_v11 = vpack.c.bf16 %v3329_v16, %v3328_v47  ;;  %v6933_v1 = vld [vmem:[#allocation4_spill] sm:$0xff]  ;;  %v6943_v47 = vld [vmem:[#allocation7_spill] sm:$0xff] }
 0x123   : > { %v6064_v33 = vadd.f32 %v4175_v17, %v1298_v22  ;;  %v1290_v61 = vadd.f32 %v1289_v56, %v5832_v10  ;;  %v4176_v32 = vpop.f32.mrf.mxu0  ;;  %v6939_v22 = vld [vmem:[#allocation6_spill] sm:$0xff] }
 0x124   : > { %v4142_v5 = vpop.f32.mrf.mxu1  ;;  %v3361_v44 = vsel %vm6894_vm10, %v3345_v11, 0 }
 0x125   : > { %v6069_v57 = vadd.f32 %v1696_v23, %v1290_v61  ;;  %v1301_v39 = vadd.f32 %v4142_v5, %v5836_v40  ;;  %v1699_v37 = vpop.f32.mrf.mxu0  ;;  %v6942_v5 = vld [vmem:[#allocation8_spill] sm:$0xff] }
 0x126   : > { %v1292_v6 = vpop.f32.mrf.mxu1 }
 0x127   : > { %v6077_v10 = vadd.f32 %v4176_v32, %v1301_v39  ;;  %v1293_v20 = vadd.f32 %v1292_v6, %v6929_v36  ;;  %v4179_v0 = vpop.f32.mrf.mxu0  ;;  %4382 = vmatmul.mubr.msk.bf16.gmra.mxu0 %vm6930_vm5, %v3359_v18 }
 0x128   : > { %v4145_v3 = vpop.f32.mrf.mxu1  ;;  %4348 = vmatmul.mubr.msk.bf16.gmra.mxu1 %vm6932_vm9, %v6931_v52  ;;  %4385 = vmatprep.mubr.msk.bf16.mxu0 %vm6908_vm0, %v3360_v50 }
 0x129   : > { %v6084_v40 = vadd.f32 %v1699_v37, %v1293_v20  ;;  %v1314_v34 = vadd.f32 %v4145_v3, %v6933_v1  ;;  %v1712_v54 = vpop.f32.mrf.mxu0  ;;  %4351 = vmatprep.mubr.msk.bf16.mxu1 %vm6935_vm13, %v6934_v53 }
 0x12a   : > { %v1305_v30 = vpop.f32.mrf.mxu1 }
 0x12b   : > { %v6091_v51 = vadd.f32 %v4179_v0, %v1314_v34  ;;  %v1306_v35 = vadd.f32 %v1305_v30, %v6936_v31  ;;  %v4180_v58 = vpop.f32.mrf.mxu0  ;;  %v6944_v0 = vld [vmem:[#allocation10_spill] sm:$0xff]  ;;  %v6945_v34 = vld [vmem:[#allocation9_spill] sm:$0xff] }
 0x12c   : > { %v4146_v9 = vpop.f32.mrf.mxu1 }
 0x12d   : > { %v6096_v48 = vadd.f32 %v1712_v54, %v1306_v35  ;;  %v1317_v4 = vadd.f32 %v4146_v9, %v6938_v41  ;;  %v1715_v17 = vpop.f32.mrf.mxu0 }
 0x12e   : > { %v1308_v29 = vpop.f32.mrf.mxu1 }
 0x12f   : > { %v6099_v45 = vadd.f32 %v4180_v58, %v1317_v4  ;;  %v1309_v23 = vadd.f32 %v1308_v29, %v6939_v22  ;;  %v4183_v56 = vpop.f32.mrf.mxu0  ;;  %4386 = vmatmul.mubr.msk.bf16.gmra.mxu0 %vm6940_vm3, %v3361_v44 }
 0x130   : > { %v4149_v61 = vpop.f32.mrf.mxu1  ;;  %4352 = vmatmul.mubr.msk.bf16.gmra.mxu1 %vm6941_vm12, %v3050_v46 }
 0x131   : > { %v6104_v32 = vadd.f32 %v1715_v17, %v1309_v23  ;;  %v1330_v18 = vadd.f32 %v4149_v61, %v6942_v5  ;;  %v1728_v39 = vpop.f32.mrf.mxu0 }
 0x132   : > { %v1321_v37 = vpop.f32.mrf.mxu1 }
 0x133   : > { %v6107_v50 = vadd.f32 %v4183_v56, %v1330_v18  ;;  %v1322_v16 = vadd.f32 %v1321_v37, %v6943_v47  ;;  %v4184_v6 = vpop.f32.mrf.mxu0 }
 0x134   : > { %v4150_v36 = vpop.f32.mrf.mxu1 }
 0x135   : > { %v6110_v20 = vadd.f32 %v1728_v39, %v1322_v16  ;;  %v1333_v3 = vadd.f32 %v4150_v36, %v6944_v0  ;;  %v1731_v52 = vpop.f32.mrf.mxu0 }
 0x136   : > { %v1324_v11 = vpop.f32.mrf.mxu1 }
 0x137   : > { %v6113_v1 = vadd.f32 %v4184_v6, %v1333_v3  ;;  %v1325_v54 = vadd.f32 %v1324_v11, %v6945_v34  ;;  %v4223_v53 = vpop.f32.mrf.mxu0 }
 0x138   : > { %v4189_v14 = vpop.f32.mrf.mxu1 }
 0x139   : > { %v6116_v55 = vadd.f32 %v1731_v52, %v1325_v54  ;;  %v2056_v30 = vadd.f32 %v4189_v14, %v5937_v8  ;;  %v2222_v31 = vpop.f32.mrf.mxu0 }
 0x13a   : > { %v1927_v35 = vpop.f32.mrf.mxu1 }
 0x13b   : > { %v6119_v58 = vadd.f32 %v4223_v53, %v2056_v30  ;;  %v2054_v9 = vadd.f32 %v1927_v35, %v5942_v21  ;;  %v4224_v46 = vpop.f32.mrf.mxu0 }
 0x13c   : > { %v4190_v60 = vpop.f32.mrf.mxu1 }
 0x13d   : > { %v6122_v44 = vadd.f32 %v2222_v31, %v2054_v9  ;;  %v2057_v41 = vadd.f32 %v4190_v60, %v5951_v62  ;;  %v2225_v4 = vpop.f32.mrf.mxu0 }
 0x13e   : > { %v1930_v17 = vpop.f32.mrf.mxu1 }
 0x13f   : > { %v6125_v29 = vadd.f32 %v4224_v46, %v2057_v41  ;;  %v2055_v22 = vadd.f32 %v1930_v17, %v5957_v59  ;;  %v4227_v23 = vpop.f32.mrf.mxu0 }
 0x140   : > { %v4193_v8 = vpop.f32.mrf.mxu1 }
 0x141   : > { %v6128_v56 = vadd.f32 %v2225_v4, %v2055_v22  ;;  %v2060_v61 = vadd.f32 %v4193_v8, %v5963_v7  ;;  %v2238_v5 = vpop.f32.mrf.mxu0 }
 0x142   : > { %v1943_v21 = vpop.f32.mrf.mxu1 }
 0x143   : > { %v6131_v18 = vadd.f32 %v4227_v23, %v2060_v61  ;;  %v2058_v39 = vadd.f32 %v1943_v21, %v5968_v15  ;;  %v4228_v37 = vpop.f32.mrf.mxu0 }
 0x144   : > { %v4194_v62 = vpop.f32.mrf.mxu1 }
 0x145   : > { %v6134_v47 = vadd.f32 %v2238_v5, %v2058_v39  ;;  %v2061_v16 = vadd.f32 %v4194_v62, %v5977_v63  ;;  %v2241_v6 = vpop.f32.mrf.mxu0 }
 0x146   : > { %v1946_v59 = vpop.f32.mrf.mxu1 }
 0x147   : > { %v6137_v36 = vadd.f32 %v4228_v37, %v2061_v16  ;;  %v2059_v0 = vadd.f32 %v1946_v59, %v5983_v12  ;;  %v4231_v3 = vpop.f32.mrf.mxu0 }
 0x148   : > { %v4197_v7 = vpop.f32.mrf.mxu1 }
 0x149   : > { %v6140_v52 = vadd.f32 %v2241_v6, %v2059_v0  ;;  %v2064_v11 = vadd.f32 %v4197_v7, %v5988_v28  ;;  %v2254_v34 = vpop.f32.mrf.mxu0 }
 0x14a   : > { %v1959_v15 = vpop.f32.mrf.mxu1 }
 0x14b   : > { %v6143_v54 = vadd.f32 %v4231_v3, %v2064_v11  ;;  %v2062_v53 = vadd.f32 %v1959_v15, %v5993_v42  ;;  %v4232_v14 = vpop.f32.mrf.mxu0 }
 0x14c   : > { %v4198_v63 = vpop.f32.mrf.mxu1 }
 0x14d   : > { %v6146_v30 = vadd.f32 %v2254_v34, %v2062_v53  ;;  %v2065_v31 = vadd.f32 %v4198_v63, %v6002_v24  ;;  %v2257_v35 = vpop.f32.mrf.mxu0 }
 0x14e   : > { %v1962_v12 = vpop.f32.mrf.mxu1 }
 0x14f   : > { %v6149_v9 = vadd.f32 %v4232_v14, %v2065_v31  ;;  %v2063_v46 = vadd.f32 %v1962_v12, %v6009_v43  ;;  %v4235_v60 = vpop.f32.mrf.mxu0 }
 0x150   : > { %v4201_v28 = vpop.f32.mrf.mxu1 }
 0x151   : > { %v6152_v41 = vadd.f32 %v2257_v35, %v2063_v46  ;;  %v2068_v4 = vadd.f32 %v4201_v28, %v6014_v26  ;;  %v2270_v17 = vpop.f32.mrf.mxu0 }
 0x152   : > { %v1975_v42 = vpop.f32.mrf.mxu1 }
 0x153   : > { %v6155_v22 = vadd.f32 %v4235_v60, %v2068_v4  ;;  %v2066_v23 = vadd.f32 %v1975_v42, %v6019_v19  ;;  %v4236_v8 = vpop.f32.mrf.mxu0 }
 0x154   : > { %v4202_v24 = vpop.f32.mrf.mxu1 }
 0x155   : > { %v6158_v61 = vadd.f32 %v2270_v17, %v2066_v23  ;;  %v2069_v5 = vadd.f32 %v4202_v24, %v6028_v49  ;;  %v2273_v21 = vpop.f32.mrf.mxu0 }
 0x156   : > { %v1978_v43 = vpop.f32.mrf.mxu1 }
 0x157   : > { %v6161_v39 = vadd.f32 %v4236_v8, %v2069_v5  ;;  %v2067_v37 = vadd.f32 %v1978_v43, %v6035_v27  ;;  %v4239_v62 = vpop.f32.mrf.mxu0 }
 0x158   : > { %v4205_v26 = vpop.f32.mrf.mxu1 }
 0x159   : > { %v6164_v16 = vadd.f32 %v2273_v21, %v2067_v37  ;;  %v2072_v6 = vadd.f32 %v4205_v26, %v6040_v25  ;;  %v2286_v59 = vpop.f32.mrf.mxu0 }
 0x15a   : > { %v1991_v19 = vpop.f32.mrf.mxu1 }
 0x15b   : > { %v6167_v0 = vadd.f32 %v4239_v62, %v2072_v6  ;;  %v2070_v3 = vadd.f32 %v1991_v19, %v6045_v2  ;;  %v4240_v7 = vpop.f32.mrf.mxu0 }
 0x15c   : > { %v4206_v49 = vpop.f32.mrf.mxu1 }
 0x15d   : > { %v6170_v11 = vadd.f32 %v2286_v59, %v2070_v3  ;;  %v2073_v34 = vadd.f32 %v4206_v49, %v6052_v38  ;;  %v2289_v15 = vpop.f32.mrf.mxu0 }
 0x15e   : > { %v1994_v27 = vpop.f32.mrf.mxu1 }
 0x15f   : > { %v6173_v53 = vadd.f32 %v4240_v7, %v2073_v34  ;;  %v2071_v14 = vadd.f32 %v1994_v27, %v6059_v13  ;;  %v4243_v63 = vpop.f32.mrf.mxu0 }
 0x160   : > { %v4209_v25 = vpop.f32.mrf.mxu1 }
 0x161   : > { %6946 = vst [vmem:[#allocation12_spill] sm:$0xff] %v6173_v53  ;;  %v6176_v31 = vadd.f32 %v2289_v15, %v2071_v14  ;;  %v2076_v35 = vadd.f32 %v4209_v25, %v6064_v33  ;;  %v2302_v12 = vpop.f32.mrf.mxu0 }
 0x162   : > { %v2007_v2 = vpop.f32.mrf.mxu1 }
 0x163   : > { %6947 = vst [vmem:[#allocation11_spill] sm:$0xff] %v6176_v31  ;;  %v6179_v46 = vadd.f32 %v4243_v63, %v2076_v35  ;;  %v2074_v60 = vadd.f32 %v2007_v2, %v6069_v57  ;;  %v4244_v28 = vpop.f32.mrf.mxu0 }
 0x164   : > { %v4210_v38 = vpop.f32.mrf.mxu1 }
 0x165   : > { %6948 = vst [vmem:[#allocation13_spill] sm:$0xff] %v6179_v46  ;;  %v6182_v4 = vadd.f32 %v2302_v12, %v2074_v60  ;;  %v2077_v17 = vadd.f32 %v4210_v38, %v6077_v10  ;;  %v2305_v42 = vpop.f32.mrf.mxu0 }
 0x166   : > { %v2010_v13 = vpop.f32.mrf.mxu1 }
 0x167   : > { %6949 = vst [vmem:[#allocation14_spill] sm:$0xff] %v6182_v4  ;;  %v6185_v23 = vadd.f32 %v4244_v28, %v2077_v17  ;;  %v2075_v8 = vadd.f32 %v2010_v13, %v6084_v40  ;;  %v4247_v24 = vpop.f32.mrf.mxu0 }
 0x168   : > { %v4213_v33 = vpop.f32.mrf.mxu1 }
 0x169   : > { %6950 = vst [vmem:[#allocation16_spill] sm:$0xff] %v6185_v23  ;;  %v6188_v5 = vadd.f32 %v2305_v42, %v2075_v8  ;;  %v2080_v21 = vadd.f32 %v4213_v33, %v6091_v51  ;;  %v2318_v43 = vpop.f32.mrf.mxu0 }
 0x16a   : > { %v2023_v57 = vpop.f32.mrf.mxu1 }
 0x16b   : > { %6951 = vst [vmem:[#allocation15_spill] sm:$0xff] %v6188_v5  ;;  %v6191_v37 = vadd.f32 %v4247_v24, %v2080_v21  ;;  %v2078_v62 = vadd.f32 %v2023_v57, %v6096_v48  ;;  %v4248_v26 = vpop.f32.mrf.mxu0 }
 0x16c   : > { %v4214_v10 = vpop.f32.mrf.mxu1 }
 0x16d   : > { %6952 = vst [vmem:[#allocation17_spill] sm:$0xff] %v6191_v37  ;;  %v6194_v6 = vadd.f32 %v2318_v43, %v2078_v62  ;;  %v2081_v59 = vadd.f32 %v4214_v10, %v6099_v45  ;;  %v2321_v19 = vpop.f32.mrf.mxu0 }
 0x16e   : > { %v2026_v40 = vpop.f32.mrf.mxu1 }
 0x16f   : > { %6953 = vst [vmem:[#allocation18_spill] sm:$0xff] %v6194_v6  ;;  %v6197_v3 = vadd.f32 %v4248_v26, %v2081_v59  ;;  %v2079_v7 = vadd.f32 %v2026_v40, %v6104_v32  ;;  %v4251_v49 = vpop.f32.mrf.mxu0 }
 0x170   : > { %v4217_v51 = vpop.f32.mrf.mxu1 }
 0x171   : > { %6954 = vst [vmem:[#allocation19_spill] sm:$0xff] %v6197_v3  ;;  %v6200_v34 = vadd.f32 %v2321_v19, %v2079_v7  ;;  %v2084_v15 = vadd.f32 %v4217_v51, %v6107_v50  ;;  %v2334_v27 = vpop.f32.mrf.mxu0 }
 0x172   : > { %v2039_v48 = vpop.f32.mrf.mxu1 }
 0x173   : > { %6955 = vst [vmem:[#allocation2_spill] sm:$0xff] %v6200_v34  ;;  %v6203_v14 = vadd.f32 %v4251_v49, %v2084_v15  ;;  %v2082_v63 = vadd.f32 %v2039_v48, %v6110_v20  ;;  %v4252_v25 = vpop.f32.mrf.mxu0 }
 0x174   : > { %v4218_v45 = vpop.f32.mrf.mxu1 }
 0x175   : > { %6956 = vst [vmem:[#allocation21_spill] sm:$0xff] %v6203_v14  ;;  %v6206_v35 = vadd.f32 %v2334_v27, %v2082_v63  ;;  %v2085_v12 = vadd.f32 %v4218_v45, %v6113_v1  ;;  %v2337_v2 = vpop.f32.mrf.mxu0 }
 0x176   : > { %v2042_v32 = vpop.f32.mrf.mxu1 }
 0x177   : > { %6957 = vst [vmem:[#allocation4_spill] sm:$0xff] %v6206_v35  ;;  %v6209_v60 = vadd.f32 %v4252_v25, %v2085_v12  ;;  %v2083_v28 = vadd.f32 %v2042_v32, %v6116_v55  ;;  %v6212_v38 = vpop.f32.mrf.mxu0 }
 0x178   : > { %v4257_v50 = vpop.f32.mrf.mxu1 }
 0x179   : > { %6958 = vst [vmem:[#allocation22_spill] sm:$0xff] %v6209_v60  ;;  %v6214_v17 = vadd.f32 %v2337_v2, %v2083_v28  ;;  %v6216_v42 = vpop.f32.mrf.mxu0 }
 0x17a   : > { %v2533_v20 = vpop.f32.mrf.mxu1 }
 0x17b   : > { %6959 = vst [vmem:[#allocation3_spill] sm:$0xff] %v6214_v17  ;;  %v6218_v13 = vpop.f32.mrf.mxu0 }
 0x17c   : > { %v4258_v8 = vpop.f32.mrf.mxu1 }
 0x17d   : > { %v6220_v24 = vpop.f32.mrf.mxu0 }
 0x17e   : > { %v6222_v1 = vpop.f32.mrf.mxu1 }
 0x17f   : > { %v6224_v33 = vpop.f32.mrf.mxu0 }
 0x180   : > { %v6226_v21 = vpop.f32.mrf.mxu1 }
 0x181   : > { %v6228_v55 = vpop.f32.mrf.mxu0 }
 0x182   : > { %v6230_v43 = vpop.f32.mrf.mxu1 }
 0x183   : > { %v6232_v57 = vpop.f32.mrf.mxu0 }
 0x184   : > { %v6234_v62 = vpop.f32.mrf.mxu1 }
 0x185   : > { %v6236_v26 = vpop.f32.mrf.mxu0 }
 0x186   : > { %v6238_v10 = vpop.f32.mrf.mxu1 }
 0x187   : > { %v6240_v59 = vpop.f32.mrf.mxu0 }
 0x188   : > { %v6242_v19 = vpop.f32.mrf.mxu1 }
 0x189   : > { %v6244_v40 = vpop.f32.mrf.mxu0 }
 0x18a   : > { %v6246_v7 = vpop.f32.mrf.mxu1 }
 0x18b   : > { %v6248_v49 = vpop.f32.mrf.mxu0 }
 0x18c   : > { %v6250_v51 = vpop.f32.mrf.mxu1 }
 0x18d   : > { %v6252_v15 = vpop.f32.mrf.mxu0 }
 0x18e   : > { %v6254_v27 = vpop.f32.mrf.mxu1 }
 0x18f   : > { %v6256_v48 = vpop.f32.mrf.mxu0 }
 0x190   : > { %v6258_v63 = vpop.f32.mrf.mxu1 }
 0x191   : > { %v6260_v25 = vpop.f32.mrf.mxu0 }
 0x192   : > { %v6262_v45 = vpop.f32.mrf.mxu1 }
 0x193   : > { %v6264_v12 = vpop.f32.mrf.mxu0 }
 0x194   : > { %v6266_v2 = vpop.f32.mrf.mxu1 }
 0x195   : > { %v6268_v32 = vpop.f32.mrf.mxu0 }
 0x196   : > { %v6270_v28 = vpop.f32.mrf.mxu1 }
 0x197   : > { %v6272_v17 = vpop.f32.mrf.mxu0 }
 0x198   : > { %v6274_v60 = vpop.f32.mrf.mxu1 }
 0x199   : > { %v6276_v35 = vpop.f32.mrf.mxu0 }
 0x19a   : > { %6960 = vst [vmem:[#allocation20_spill] sm:$0xff] %v6276_v35  ;;  %v6278_v14 = vpop.f32.mrf.mxu1 }
 0x19b   : > { %v6280_v34 = vpop.f32.mrf.mxu0 }
 0x19c   : > { %6961 = vst [vmem:[#allocation5_spill] sm:$0xff] %v6280_v34  ;;  %v6282_v3 = vpop.f32.mrf.mxu1 }
 0x19d   : > { %6962 = vst [vmem:[#allocation6_spill] sm:$0xff] %v6282_v3  ;;  %v6284_v6 = vpop.f32.mrf.mxu0 }
 0x19e   : > { %6963 = vst [vmem:[#allocation8_spill] sm:$0xff] %v6284_v6  ;;  %v6286_v37 = vpop.f32.mrf.mxu1 }
 0x19f   : > { %6964 = vst [vmem:[#allocation7_spill] sm:$0xff] %v6286_v37  ;;  %v6288_v5 = vpop.f32.mrf.mxu0 }
 0x1a0   : > { %6965 = vst [vmem:[#allocation10_spill] sm:$0xff] %v6288_v5  ;;  %v6290_v23 = vpop.f32.mrf.mxu1 }
 0x1a1   : > { %6966 = vst [vmem:[#allocation9_spill] sm:$0xff] %v6290_v23  ;;  %v6292_v4 = vpop.f32.mrf.mxu0 }
 0x1a2   : > { %6967 = vst [vmem:[#allocation23_spill] sm:$0xff] %v6292_v4  ;;  %v6294_v46 = vpop.f32.mrf.mxu1 }
 0x1a3   : > { %6968 = vst [vmem:[#allocation24_spill] sm:$0xff] %v6294_v46  ;;  %v6296_v31 = vpop.f32.mrf.mxu0 }
 0x1a4   : > { %6969 = vst [vmem:[#allocation25_spill] sm:$0xff] %v6296_v31  ;;  %v6298_v35 = vpop.f32.mrf.mxu1 }
 0x1a5   : > { %6970 = vst [vmem:[#allocation26_spill] sm:$0xff] %v6298_v35  ;;  %v6300_v53 = vpop.f32.mrf.mxu0 }
 0x1a6   : > { %6971 = vst [vmem:[#allocation27_spill] sm:$0xff] %v6300_v53  ;;  %v6302_v34 = vpop.f32.mrf.mxu1 }
 0x1a7   : > { %6972 = vst [vmem:[#allocation28_spill] sm:$0xff] %v6302_v34  ;;  %v6304_v3 = vpop.f32.mrf.mxu0 }
 0x1a8   : > { %6973 = vst [vmem:[#allocation29_spill] sm:$0xff] %v6304_v3  ;;  %v6306_v6 = vpop.f32.mrf.mxu1 }
 0x1a9   : > { %6974 = vst [vmem:[#allocation30_spill] sm:$0xff] %v6306_v6  ;;  %v6308_v37 = vpop.f32.mrf.mxu0 }
 0x1aa   : > { %6975 = vst [vmem:[#allocation31_spill] sm:$0xff] %v6308_v37  ;;  %v6310_v5 = vpop.f32.mrf.mxu1  ;;  %v2662_v37 = vadd.f32 %v4257_v50, %v6119_v58  ;;  %v2661_v58 = vadd.f32 %v6222_v1, %v6128_v56 }
 0x1ab   : > { %6976 = vst [vmem:[#allocation32_spill] sm:$0xff] %v6310_v5  ;;  %v6312_v23 = vpop.f32.mrf.mxu0 }
 0x1ac   : > { %6977 = vst [vmem:[#allocation33_spill] sm:$0xff] %v6312_v23  ;;  %v6314_v4 = vpop.f32.mrf.mxu1  ;;  %v2972_v56 = vadd.f32 %v6220_v24, %v2661_v58 }
 0x1ad   : > { %6978 = vst [vmem:[#allocation34_spill] sm:$0xff] %v6314_v4  ;;  %v6316_v31 = vpop.f32.mrf.mxu0  ;;  %v2660_v4 = vadd.f32 %v2533_v20, %v6122_v44 }
 0x1ae   : > { %6979 = vst [vmem:[#allocation35_spill] sm:$0xff] %v6316_v31  ;;  %v6318_v35 = vpop.f32.mrf.mxu1 }
 0x1af   : > { %6980 = vst [vmem:[#allocation36_spill] sm:$0xff] %v6318_v35  ;;  %v6320_v53 = vpop.f32.mrf.mxu0 }
 0x1b0   : > { %6981 = vst [vmem:[#allocation37_spill] sm:$0xff] %v6320_v53  ;;  %v6322_v34 = vpop.f32.mrf.mxu1  ;;  %v2973_v53 = vadd.f32 %v6212_v38, %v2662_v37  ;;  %v2666_v37 = vadd.f32 %v6226_v21, %v6131_v18  ;;  %v2667_v18 = vadd.f32 %v6234_v62, %v6137_v36  ;;  %v2670_v36 = vadd.f32 %v6242_v19, %v6143_v54 }
 0x1b1   : > { %6982 = vst [vmem:[#allocation38_spill] sm:$0xff] %v6322_v34  ;;  %v6324_v3 = vpop.f32.mrf.mxu0  ;;  %v2663_v34 = vadd.f32 %v4258_v8, %v6125_v29  ;;  %v2671_v54 = vadd.f32 %v6250_v51, %v6149_v9  ;;  %v2674_v9 = vadd.f32 %v6258_v63, %v6155_v22  ;;  %v2675_v22 = vadd.f32 %v6266_v2, %v6161_v39 }
 0x1b2   : > { %6983 = vst [vmem:[#allocation39_spill] sm:$0xff] %v6324_v3  ;;  %v6326_v6 = vpop.f32.mrf.mxu1  ;;  %v2678_v39 = vadd.f32 %v6274_v60, %v6167_v0  ;;  %v6988_v0 = vld [vmem:[#allocation6_spill] sm:$0xff] }
 0x1b3   : > { %6984 = vst [vmem:[#allocation40_spill] sm:$0xff] %v6326_v6  ;;  %v6329_v5 = vpop.f32.mrf.mxu0  ;;  %v2971_v6 = vadd.f32 %v6216_v42, %v2660_v4  ;;  %v2974_v29 = vadd.f32 %v6218_v13, %v2663_v34  ;;  %v2977_v34 = vadd.f32 %v6224_v33, %v2666_v37 }
 0x1b4   : > { %6985 = vst [vmem:[#allocation41_spill] sm:$0xff] %v6329_v5  ;;  %v6331_v23 = vpop.f32.mrf.mxu1 }
 0x1b5   : > { %v6334_v46 = vpop.f32.mrf.mxu0 }
 0x1b6   : > { %6986 = vst [vmem:[#allocation42_spill] sm:$0xff] %v6334_v46  ;;  %v6336_v31 = vpop.f32.mrf.mxu1 }
 0x1b7   : > { %v4359_v3 = vpop.f32.mrf.mxu0 }
 0x1b8   : > { %v4325_v35 = vpop.f32.mrf.mxu1 }
 0x1b9   : > { %v3268_v50 = vadd.f32 %v4325_v35, %v2973_v53  ;;  %v3450_v5 = vpop.f32.mrf.mxu0  ;;  %v2664_v53 = vadd.f32 %v6230_v43, %v6134_v47  ;;  %v2665_v47 = vadd.f32 %v6238_v10, %v6140_v52  ;;  %v2668_v52 = vadd.f32 %v6246_v7, %v6146_v30 }
 0x1ba   : > { %v3139_v44 = vpop.f32.mrf.mxu1  ;;  %v2669_v30 = vadd.f32 %v6254_v27, %v6152_v41  ;;  %v2672_v41 = vadd.f32 %v6262_v45, %v6158_v61  ;;  %v2673_v61 = vadd.f32 %v6270_v28, %v6164_v16  ;;  %v2676_v16 = vadd.f32 %v6278_v14, %v6170_v11  ;;  %v6991_v11 = vld [vmem:[#allocation7_spill] sm:$0xff] }
 0x1bb   : > { %v3579_v38 = vadd.f32 %v4359_v3, %v3268_v50  ;;  %v3266_v4 = vadd.f32 %v3139_v44, %v2971_v6  ;;  %v4360_v42 = vpop.f32.mrf.mxu0  ;;  %v2975_v21 = vadd.f32 %v6228_v55, %v2664_v53  ;;  %v2978_v50 = vadd.f32 %v6232_v57, %v2667_v18 }
 0x1bc   : > { %v4326_v20 = vpop.f32.mrf.mxu1  ;;  %v2980_v18 = vadd.f32 %v6252_v15, %v2669_v30 }
 0x1bd   : > { %3611 = vst [vmem:[%s6347_s14 + $0x10] sm:$0xff] %v3579_v38  ;;  %v3577_v35 = vadd.f32 %v3450_v5, %v3266_v4  ;;  %v3269_v8 = vadd.f32 %v4326_v20, %v2974_v29  ;;  %v3453_v1 = vpop.f32.mrf.mxu0  ;;  %v2976_v29 = vadd.f32 %v6236_v26, %v2665_v47  ;;  %v2981_v4 = vadd.f32 %v6240_v59, %v2670_v36 }
 0x1be   : > { %v3142_v46 = vpop.f32.mrf.mxu1  ;;  %v2983_v47 = vadd.f32 %v6260_v25, %v2672_v41  ;;  %v2984_v36 = vadd.f32 %v6268_v32, %v2673_v61 }
 0x1bf   : > { %3609 = vst [vmem:[%s6347_s14] sm:$0xff] %v3577_v35  ;;  %v3580_v6 = vadd.f32 %v4360_v42, %v3269_v8  ;;  %v3267_v3 = vadd.f32 %v3142_v46, %v2972_v56  ;;  %v4363_v13 = vpop.f32.mrf.mxu0  ;;  %v2979_v56 = vadd.f32 %v6244_v40, %v2668_v52  ;;  %v2982_v8 = vadd.f32 %v6248_v49, %v2671_v54 }
 0x1c0   : > { %v4329_v24 = vpop.f32.mrf.mxu1 }
 0x1c1   : > { %3612 = vst [vmem:[%s6347_s14 + $0x18] sm:$0xff] %v3580_v6  ;;  %v3578_v5 = vadd.f32 %v3453_v1, %v3267_v3  ;;  %v3272_v43 = vadd.f32 %v4329_v24, %v2977_v34  ;;  %v3466_v58 = vpop.f32.mrf.mxu0 }
 0x1c2   : > { %v3155_v33 = vpop.f32.mrf.mxu1 }
 0x1c3   : > { %3610 = vst [vmem:[%s6347_s14 + $0x8] sm:$0xff] %v3578_v5  ;;  %v3583_v46 = vadd.f32 %v4363_v13, %v3272_v43  ;;  %v3270_v62 = vadd.f32 %v3155_v33, %v2975_v21  ;;  %v4364_v44 = vpop.f32.mrf.mxu0  ;;  %v2985_v13 = vadd.f32 %v6256_v48, %v2674_v9 }
 0x1c4   : > { %v4330_v55 = vpop.f32.mrf.mxu1 }
 0x1c5   : > { %3615 = vst [vmem:[%s6347_s14 + $0x30] sm:$0xff] %v3583_v46  ;;  %v3581_v10 = vadd.f32 %v3466_v58, %v3270_v62  ;;  %v3273_v37 = vadd.f32 %v4330_v55, %v2978_v50  ;;  %v3469_v38 = vpop.f32.mrf.mxu0  ;;  %v2986_v58 = vadd.f32 %v6264_v12, %v2675_v22  ;;  %v6987_v55 = vld [vmem:[#allocation12_spill] sm:$0xff] }
 0x1c6   : > { %v3158_v57 = vpop.f32.mrf.mxu1  ;;  %v2679_v60 = vadd.f32 %v6988_v0, %v6987_v55  ;;  %v7008_v0 = vld [vmem:[#allocation18_spill] sm:$0xff] }
 0x1c7   : > { %3613 = vst [vmem:[%s6347_s14 + $0x20] sm:$0xff] %v3581_v10  ;;  %v3584_v19 = vadd.f32 %v4364_v44, %v3273_v37  ;;  %v3271_v42 = vadd.f32 %v3158_v57, %v2976_v29  ;;  %v4367_v20 = vpop.f32.mrf.mxu0  ;;  %v2989_v44 = vadd.f32 %v6272_v17, %v2678_v39  ;;  %v6989_v37 = vld [vmem:[#allocation20_spill] sm:$0xff]  ;;  %v6990_v57 = vld [vmem:[#allocation11_spill] sm:$0xff] }
 0x1c8   : > { %v4333_v26 = vpop.f32.mrf.mxu1  ;;  %v2677_v14 = vadd.f32 %v6991_v11, %v6990_v57  ;;  %v7011_v11 = vld [vmem:[#allocation19_spill] sm:$0xff] }
 0x1c9   : > { %3616 = vst [vmem:[%s6347_s14 + $0x38] sm:$0xff] %v3584_v19  ;;  %v3582_v7 = vadd.f32 %v3469_v38, %v3271_v42  ;;  %v3276_v53 = vadd.f32 %v4333_v26, %v2981_v4  ;;  %v3482_v35 = vpop.f32.mrf.mxu0  ;;  %v2987_v38 = vadd.f32 %v6989_v37, %v2676_v16  ;;  %v6992_v42 = vld [vmem:[#allocation5_spill] sm:$0xff] }
 0x1ca   : > { %v3171_v59 = vpop.f32.mrf.mxu1  ;;  %v6993_v26 = vld [vmem:[#allocation13_spill] sm:$0xff] }
 0x1cb   : > { %3614 = vst [vmem:[%s6347_s14 + $0x28] sm:$0xff] %v3582_v7  ;;  %v3587_v51 = vadd.f32 %v4367_v20, %v3276_v53  ;;  %v3274_v1 = vadd.f32 %v3171_v59, %v2979_v56  ;;  %v4368_v34 = vpop.f32.mrf.mxu0  ;;  %v2990_v20 = vadd.f32 %v6992_v42, %v2679_v60  ;;  %v6994_v56 = vld [vmem:[#allocation9_spill] sm:$0xff]  ;;  %v7009_v60 = vld [vmem:[#allocation32_spill] sm:$0xff] }
 0x1cc   : > { %v4334_v40 = vpop.f32.mrf.mxu1  ;;  %v2682_v30 = vadd.f32 %v6994_v56, %v6993_v26  ;;  %v7014_v56 = vld [vmem:[#allocation2_spill] sm:$0xff] }
 0x1cd   : > { %3619 = vst [vmem:[%s6347_s14 + $0x50] sm:$0xff] %v3587_v51  ;;  %v3585_v27 = vadd.f32 %v3482_v35, %v3274_v1  ;;  %v3277_v6 = vadd.f32 %v4334_v40, %v2982_v8  ;;  %v3485_v3 = vpop.f32.mrf.mxu0  ;;  %v6995_v8 = vld [vmem:[#allocation8_spill] sm:$0xff]  ;;  %v6996_v51 = vld [vmem:[#allocation14_spill] sm:$0xff] }
 0x1ce   : > { %v3174_v49 = vpop.f32.mrf.mxu1  ;;  %v2988_v9 = vadd.f32 %v6995_v8, %v2677_v14  ;;  %v6997_v1 = vld [vmem:[#allocation24_spill] sm:$0xff]  ;;  %v7012_v14 = vld [vmem:[#allocation34_spill] sm:$0xff] }
 0x1cf   : > { %3617 = vst [vmem:[%s6347_s14 + $0x40] sm:$0xff] %v3585_v27  ;;  %v3588_v63 = vadd.f32 %v4368_v34, %v3277_v6  ;;  %v3275_v24 = vadd.f32 %v3174_v49, %v2980_v18  ;;  %v4371_v21 = vpop.f32.mrf.mxu0  ;;  %v2680_v34 = vadd.f32 %v6997_v1, %v6996_v51  ;;  %v6998_v6 = vld [vmem:[#allocation10_spill] sm:$0xff]  ;;  %v6999_v49 = vld [vmem:[#allocation16_spill] sm:$0xff]  ;;  %v7017_v1 = vld [vmem:[#allocation21_spill] sm:$0xff] }
 0x1d0   : > { %v4337_v15 = vpop.f32.mrf.mxu1 }
 0x1d1   : > { %3620 = vst [vmem:[%s6347_s14 + $0x58] sm:$0xff] %v3588_v63  ;;  %v3586_v45 = vadd.f32 %v3485_v3, %v3275_v24  ;;  %v3280_v5 = vadd.f32 %v4337_v15, %v2985_v13  ;;  %v3498_v43 = vpop.f32.mrf.mxu0  ;;  %v2993_v3 = vadd.f32 %v6998_v6, %v2682_v30  ;;  %v7000_v13 = vld [vmem:[#allocation26_spill] sm:$0xff]  ;;  %v7015_v30 = vld [vmem:[#allocation36_spill] sm:$0xff] }
 0x1d2   : > { %v3187_v48 = vpop.f32.mrf.mxu1  ;;  %v2683_v22 = vadd.f32 %v7000_v13, %v6999_v49  ;;  %v7020_v13 = vld [vmem:[#allocation4_spill] sm:$0xff] }
 0x1d3   : > { %3618 = vst [vmem:[%s6347_s14 + $0x48] sm:$0xff] %v3586_v45  ;;  %v3591_v2 = vadd.f32 %v4371_v21, %v3280_v5  ;;  %v3278_v33 = vadd.f32 %v3187_v48, %v2983_v47  ;;  %v4372_v50 = vpop.f32.mrf.mxu0  ;;  %v7001_v47 = vld [vmem:[#allocation23_spill] sm:$0xff]  ;;  %v7003_v5 = vld [vmem:[#allocation28_spill] sm:$0xff] }
 0x1d4   : > { %v4338_v25 = vpop.f32.mrf.mxu1  ;;  %v2991_v61 = vadd.f32 %v7001_v47, %v2680_v34  ;;  %v7002_v45 = vld [vmem:[#allocation15_spill] sm:$0xff]  ;;  %v7018_v34 = vld [vmem:[#allocation38_spill] sm:$0xff] }
 0x1d5   : > { %3623 = vst [vmem:[%s6347_s14 + $0x70] sm:$0xff] %v3591_v2  ;;  %v3589_v28 = vadd.f32 %v3498_v43, %v3278_v33  ;;  %v3281_v46 = vadd.f32 %v4338_v25, %v2986_v58  ;;  %v3501_v62 = vpop.f32.mrf.mxu0  ;;  %v2681_v43 = vadd.f32 %v7003_v5, %v7002_v45  ;;  %v7004_v33 = vld [vmem:[#allocation25_spill] sm:$0xff]  ;;  %v7023_v5 = vld [vmem:[#allocation22_spill] sm:$0xff] }
 0x1d6   : > { %v3190_v12 = vpop.f32.mrf.mxu1  ;;  %v7005_v25 = vld [vmem:[#allocation17_spill] sm:$0xff] }
 0x1d7   : > { %3621 = vst [vmem:[%s6347_s14 + $0x60] sm:$0xff] %v3589_v28  ;;  %v3592_v29 = vadd.f32 %v4372_v50, %v3281_v46  ;;  %v3279_v52 = vadd.f32 %v3190_v12, %v2984_v36  ;;  %v4375_v10 = vpop.f32.mrf.mxu0  ;;  %v2994_v50 = vadd.f32 %v7004_v33, %v2683_v22  ;;  %v7006_v36 = vld [vmem:[#allocation30_spill] sm:$0xff]  ;;  %v7021_v22 = vld [vmem:[#allocation40_spill] sm:$0xff]  ;;  %v7024_v33 = vld [vmem:[#allocation39_spill] sm:$0xff] }
 0x1d8   : > { %v4341_v32 = vpop.f32.mrf.mxu1  ;;  %v2686_v16 = vadd.f32 %v7006_v36, %v7005_v25  ;;  %v7025_v25 = vld [vmem:[#allocation3_spill] sm:$0xff] }
 0x1d9   : > { %3624 = vst [vmem:[%s6347_s14 + $0x78] sm:$0xff] %v3592_v29  ;;  %v3590_v4 = vadd.f32 %v3501_v62, %v3279_v52  ;;  %v3284_v54 = vadd.f32 %v4341_v32, %v2989_v44  ;;  %v3514_v19 = vpop.f32.mrf.mxu0  ;;  %v7007_v44 = vld [vmem:[#allocation27_spill] sm:$0xff]  ;;  %v2684_v29 = vadd.f32 %v7009_v60, %v7008_v0  ;;  %v2689_v36 = vadd.f32 %v6336_v31, %v7025_v25 }
 0x1da   : > { %v3203_v17 = vpop.f32.mrf.mxu1  ;;  %v2992_v55 = vadd.f32 %v7007_v44, %v2681_v43  ;;  %v2691_v43 = vadd.f32 %v6331_v23, %v7023_v5 }
 0x1db   : > { %3622 = vst [vmem:[%s6347_s14 + $0x68] sm:$0xff] %v3590_v4  ;;  %v3595_v7 = vadd.f32 %v4375_v10, %v3284_v54  ;;  %v3282_v53 = vadd.f32 %v3203_v17, %v2987_v38  ;;  %v4376_v35 = vpop.f32.mrf.mxu0  ;;  %v7010_v38 = vld [vmem:[#allocation29_spill] sm:$0xff]  ;;  %v2687_v4 = vadd.f32 %v7012_v14, %v7011_v11 }
 0x1dc   : > { %v4342_v59 = vpop.f32.mrf.mxu1  ;;  %v2997_v57 = vadd.f32 %v7010_v38, %v2686_v16 }
 0x1dd   : > { %3627 = vst [vmem:[%s6347_s14 + $0x90] sm:$0xff] %v3595_v7  ;;  %v3593_v40 = vadd.f32 %v3514_v19, %v3282_v53  ;;  %v3285_v18 = vadd.f32 %v4342_v59, %v2990_v20  ;;  %v3517_v41 = vpop.f32.mrf.mxu0  ;;  %v7013_v20 = vld [vmem:[#allocation31_spill] sm:$0xff]  ;;  %v2685_v7 = vadd.f32 %v7015_v30, %v7014_v56 }
 0x1de   : > { %v3206_v27 = vpop.f32.mrf.mxu1  ;;  %v2995_v26 = vadd.f32 %v7013_v20, %v2684_v29  ;;  %v7027_v29 = vld [vmem:[#allocation42_spill] sm:$0xff] }
 0x1df   : > { %3625 = vst [vmem:[%s6347_s14 + $0x80] sm:$0xff] %v3593_v40  ;;  %v3596_v63 = vadd.f32 %v4376_v35, %v3285_v18  ;;  %v3283_v24 = vadd.f32 %v3206_v27, %v2988_v9  ;;  %v4379_v21 = vpop.f32.mrf.mxu0  ;;  %v7016_v9 = vld [vmem:[#allocation33_spill] sm:$0xff]  ;;  %v2690_v40 = vadd.f32 %v7018_v34, %v7017_v1 }
 0x1e0   : > { %v4345_v15 = vpop.f32.mrf.mxu1  ;;  %v2998_v51 = vadd.f32 %v7016_v9, %v2687_v4 }
 0x1e1   : > { %3628 = vst [vmem:[%s6347_s14 + $0x98] sm:$0xff] %v3596_v63  ;;  %v3594_v48 = vadd.f32 %v3517_v41, %v3283_v24  ;;  %v3288_v58 = vadd.f32 %v4345_v15, %v2993_v3  ;;  %v3530_v39 = vpop.f32.mrf.mxu0  ;;  %v7019_v3 = vld [vmem:[#allocation35_spill] sm:$0xff]  ;;  %v2688_v63 = vadd.f32 %v7021_v22, %v7020_v13 }
 0x1e2   : > { %v3219_v2 = vpop.f32.mrf.mxu1  ;;  %v2996_v49 = vadd.f32 %v7019_v3, %v2685_v7 }
 0x1e3   : > { %3626 = vst [vmem:[%s6347_s14 + $0x88] sm:$0xff] %v3594_v48  ;;  %v3599_v28 = vadd.f32 %v4379_v21, %v3288_v58  ;;  %v3286_v46 = vadd.f32 %v3219_v2, %v2991_v61  ;;  %v4380_v62 = vpop.f32.mrf.mxu0  ;;  %v7022_v61 = vld [vmem:[#allocation37_spill] sm:$0xff] }
 0x1e4   : > { %v4346_v12 = vpop.f32.mrf.mxu1  ;;  %v3001_v45 = vadd.f32 %v7022_v61, %v2690_v40 }
 0x1e5   : > { %3631 = vst [vmem:[%s6347_s14 + $0xb0] sm:$0xff] %v3599_v28  ;;  %v3597_v52 = vadd.f32 %v3530_v39, %v3286_v46  ;;  %v3289_v10 = vadd.f32 %v4346_v12, %v2994_v50  ;;  %v3533_v32 = vpop.f32.mrf.mxu0  ;;  %v2999_v50 = vadd.f32 %v7024_v33, %v2688_v63  ;;  %v7026_v12 = vld [vmem:[#allocation41_spill] sm:$0xff] }
 0x1e6   : > { %v3222_v37 = vpop.f32.mrf.mxu1  ;;  %v3002_v23 = vadd.f32 %v7026_v12, %v2691_v43 }
 0x1e7   : > { %3629 = vst [vmem:[%s6347_s14 + $0xa0] sm:$0xff] %v3597_v52  ;;  %v3600_v54 = vadd.f32 %v4380_v62, %v3289_v10  ;;  %v3287_v19 = vadd.f32 %v3222_v37, %v2992_v55  ;;  %v4383_v17 = vpop.f32.mrf.mxu0  ;;  %v3000_v52 = vadd.f32 %v7027_v29, %v2689_v36 }
 0x1e8   : > { %v4349_v42 = vpop.f32.mrf.mxu1 }
 0x1e9   : > { %3632 = vst [vmem:[%s6347_s14 + $0xb8] sm:$0xff] %v3600_v54  ;;  %v3598_v53 = vadd.f32 %v3533_v32, %v3287_v19  ;;  %v3292_v35 = vadd.f32 %v4349_v42, %v2997_v57  ;;  %v3546_v59 = vpop.f32.mrf.mxu0 }
 0x1ea   : > { %v3235_v8 = vpop.f32.mrf.mxu1 }
 0x1eb   : > { %3630 = vst [vmem:[%s6347_s14 + $0xa8] sm:$0xff] %v3598_v53  ;;  %v3603_v18 = vadd.f32 %v4383_v17, %v3292_v35  ;;  %v3290_v41 = vadd.f32 %v3235_v8, %v2995_v26  ;;  %v4384_v27 = vpop.f32.mrf.mxu0 }
 0x1ec   : > { %v4350_v6 = vpop.f32.mrf.mxu1 }
 0x1ed   : > { %3635 = vst [vmem:[%s6347_s14 + $0xd0] sm:$0xff] %v3603_v18  ;;  %v3601_v24 = vadd.f32 %v3546_v59, %v3290_v41  ;;  %v3293_v21 = vadd.f32 %v4350_v6, %v2998_v51  ;;  %v3549_v15 = vpop.f32.mrf.mxu0 }
 0x1ee   : > { %v3238_v47 = vpop.f32.mrf.mxu1 }
 0x1ef   : > { %3633 = vst [vmem:[%s6347_s14 + $0xc0] sm:$0xff] %v3601_v24  ;;  %v3604_v48 = vadd.f32 %v4384_v27, %v3293_v21  ;;  %v3291_v58 = vadd.f32 %v3238_v47, %v2996_v49  ;;  %v4387_v39 = vpop.f32.mrf.mxu0 }
 0x1f0   : > { %v4353_v2 = vpop.f32.mrf.mxu1 }
 0x1f1   : > { %3636 = vst [vmem:[%s6347_s14 + $0xd8] sm:$0xff] %v3604_v48  ;;  %v3602_v16 = vadd.f32 %v3549_v15, %v3291_v58  ;;  %v3296_v28 = vadd.f32 %v4353_v2, %v3001_v45  ;;  %v3562_v46 = vpop.f32.mrf.mxu0 }
 0x1f2   : > { %v3251_v62 = vpop.f32.mrf.mxu1 }
 0x1f3   : > { %3634 = vst [vmem:[%s6347_s14 + $0xc8] sm:$0xff] %v3602_v16  ;;  %v3607_v44 = vadd.f32 %v4387_v39, %v3296_v28  ;;  %v3294_v55 = vadd.f32 %v3251_v62, %v2999_v50  ;;  %v4388_v60 = vpop.f32.mrf.mxu0 }
 0x1f4   : > { %v4354_v0 = vpop.f32.mrf.mxu1 }
 0x1f5   : > { %3639 = vst [vmem:[%s6347_s14 + $0xf0] sm:$0xff] %v3607_v44  ;;  %v3605_v10 = vadd.f32 %v3562_v46, %v3294_v55  ;;  %v3297_v31 = vadd.f32 %v4354_v0, %v3002_v23  ;;  %v3565_v57 = vpop.f32.mrf.mxu0 }
 0x1f6   : > { %v3254_v32 = vpop.f32.mrf.mxu1 }
 0x1f7   : > { %3637 = vst [vmem:[%s6347_s14 + $0xe0] sm:$0xff] %v3605_v10  ;;  %v3608_v37 = vadd.f32 %v4388_v60, %v3297_v31  ;;  %v3295_v38 = vadd.f32 %v3254_v32, %v3000_v52 }
 0x1f9   : > { %3640 = vst [vmem:[%s6347_s14 + $0xf8] sm:$0xff] %v3608_v37  ;;  %v3606_v11 = vadd.f32 %v3565_v57, %v3295_v38 }
 0x1fb   : > { %3638 = vst [vmem:[%s6347_s14 + $0xe8] sm:$0xff] %v3606_v11 }
 0x1fc PF: > { %s12_s11 = sadd.s32 1, %s4450_s11   ;;  %s7028_s9 = smov %s4446_s10 }
 0x1fd   : > { %p9_p5 = scmp.ge.s32.totalorder %s12_s11, 4   ;;  %s7029_s10 = smov %s7031_s12 }
 0x1ff   :  { %11 = sbr.rel (!%p9_p5) target bundleno = 2 (0x2), region = 69 }

</bundles_post_ra>
